<compile_context>
chip_gen: v5e
topology: v5e:2x2
jax: 0.10.0
libtpu: 0.0.40
codegen_flags: <defaults>
</compile_context>

<pallas_src>
import functools

import jax
import jax.numpy as jnp
from jax import lax
from jax.experimental import pallas as pl
from jax.experimental.pallas import tpu as pltpu


def _round_up(x, m):
    return (x + m - 1) // m * m


def _chip_info():
    """Best-effort physical VMEM size + device-generation string."""
    vmem_bytes = 128 * 1024 * 1024
    kind = ""
    try:
        vmem_bytes = int(pltpu.get_tpu_info().vmem_capacity_bytes)
    except Exception:
        pass
    try:
        kind = jax.devices()[0].device_kind.lower()
    except Exception:
        pass
    return vmem_bytes, kind


# ---------------------------------------------------------------------------
# Kernel 1: combined kernel = weight + convmap(weight), emitted directly in
# the (k, k, Cin_g*Cout) im2col channel order used by the main conv (bf16).
# The map_k*map_k shifted windows are pre-stacked in XLA, so the body is pure
# full-(8,128)-tile FMA (no sublane-offset slicing), tiled over the lane dim.
# ---------------------------------------------------------------------------
def _weight_kernel(wins_ref, m_ref, base_ref, o_ref, *, map_k, groups):
    acc = base_ref[...].astype(jnp.float32)
    for s in range(groups):
        for di in range(map_k):
            for dj in range(map_k):
                # (k, k, TL) * (1, 1, TL) broadcast FMA -- full lane width.
                acc = acc + wins_ref[s, di, dj] * m_ref[s, di, dj]
    o_ref[...] = acc.astype(o_ref.dtype)


# ---------------------------------------------------------------------------
# Kernel 2: grouped conv2d over the (pre-padded, bf16, NHWC) inputs.
# ---------------------------------------------------------------------------
def _window(x_ref, kh, kw, h_out, w_out, stride, c0, cin_g):
    """(h_out, w_out, cin_g) input window of tap (kh, kw) for one group."""
    if stride == 1:
        return x_ref[0, kh:kh + h_out, kw:kw + w_out, c0:c0 + cin_g]
    # TODO(synk): space-to-batch in the wrapper would avoid strided VMEM reads.
    return x_ref[0, pl.ds(kh, h_out, stride), pl.ds(kw, w_out, stride),
                 c0:c0 + cin_g]


def _conv_tap_kernel(x_ref, w_ref, o_ref, *, h_out, w_out, k, stride, groups,
                     cin_g, cout_tile):
    # Small-Cin_g path: K*K GEMMs (contraction Cin_g) accumulated in f32.
    # No im2col patch scratch and no masked / lane-rotated tap stores; the
    # only store per (batch, group) is the final lane-dense output slab.
    hw = h_out * w_out
    cpg = cout_tile // groups          # groups > 1 implies cout_tile == out_c
    for g in range(groups):
        c0 = g * cin_g
        acc = None
        for kh in range(k):
            for kw in range(k):
                lhs = _window(x_ref, kh, kw, h_out, w_out, stride,
                              c0, cin_g).reshape(hw, cin_g)
                rhs = (w_ref[kh * k + kw] if groups == 1 else
                       w_ref[kh * k + kw, :, g * cpg:(g + 1) * cpg])
                part = jnp.dot(lhs, rhs, preferred_element_type=jnp.float32)
                acc = part if acc is None else acc + part
        if groups == 1:
            o_ref[0] = acc.astype(o_ref.dtype)
        else:
            # Direct per-group store (no concatenate / extra f32 buffer).
            o_ref[0, :, g * cpg:(g + 1) * cpg] = acc.astype(o_ref.dtype)


def _conv_wide_kernel(x_ref, w_ref, o_ref, patch_ref, *, h_out, w_out, k,
                      stride, groups, cin_g, cout_tile):
    # Cin_g % 128 == 0 path: im2col patch built once per batch (cout tile 0);
    # every tap store is lane-aligned (offset t*cin_g is a multiple of 128);
    # one MXU GEMM per group with contraction K*K*Cin_g.
    hw = h_out * w_out
    j = pl.program_id(1)

    @pl.when(j == 0)
    def _build():
        for g in range(groups):
            c0 = g * cin_g
            for kh in range(k):
                for kw in range(k):
                    t = kh * k + kw
                    win = _window(x_ref, kh, kw, h_out, w_out, stride,
                                  c0, cin_g)
                    patch_ref[g, :, t * cin_g:(t + 1) * cin_g] = (
                        win.reshape(hw, cin_g))      # bf16 -> bf16, no cast

    cpg = cout_tile // groups
    for g in range(groups):
        rhs = w_ref[...] if groups == 1 else w_ref[:, g * cpg:(g + 1) * cpg]
        res = jnp.dot(patch_ref[g], rhs, preferred_element_type=jnp.float32)
        if groups == 1:
            o_ref[0] = res.astype(o_ref.dtype)
        else:
            o_ref[0, :, g * cpg:(g + 1) * cpg] = res.astype(o_ref.dtype)


# ---------------------------------------------------------------------------
# Wrapper: full RefConv forward.
# ---------------------------------------------------------------------------
@functools.partial(jax.jit,
                   static_argnames=("stride", "padding", "groups", "map_k"))
def refconv_forward(x_nchw, weight_oihw, convmap_w, *, stride=1, padding=None,
                    groups=1, map_k=3):
    out_c, in_c_g, k, _ = weight_oihw.shape
    in_c = in_c_g * groups
    num2d = out_c * in_c_g                       # == out_c * in_c // groups
    if padding is None:
        padding = k // 2
    phys_vmem, kind = _chip_info()
    is_v5e = ("v5 lite" in kind) or ("v5e" in kind)

    # ---- Step 1: combined kernel = weight + convmap(weight) -------------
    # Lane axis ordered c' = i*out_c + o so the kernel output reshapes for
    # free into the (kh, kw, i, o) im2col layout (no XLA transpose after).
    p = map_k // 2
    cprime = jnp.arange(num2d)
    c_orig = (cprime % out_c) * in_c_g + cprime // out_c     # c' -> o*in_c_g+i
    w2d_pad = jnp.pad(weight_oihw.reshape(num2d, k, k),
                      ((0, 0), (p, p), (p, p)))
    wins_s = []
    for s in range(groups):
        src = (c_orig // groups) * groups + s        # convmap input channels
        w_s = w2d_pad[src]                           # (num2d, k+2p, k+2p)
        taps = []
        for di in range(map_k):
            taps.append(jnp.stack([w_s[:, di:di + k, dj:dj + k]
                                   for dj in range(map_k)], axis=0))
        wins_s.append(jnp.stack(taps, axis=0))       # (mk, mk, num2d, k, k)
    wins = jnp.transpose(jnp.stack(wins_s, axis=0), (0, 1, 2, 4, 5, 3))
    m_arr = jnp.transpose(convmap_w[c_orig],
                          (1, 2, 3, 0))[:, :, :, None, None, :]
    base = jnp.transpose(weight_oihw, (2, 3, 1, 0)).reshape(k, k, num2d)

    lane = _round_up(num2d, 128)                     # full-lane loads/stores
    tl = lane if lane <= 512 else 512                # lane tile for the grid
    lane = _round_up(lane, tl)

    def _pad_lane(a):
        pad_n = lane - a.shape[-1]
        a = a.astype(jnp.float32)
        if pad_n == 0:
            return a
        return jnp.pad(a, [(0, 0)] * (a.ndim - 1) + [(0, pad_n)])

    wins, m_arr, base = _pad_lane(wins), _pad_lane(m_arr), _pad_lane(base)

    w_kkio = pl.pallas_call(
        functools.partial(_weight_kernel, map_k=map_k, groups=groups),
        out_shape=jax.ShapeDtypeStruct((k, k, lane), jnp.bfloat16),
        grid=(lane // tl,),
        in_specs=[
            pl.BlockSpec((groups, map_k, map_k, k, k, tl),
                         lambda t: (0, 0, 0, 0, 0, t)),
            pl.BlockSpec((groups, map_k, map_k, 1, 1, tl),
                         lambda t: (0, 0, 0, 0, 0, t)),
            pl.BlockSpec((k, k, tl), lambda t: (0, 0, t)),
        ],
        out_specs=pl.BlockSpec((k, k, tl), lambda t: (0, 0, t)),
        compiler_params=pltpu.CompilerParams(
            dimension_semantics=("parallel",)),
    )(wins, m_arr, base)
    w_kkio = w_kkio[:, :, :num2d].reshape(k, k, in_c_g, out_c)   # bf16

    # ---- Step 2: grouped conv2d as implicit GEMM ------------------------
    # NCHW->NHWC transpose (needed anyway), bf16 cast and spatial zero pad
    # are one fused XLA pass; the kernel receives the padded bf16 image.
    x_pad = jnp.pad(
        jnp.transpose(x_nchw, (0, 2, 3, 1)).astype(jnp.bfloat16),
        ((0, 0), (padding, padding), (padding, padding), (0, 0)))
    n, hp, wp, _ = x_pad.shape
    h_out = (hp - k) // stride + 1
    w_out = (wp - k) // stride + 1
    hw = h_out * w_out

    # Cout tiling (groups == 1 only): 128 is the v5e-native MXU granule,
    # 256 suits v6e/v7x; fall back to the full Cout for small layers.
    if groups > 1:
        cout_tile = out_c
    else:
        pref = 128 if is_v5e else 256
        if out_c % pref == 0:
            cout_tile = pref
        elif out_c % 128 == 0:
            cout_tile = 128
        else:
            cout_tile = out_c
    n_ct = out_c // cout_tile

    wide = (in_c_g % 128 == 0)
    if wide:
        w_conv = w_kkio.reshape(k * k * in_c_g, out_c)
        w_spec = pl.BlockSpec((k * k * in_c_g, cout_tile), lambda b, j: (0, j))
        scratch = [pltpu.VMEM((groups, hw, k * k * in_c_g), jnp.bfloat16)]
        scratch_b = groups * hw * k * k * in_c_g * 2
        kern = functools.partial(_conv_wide_kernel, h_out=h_out, w_out=w_out,
                                 k=k, stride=stride, groups=groups,
                                 cin_g=in_c_g, cout_tile=cout_tile)
    else:
        w_conv = w_kkio.reshape(k * k, in_c_g, out_c)
        w_spec = pl.BlockSpec((k * k, in_c_g, cout_tile),
                              lambda b, j: (0, 0, j))
        scratch = []
        scratch_b = hw * cout_tile * 4          # f32 accumulator temporaries
        kern = functools.partial(_conv_tap_kernel, h_out=h_out, w_out=w_out,
                                 k=k, stride=stride, groups=groups,
                                 cin_g=in_c_g, cout_tile=cout_tile)

    # Per-chip VMEM budget: at most ~85% of physical (v7x: ~54 of 64 MiB,
    # v5e/v6e: ~108 of 128 MiB), no more than the blocks actually need.
    # TODO(synk): if `needed` exceeds the cap, H-tile the image instead.
    out_dtype = x_nchw.dtype
    out_isz = jnp.dtype(out_dtype).itemsize
    x_blk = hp * wp * in_c * 2
    w_blk = k * k * in_c_g * cout_tile * 2
    o_blk = hw * cout_tile * out_isz
    needed = 2 * (x_blk + w_blk + o_blk) + scratch_b
    vmem_limit = int(max(32 << 20,
                         min(int(phys_vmem * 0.85), needed + (8 << 20))))

    flops = 2 * n * hw * k * k * in_c_g * out_c
    bytes_accessed = (x_pad.size * 2 + w_conv.size * 2 + n * hw * out_c * out_isz)

    out2d = pl.pallas_call(
        kern,
        out_shape=jax.ShapeDtypeStruct((n, hw, out_c), out_dtype),
        grid=(n, n_ct),
        in_specs=[pl.BlockSpec((1, hp, wp, in_c), lambda b, j: (b, 0, 0, 0)),
                  w_spec],
        out_specs=pl.BlockSpec((1, hw, cout_tile), lambda b, j: (b, 0, j)),
        scratch_shapes=scratch,
        compiler_params=pltpu.CompilerParams(
            # Batch is megacore-parallel; the cout axis stays "arbitrary" so
            # the wide path's j==0 im2col patch is reused by later cout tiles.
            # TODO(synk): add an H-tile parallel axis so batch=1 still uses
            # both v7x TensorCores.
            dimension_semantics=("parallel", "arbitrary"),
            vmem_limit_bytes=vmem_limit),
        cost_estimate=pl.CostEstimate(flops=flops, transcendentals=0,
                                      bytes_accessed=bytes_accessed),
    )(x_pad, w_conv)

    out_nhwc = out2d.reshape(n, h_out, w_out, out_c)
    return jnp.transpose(out_nhwc, (0, 3, 1, 2))            # back to NCHW


# ---------------------------------------------------------------------------
# Pure-JAX reference of the same forward (verification only).
# ---------------------------------------------------------------------------
def refconv_reference(x, weight, convmap_w, *, stride, padding, groups, map_k):
    out_c, in_c_g, k, _ = weight.shape
    in_c = in_c_g * groups
    num2d = out_c * in_c // groups
    g_conv = in_c * out_c // (groups * groups)
    origin = weight.reshape(1, num2d, k, k)
    delta = lax.conv_general_dilated(
        origin, convmap_w, (1, 1), [(map_k // 2,) * 2] * 2,
        dimension_numbers=("NCHW", "OIHW", "NCHW"),
        feature_group_count=g_conv, precision=lax.Precision.HIGHEST)
    kernel = weight + delta.reshape(out_c, in_c_g, k, k)
    return lax.conv_general_dilated(
        x, kernel, (stride, stride), [(padding, padding)] * 2,
        dimension_numbers=("NCHW", "OIHW", "NCHW"),
        feature_group_count=groups, precision=lax.Precision.HIGHEST)


if __name__ == "__main__":
    # A: the module's small default config (tap path).  B: grouped path.
    # C: lane-aligned wide path (Cin_g % 128 == 0).
    configs = [
        dict(name="A", n=2, in_c=4, out_c=8, sp=16, groups=1,
             atol=3e-2, rtol=3e-2),
        dict(name="B", n=2, in_c=8, out_c=8, sp=16, groups=2,
             atol=3e-2, rtol=3e-2),
        dict(name="C", n=1, in_c=128, out_c=128, sp=16, groups=1,
             atol=1e-1, rtol=5e-2),
    ]
    K, MAP_K, STRIDE = 3, 3, 1
    key = jax.random.PRNGKey(0)
    for cfg in configs:
        key, kx, kw, km = jax.random.split(key, 4)
        n, in_c, out_c, sp, groups = (cfg["n"], cfg["in_c"], cfg["out_c"],
                                      cfg["sp"], cfg["groups"])
        in_c_g = in_c // groups
        num2d = out_c * in_c // groups
        pad = K // 2
        x = jax.random.normal(kx, (n, in_c, sp, sp), jnp.float32)
        # NOTE: the module registers `weight` as a zero buffer (checkpoint
        # filled); random values here keep the forward non-degenerate.
        weight = 0.1 * jax.random.normal(kw, (out_c, in_c_g, K, K),
                                         jnp.float32)
        convmap_w = 0.1 * jax.random.normal(
            km, (num2d, groups, MAP_K, MAP_K), jnp.float32)

        out = refconv_forward(x, weight, convmap_w, stride=STRIDE,
                              padding=pad, groups=groups, map_k=MAP_K)
        out = jax.block_until_ready(out)
        ref = refconv_reference(x, weight, convmap_w, stride=STRIDE,
                                padding=pad, groups=groups, map_k=MAP_K)
        assert out.shape == ref.shape, (cfg["name"], out.shape, ref.shape)
        max_err = float(jnp.max(jnp.abs(out - ref)))
        # bf16 MXU operands (f32 accumulation) => looser-than-f32 tolerance;
        # config C has a 1152-deep contraction, hence the wider bound.
        assert jnp.allclose(out, ref, atol=cfg["atol"], rtol=cfg["rtol"]), (
            cfg["name"], max_err)
    print("KERNEL_OK")
</pallas_src>

<mosaic_0001>
module attributes {stable_mosaic.version = 11 : i64} {
  func.func @_weight_kernel(%arg0: i32, %arg1: memref<1x3x3x3x3x128xf32, #tpu.memory_space<vmem>>, %arg2: memref<1x3x3x1x1x128xf32, #tpu.memory_space<vmem>>, %arg3: memref<3x3x128xf32, #tpu.memory_space<vmem>>, %arg4: memref<3x3x128xbf16, #tpu.memory_space<vmem>>) attributes {dimension_semantics = [#tpu.dimension_semantics<parallel>], iteration_bounds = array<i64: 1>, scalar_prefetch = 0 : i64, scratch_operands = 0 : i64, tpu.core_type = #tpu.core_type<tc>, window_params = [{transform_indices = @transform_0, window_bounds = array<i64: 1, 3, 3, 3, 3, 128>}, {transform_indices = @transform_1, window_bounds = array<i64: 1, 3, 3, 1, 1, 128>}, {transform_indices = @transform_2, window_bounds = array<i64: 3, 3, 128>}, {transform_indices = @transform_3, window_bounds = array<i64: 3, 3, 128>}]} {
    %c0 = arith.constant 0 : index
    %c0_0 = arith.constant 0 : index
    %c0_1 = arith.constant 0 : index
    %0 = vector.load %arg3[%c0, %c0_0, %c0_1] : memref<3x3x128xf32, #tpu.memory_space<vmem>>, vector<3x3x128xf32>
    %c0_2 = arith.constant 0 : index
    %c0_3 = arith.constant 0 : index
    %c0_4 = arith.constant 0 : index
    %c0_5 = arith.constant 0 : index
    %c0_6 = arith.constant 0 : index
    %c0_7 = arith.constant 0 : index
    %1 = vector.load %arg1[%c0_2, %c0_3, %c0_4, %c0_5, %c0_6, %c0_7] : memref<1x3x3x3x3x128xf32, #tpu.memory_space<vmem>>, vector<1x1x1x3x3x128xf32>
    %2 = vector.shape_cast %1 : vector<1x1x1x3x3x128xf32> to vector<3x3x128xf32>
    %c0_8 = arith.constant 0 : index
    %c0_9 = arith.constant 0 : index
    %c0_10 = arith.constant 0 : index
    %c0_11 = arith.constant 0 : index
    %c0_12 = arith.constant 0 : index
    %c0_13 = arith.constant 0 : index
    %3 = vector.load %arg2[%c0_8, %c0_9, %c0_10, %c0_11, %c0_12, %c0_13] : memref<1x3x3x1x1x128xf32, #tpu.memory_space<vmem>>, vector<1x1x1x1x1x128xf32>
    %4 = vector.shape_cast %3 : vector<1x1x1x1x1x128xf32> to vector<1x1x128xf32>
    %5 = vector.broadcast %4 : vector<1x1x128xf32> to vector<3x3x128xf32>
    %6 = arith.mulf %2, %5 : vector<3x3x128xf32>
    %7 = arith.addf %0, %6 : vector<3x3x128xf32>
    %c0_14 = arith.constant 0 : index
    %c0_15 = arith.constant 0 : index
    %c1 = arith.constant 1 : index
    %c0_16 = arith.constant 0 : index
    %c0_17 = arith.constant 0 : index
    %c0_18 = arith.constant 0 : index
    %8 = vector.load %arg1[%c0_14, %c0_15, %c1, %c0_16, %c0_17, %c0_18] : memref<1x3x3x3x3x128xf32, #tpu.memory_space<vmem>>, vector<1x1x1x3x3x128xf32>
    %9 = vector.shape_cast %8 : vector<1x1x1x3x3x128xf32> to vector<3x3x128xf32>
    %c0_19 = arith.constant 0 : index
    %c0_20 = arith.constant 0 : index
    %c1_21 = arith.constant 1 : index
    %c0_22 = arith.constant 0 : index
    %c0_23 = arith.constant 0 : index
    %c0_24 = arith.constant 0 : index
    %10 = vector.load %arg2[%c0_19, %c0_20, %c1_21, %c0_22, %c0_23, %c0_24] : memref<1x3x3x1x1x128xf32, #tpu.memory_space<vmem>>, vector<1x1x1x1x1x128xf32>
    %11 = vector.shape_cast %10 : vector<1x1x1x1x1x128xf32> to vector<1x1x128xf32>
    %12 = vector.broadcast %11 : vector<1x1x128xf32> to vector<3x3x128xf32>
    %13 = arith.mulf %9, %12 : vector<3x3x128xf32>
    %14 = arith.addf %7, %13 : vector<3x3x128xf32>
    %c0_25 = arith.constant 0 : index
    %c0_26 = arith.constant 0 : index
    %c2 = arith.constant 2 : index
    %c0_27 = arith.constant 0 : index
    %c0_28 = arith.constant 0 : index
    %c0_29 = arith.constant 0 : index
    %15 = vector.load %arg1[%c0_25, %c0_26, %c2, %c0_27, %c0_28, %c0_29] : memref<1x3x3x3x3x128xf32, #tpu.memory_space<vmem>>, vector<1x1x1x3x3x128xf32>
    %16 = vector.shape_cast %15 : vector<1x1x1x3x3x128xf32> to vector<3x3x128xf32>
    %c0_30 = arith.constant 0 : index
    %c0_31 = arith.constant 0 : index
    %c2_32 = arith.constant 2 : index
    %c0_33 = arith.constant 0 : index
    %c0_34 = arith.constant 0 : index
    %c0_35 = arith.constant 0 : index
    %17 = vector.load %arg2[%c0_30, %c0_31, %c2_32, %c0_33, %c0_34, %c0_35] : memref<1x3x3x1x1x128xf32, #tpu.memory_space<vmem>>, vector<1x1x1x1x1x128xf32>
    %18 = vector.shape_cast %17 : vector<1x1x1x1x1x128xf32> to vector<1x1x128xf32>
    %19 = vector.broadcast %18 : vector<1x1x128xf32> to vector<3x3x128xf32>
    %20 = arith.mulf %16, %19 : vector<3x3x128xf32>
    %21 = arith.addf %14, %20 : vector<3x3x128xf32>
    %c0_36 = arith.constant 0 : index
    %c1_37 = arith.constant 1 : index
    %c0_38 = arith.constant 0 : index
    %c0_39 = arith.constant 0 : index
    %c0_40 = arith.constant 0 : index
    %c0_41 = arith.constant 0 : index
    %22 = vector.load %arg1[%c0_36, %c1_37, %c0_38, %c0_39, %c0_40, %c0_41] : memref<1x3x3x3x3x128xf32, #tpu.memory_space<vmem>>, vector<1x1x1x3x3x128xf32>
    %23 = vector.shape_cast %22 : vector<1x1x1x3x3x128xf32> to vector<3x3x128xf32>
    %c0_42 = arith.constant 0 : index
    %c1_43 = arith.constant 1 : index
    %c0_44 = arith.constant 0 : index
    %c0_45 = arith.constant 0 : index
    %c0_46 = arith.constant 0 : index
    %c0_47 = arith.constant 0 : index
    %24 = vector.load %arg2[%c0_42, %c1_43, %c0_44, %c0_45, %c0_46, %c0_47] : memref<1x3x3x1x1x128xf32, #tpu.memory_space<vmem>>, vector<1x1x1x1x1x128xf32>
    %25 = vector.shape_cast %24 : vector<1x1x1x1x1x128xf32> to vector<1x1x128xf32>
    %26 = vector.broadcast %25 : vector<1x1x128xf32> to vector<3x3x128xf32>
    %27 = arith.mulf %23, %26 : vector<3x3x128xf32>
    %28 = arith.addf %21, %27 : vector<3x3x128xf32>
    %c0_48 = arith.constant 0 : index
    %c1_49 = arith.constant 1 : index
    %c1_50 = arith.constant 1 : index
    %c0_51 = arith.constant 0 : index
    %c0_52 = arith.constant 0 : index
    %c0_53 = arith.constant 0 : index
    %29 = vector.load %arg1[%c0_48, %c1_49, %c1_50, %c0_51, %c0_52, %c0_53] : memref<1x3x3x3x3x128xf32, #tpu.memory_space<vmem>>, vector<1x1x1x3x3x128xf32>
    %30 = vector.shape_cast %29 : vector<1x1x1x3x3x128xf32> to vector<3x3x128xf32>
    %c0_54 = arith.constant 0 : index
    %c1_55 = arith.constant 1 : index
    %c1_56 = arith.constant 1 : index
    %c0_57 = arith.constant 0 : index
    %c0_58 = arith.constant 0 : index
    %c0_59 = arith.constant 0 : index
    %31 = vector.load %arg2[%c0_54, %c1_55, %c1_56, %c0_57, %c0_58, %c0_59] : memref<1x3x3x1x1x128xf32, #tpu.memory_space<vmem>>, vector<1x1x1x1x1x128xf32>
    %32 = vector.shape_cast %31 : vector<1x1x1x1x1x128xf32> to vector<1x1x128xf32>
    %33 = vector.broadcast %32 : vector<1x1x128xf32> to vector<3x3x128xf32>
    %34 = arith.mulf %30, %33 : vector<3x3x128xf32>
    %35 = arith.addf %28, %34 : vector<3x3x128xf32>
    %c0_60 = arith.constant 0 : index
    %c1_61 = arith.constant 1 : index
    %c2_62 = arith.constant 2 : index
    %c0_63 = arith.constant 0 : index
    %c0_64 = arith.constant 0 : index
    %c0_65 = arith.constant 0 : index
    %36 = vector.load %arg1[%c0_60, %c1_61, %c2_62, %c0_63, %c0_64, %c0_65] : memref<1x3x3x3x3x128xf32, #tpu.memory_space<vmem>>, vector<1x1x1x3x3x128xf32>
    %37 = vector.shape_cast %36 : vector<1x1x1x3x3x128xf32> to vector<3x3x128xf32>
    %c0_66 = arith.constant 0 : index
    %c1_67 = arith.constant 1 : index
    %c2_68 = arith.constant 2 : index
    %c0_69 = arith.constant 0 : index
    %c0_70 = arith.constant 0 : index
    %c0_71 = arith.constant 0 : index
    %38 = vector.load %arg2[%c0_66, %c1_67, %c2_68, %c0_69, %c0_70, %c0_71] : memref<1x3x3x1x1x128xf32, #tpu.memory_space<vmem>>, vector<1x1x1x1x1x128xf32>
    %39 = vector.shape_cast %38 : vector<1x1x1x1x1x128xf32> to vector<1x1x128xf32>
    %40 = vector.broadcast %39 : vector<1x1x128xf32> to vector<3x3x128xf32>
    %41 = arith.mulf %37, %40 : vector<3x3x128xf32>
    %42 = arith.addf %35, %41 : vector<3x3x128xf32>
    %c0_72 = arith.constant 0 : index
    %c2_73 = arith.constant 2 : index
    %c0_74 = arith.constant 0 : index
    %c0_75 = arith.constant 0 : index
    %c0_76 = arith.constant 0 : index
    %c0_77 = arith.constant 0 : index
    %43 = vector.load %arg1[%c0_72, %c2_73, %c0_74, %c0_75, %c0_76, %c0_77] : memref<1x3x3x3x3x128xf32, #tpu.memory_space<vmem>>, vector<1x1x1x3x3x128xf32>
    %44 = vector.shape_cast %43 : vector<1x1x1x3x3x128xf32> to vector<3x3x128xf32>
    %c0_78 = arith.constant 0 : index
    %c2_79 = arith.constant 2 : index
    %c0_80 = arith.constant 0 : index
    %c0_81 = arith.constant 0 : index
    %c0_82 = arith.constant 0 : index
    %c0_83 = arith.constant 0 : index
    %45 = vector.load %arg2[%c0_78, %c2_79, %c0_80, %c0_81, %c0_82, %c0_83] : memref<1x3x3x1x1x128xf32, #tpu.memory_space<vmem>>, vector<1x1x1x1x1x128xf32>
    %46 = vector.shape_cast %45 : vector<1x1x1x1x1x128xf32> to vector<1x1x128xf32>
    %47 = vector.broadcast %46 : vector<1x1x128xf32> to vector<3x3x128xf32>
    %48 = arith.mulf %44, %47 : vector<3x3x128xf32>
    %49 = arith.addf %42, %48 : vector<3x3x128xf32>
    %c0_84 = arith.constant 0 : index
    %c2_85 = arith.constant 2 : index
    %c1_86 = arith.constant 1 : index
    %c0_87 = arith.constant 0 : index
    %c0_88 = arith.constant 0 : index
    %c0_89 = arith.constant 0 : index
    %50 = vector.load %arg1[%c0_84, %c2_85, %c1_86, %c0_87, %c0_88, %c0_89] : memref<1x3x3x3x3x128xf32, #tpu.memory_space<vmem>>, vector<1x1x1x3x3x128xf32>
    %51 = vector.shape_cast %50 : vector<1x1x1x3x3x128xf32> to vector<3x3x128xf32>
    %c0_90 = arith.constant 0 : index
    %c2_91 = arith.constant 2 : index
    %c1_92 = arith.constant 1 : index
    %c0_93 = arith.constant 0 : index
    %c0_94 = arith.constant 0 : index
    %c0_95 = arith.constant 0 : index
    %52 = vector.load %arg2[%c0_90, %c2_91, %c1_92, %c0_93, %c0_94, %c0_95] : memref<1x3x3x1x1x128xf32, #tpu.memory_space<vmem>>, vector<1x1x1x1x1x128xf32>
    %53 = vector.shape_cast %52 : vector<1x1x1x1x1x128xf32> to vector<1x1x128xf32>
    %54 = vector.broadcast %53 : vector<1x1x128xf32> to vector<3x3x128xf32>
    %55 = arith.mulf %51, %54 : vector<3x3x128xf32>
    %56 = arith.addf %49, %55 : vector<3x3x128xf32>
    %c0_96 = arith.constant 0 : index
    %c2_97 = arith.constant 2 : index
    %c2_98 = arith.constant 2 : index
    %c0_99 = arith.constant 0 : index
    %c0_100 = arith.constant 0 : index
    %c0_101 = arith.constant 0 : index
    %57 = vector.load %arg1[%c0_96, %c2_97, %c2_98, %c0_99, %c0_100, %c0_101] : memref<1x3x3x3x3x128xf32, #tpu.memory_space<vmem>>, vector<1x1x1x3x3x128xf32>
    %58 = vector.shape_cast %57 : vector<1x1x1x3x3x128xf32> to vector<3x3x128xf32>
    %c0_102 = arith.constant 0 : index
    %c2_103 = arith.constant 2 : index
    %c2_104 = arith.constant 2 : index
    %c0_105 = arith.constant 0 : index
    %c0_106 = arith.constant 0 : index
    %c0_107 = arith.constant 0 : index
    %59 = vector.load %arg2[%c0_102, %c2_103, %c2_104, %c0_105, %c0_106, %c0_107] : memref<1x3x3x1x1x128xf32, #tpu.memory_space<vmem>>, vector<1x1x1x1x1x128xf32>
    %60 = vector.shape_cast %59 : vector<1x1x1x1x1x128xf32> to vector<1x1x128xf32>
    %61 = vector.broadcast %60 : vector<1x1x128xf32> to vector<3x3x128xf32>
    %62 = arith.mulf %58, %61 : vector<3x3x128xf32>
    %63 = arith.addf %56, %62 : vector<3x3x128xf32>
    %64 = arith.truncf %63 : vector<3x3x128xf32> to vector<3x3x128xbf16>
    %c0_108 = arith.constant 0 : index
    %c0_109 = arith.constant 0 : index
    %c0_110 = arith.constant 0 : index
    %65 = vector.load %arg4[%c0_108, %c0_109, %c0_110] : memref<3x3x128xbf16, #tpu.memory_space<vmem>>, vector<3x3x128xbf16>
    tpu.vector_store %arg4[%c0_108, %c0_109, %c0_110], %64 {strides = array<i32>} : memref<3x3x128xbf16, #tpu.memory_space<vmem>>, vector<3x3x128xbf16>,
    return
  }
  func.func @transform_0(%arg0: i32) -> (i32, i32, i32, i32, i32, i32) {
    %c0_i32 = arith.constant 0 : i32
    %c0_i32_0 = arith.constant 0 : i32
    %c0_i32_1 = arith.constant 0 : i32
    %c0_i32_2 = arith.constant 0 : i32
    %c0_i32_3 = arith.constant 0 : i32
    %c0_i32_4 = arith.constant 0 : i32
    return %c0_i32, %c0_i32_0, %c0_i32_1, %c0_i32_2, %c0_i32_3, %arg0 : i32, i32, i32, i32, i32, i32
  }
  func.func @transform_1(%arg0: i32) -> (i32, i32, i32, i32, i32, i32) {
    %c0_i32 = arith.constant 0 : i32
    %c0_i32_0 = arith.constant 0 : i32
    %c0_i32_1 = arith.constant 0 : i32
    %c0_i32_2 = arith.constant 0 : i32
    %c0_i32_3 = arith.constant 0 : i32
    %c0_i32_4 = arith.constant 0 : i32
    return %c0_i32, %c0_i32_0, %c0_i32_1, %c0_i32_2, %c0_i32_3, %arg0 : i32, i32, i32, i32, i32, i32
  }
  func.func @transform_2(%arg0: i32) -> (i32, i32, i32) {
    %c0_i32 = arith.constant 0 : i32
    %c0_i32_0 = arith.constant 0 : i32
    %c0_i32_1 = arith.constant 0 : i32
    return %c0_i32, %c0_i32_0, %arg0 : i32, i32, i32
  }
  func.func @transform_3(%arg0: i32) -> (i32, i32, i32) {
    %c0_i32 = arith.constant 0 : i32
    %c0_i32_0 = arith.constant 0 : i32
    %c0_i32_1 = arith.constant 0 : i32
    return %c0_i32, %c0_i32_0, %arg0 : i32, i32, i32
  }
}

module attributes {stable_mosaic.version = 11 : i64} {
  func.func @_conv_tap_kernel(%arg0: i32, %arg1: i32, %arg2: memref<1x18x18x4xbf16, #tpu.memory_space<vmem>>, %arg3: memref<9x4x8xbf16, #tpu.memory_space<vmem>>, %arg4: memref<1x256x8xf32, #tpu.memory_space<vmem>>) attributes {dimension_semantics = [#tpu.dimension_semantics<parallel>, #tpu.dimension_semantics<arbitrary>], iteration_bounds = array<i64: 2, 1>, scalar_prefetch = 0 : i64, scratch_operands = 0 : i64, tpu.core_type = #tpu.core_type<tc>, window_params = [{transform_indices = @transform_0, window_bounds = array<i64: 1, 18, 18, 4>}, {transform_indices = @transform_1, window_bounds = array<i64: 9, 4, 8>}, {transform_indices = @transform_2, window_bounds = array<i64: 1, 256, 8>}]} {
    %c0 = arith.constant 0 : index
    %c0_0 = arith.constant 0 : index
    %c0_1 = arith.constant 0 : index
    %c0_2 = arith.constant 0 : index
    %0 = vector.load %arg2[%c0, %c0_0, %c0_1, %c0_2] : memref<1x18x18x4xbf16, #tpu.memory_space<vmem>>, vector<1x16x16x4xbf16>
    %1 = vector.shape_cast %0 : vector<1x16x16x4xbf16> to vector<16x16x4xbf16>
    %2 = vector.shape_cast %1 : vector<16x16x4xbf16> to vector<256x4xbf16>
    %c0_3 = arith.constant 0 : index
    %c0_4 = arith.constant 0 : index
    %c0_5 = arith.constant 0 : index
    %3 = vector.load %arg3[%c0_3, %c0_4, %c0_5] : memref<9x4x8xbf16, #tpu.memory_space<vmem>>, vector<1x4x8xbf16>
    %4 = vector.shape_cast %3 : vector<1x4x8xbf16> to vector<4x8xbf16>
    %cst = arith.constant dense<0.000000e+00> : vector<256x8xf32>
    %5 = tpu.matmul %2, %4, %cst {dimension_numbers = #tpu.dot_dimension_numbers<[1], [0], [0], [1], [0, 0, 1, 1], [], []>} : vector<256x4xbf16>, vector<4x8xbf16>, vector<256x8xf32> -> vector<256x8xf32>
    %c0_6 = arith.constant 0 : index
    %c0_7 = arith.constant 0 : index
    %c1 = arith.constant 1 : index
    %c0_8 = arith.constant 0 : index
    %6 = vector.load %arg2[%c0_6, %c0_7, %c1, %c0_8] : memref<1x18x18x4xbf16, #tpu.memory_space<vmem>>, vector<1x16x16x4xbf16>
    %7 = vector.shape_cast %6 : vector<1x16x16x4xbf16> to vector<16x16x4xbf16>
    %8 = vector.shape_cast %7 : vector<16x16x4xbf16> to vector<256x4xbf16>
    %c1_9 = arith.constant 1 : index
    %c0_10 = arith.constant 0 : index
    %c0_11 = arith.constant 0 : index
    %9 = vector.load %arg3[%c1_9, %c0_10, %c0_11] : memref<9x4x8xbf16, #tpu.memory_space<vmem>>, vector<1x4x8xbf16>
    %10 = vector.shape_cast %9 : vector<1x4x8xbf16> to vector<4x8xbf16>
    %cst_12 = arith.constant dense<0.000000e+00> : vector<256x8xf32>
    %11 = tpu.matmul %8, %10, %cst_12 {dimension_numbers = #tpu.dot_dimension_numbers<[1], [0], [0], [1], [0, 0, 1, 1], [], []>} : vector<256x4xbf16>, vector<4x8xbf16>, vector<256x8xf32> -> vector<256x8xf32>
    %12 = arith.addf %5, %11 : vector<256x8xf32>
    %c0_13 = arith.constant 0 : index
    %c0_14 = arith.constant 0 : index
    %c2 = arith.constant 2 : index
    %c0_15 = arith.constant 0 : index
    %13 = vector.load %arg2[%c0_13, %c0_14, %c2, %c0_15] : memref<1x18x18x4xbf16, #tpu.memory_space<vmem>>, vector<1x16x16x4xbf16>
    %14 = vector.shape_cast %13 : vector<1x16x16x4xbf16> to vector<16x16x4xbf16>
    %15 = vector.shape_cast %14 : vector<16x16x4xbf16> to vector<256x4xbf16>
    %c2_16 = arith.constant 2 : index
    %c0_17 = arith.constant 0 : index
    %c0_18 = arith.constant 0 : index
    %16 = vector.load %arg3[%c2_16, %c0_17, %c0_18] : memref<9x4x8xbf16, #tpu.memory_space<vmem>>, vector<1x4x8xbf16>
    %17 = vector.shape_cast %16 : vector<1x4x8xbf16> to vector<4x8xbf16>
    %cst_19 = arith.constant dense<0.000000e+00> : vector<256x8xf32>
    %18 = tpu.matmul %15, %17, %cst_19 {dimension_numbers = #tpu.dot_dimension_numbers<[1], [0], [0], [1], [0, 0, 1, 1], [], []>} : vector<256x4xbf16>, vector<4x8xbf16>, vector<256x8xf32> -> vector<256x8xf32>
    %19 = arith.addf %12, %18 : vector<256x8xf32>
    %c0_20 = arith.constant 0 : index
    %c1_21 = arith.constant 1 : index
    %c0_22 = arith.constant 0 : index
    %c0_23 = arith.constant 0 : index
    %20 = vector.load %arg2[%c0_20, %c1_21, %c0_22, %c0_23] : memref<1x18x18x4xbf16, #tpu.memory_space<vmem>>, vector<1x16x16x4xbf16>
    %21 = vector.shape_cast %20 : vector<1x16x16x4xbf16> to vector<16x16x4xbf16>
    %22 = vector.shape_cast %21 : vector<16x16x4xbf16> to vector<256x4xbf16>
    %c3 = arith.constant 3 : index
    %c0_24 = arith.constant 0 : index
    %c0_25 = arith.constant 0 : index
    %23 = vector.load %arg3[%c3, %c0_24, %c0_25] : memref<9x4x8xbf16, #tpu.memory_space<vmem>>, vector<1x4x8xbf16>
    %24 = vector.shape_cast %23 : vector<1x4x8xbf16> to vector<4x8xbf16>
    %cst_26 = arith.constant dense<0.000000e+00> : vector<256x8xf32>
    %25 = tpu.matmul %22, %24, %cst_26 {dimension_numbers = #tpu.dot_dimension_numbers<[1], [0], [0], [1], [0, 0, 1, 1], [], []>} : vector<256x4xbf16>, vector<4x8xbf16>, vector<256x8xf32> -> vector<256x8xf32>
    %26 = arith.addf %19, %25 : vector<256x8xf32>
    %c0_27 = arith.constant 0 : index
    %c1_28 = arith.constant 1 : index
    %c1_29 = arith.constant 1 : index
    %c0_30 = arith.constant 0 : index
    %27 = vector.load %arg2[%c0_27, %c1_28, %c1_29, %c0_30] : memref<1x18x18x4xbf16, #tpu.memory_space<vmem>>, vector<1x16x16x4xbf16>
    %28 = vector.shape_cast %27 : vector<1x16x16x4xbf16> to vector<16x16x4xbf16>
    %29 = vector.shape_cast %28 : vector<16x16x4xbf16> to vector<256x4xbf16>
    %c4 = arith.constant 4 : index
    %c0_31 = arith.constant 0 : index
    %c0_32 = arith.constant 0 : index
    %30 = vector.load %arg3[%c4, %c0_31, %c0_32] : memref<9x4x8xbf16, #tpu.memory_space<vmem>>, vector<1x4x8xbf16>
    %31 = vector.shape_cast %30 : vector<1x4x8xbf16> to vector<4x8xbf16>
    %cst_33 = arith.constant dense<0.000000e+00> : vector<256x8xf32>
    %32 = tpu.matmul %29, %31, %cst_33 {dimension_numbers = #tpu.dot_dimension_numbers<[1], [0], [0], [1], [0, 0, 1, 1], [], []>} : vector<256x4xbf16>, vector<4x8xbf16>, vector<256x8xf32> -> vector<256x8xf32>
    %33 = arith.addf %26, %32 : vector<256x8xf32>
    %c0_34 = arith.constant 0 : index
    %c1_35 = arith.constant 1 : index
    %c2_36 = arith.constant 2 : index
    %c0_37 = arith.constant 0 : index
    %34 = vector.load %arg2[%c0_34, %c1_35, %c2_36, %c0_37] : memref<1x18x18x4xbf16, #tpu.memory_space<vmem>>, vector<1x16x16x4xbf16>
    %35 = vector.shape_cast %34 : vector<1x16x16x4xbf16> to vector<16x16x4xbf16>
    %36 = vector.shape_cast %35 : vector<16x16x4xbf16> to vector<256x4xbf16>
    %c5 = arith.constant 5 : index
    %c0_38 = arith.constant 0 : index
    %c0_39 = arith.constant 0 : index
    %37 = vector.load %arg3[%c5, %c0_38, %c0_39] : memref<9x4x8xbf16, #tpu.memory_space<vmem>>, vector<1x4x8xbf16>
    %38 = vector.shape_cast %37 : vector<1x4x8xbf16> to vector<4x8xbf16>
    %cst_40 = arith.constant dense<0.000000e+00> : vector<256x8xf32>
    %39 = tpu.matmul %36, %38, %cst_40 {dimension_numbers = #tpu.dot_dimension_numbers<[1], [0], [0], [1], [0, 0, 1, 1], [], []>} : vector<256x4xbf16>, vector<4x8xbf16>, vector<256x8xf32> -> vector<256x8xf32>
    %40 = arith.addf %33, %39 : vector<256x8xf32>
    %c0_41 = arith.constant 0 : index
    %c2_42 = arith.constant 2 : index
    %c0_43 = arith.constant 0 : index
    %c0_44 = arith.constant 0 : index
    %41 = vector.load %arg2[%c0_41, %c2_42, %c0_43, %c0_44] : memref<1x18x18x4xbf16, #tpu.memory_space<vmem>>, vector<1x16x16x4xbf16>
    %42 = vector.shape_cast %41 : vector<1x16x16x4xbf16> to vector<16x16x4xbf16>
    %43 = vector.shape_cast %42 : vector<16x16x4xbf16> to vector<256x4xbf16>
    %c6 = arith.constant 6 : index
    %c0_45 = arith.constant 0 : index
    %c0_46 = arith.constant 0 : index
    %44 = vector.load %arg3[%c6, %c0_45, %c0_46] : memref<9x4x8xbf16, #tpu.memory_space<vmem>>, vector<1x4x8xbf16>
    %45 = vector.shape_cast %44 : vector<1x4x8xbf16> to vector<4x8xbf16>
    %cst_47 = arith.constant dense<0.000000e+00> : vector<256x8xf32>
    %46 = tpu.matmul %43, %45, %cst_47 {dimension_numbers = #tpu.dot_dimension_numbers<[1], [0], [0], [1], [0, 0, 1, 1], [], []>} : vector<256x4xbf16>, vector<4x8xbf16>, vector<256x8xf32> -> vector<256x8xf32>
    %47 = arith.addf %40, %46 : vector<256x8xf32>
    %c0_48 = arith.constant 0 : index
    %c2_49 = arith.constant 2 : index
    %c1_50 = arith.constant 1 : index
    %c0_51 = arith.constant 0 : index
    %48 = vector.load %arg2[%c0_48, %c2_49, %c1_50, %c0_51] : memref<1x18x18x4xbf16, #tpu.memory_space<vmem>>, vector<1x16x16x4xbf16>
    %49 = vector.shape_cast %48 : vector<1x16x16x4xbf16> to vector<16x16x4xbf16>
    %50 = vector.shape_cast %49 : vector<16x16x4xbf16> to vector<256x4xbf16>
    %c7 = arith.constant 7 : index
    %c0_52 = arith.constant 0 : index
    %c0_53 = arith.constant 0 : index
    %51 = vector.load %arg3[%c7, %c0_52, %c0_53] : memref<9x4x8xbf16, #tpu.memory_space<vmem>>, vector<1x4x8xbf16>
    %52 = vector.shape_cast %51 : vector<1x4x8xbf16> to vector<4x8xbf16>
    %cst_54 = arith.constant dense<0.000000e+00> : vector<256x8xf32>
    %53 = tpu.matmul %50, %52, %cst_54 {dimension_numbers = #tpu.dot_dimension_numbers<[1], [0], [0], [1], [0, 0, 1, 1], [], []>} : vector<256x4xbf16>, vector<4x8xbf16>, vector<256x8xf32> -> vector<256x8xf32>
    %54 = arith.addf %47, %53 : vector<256x8xf32>
    %c0_55 = arith.constant 0 : index
    %c2_56 = arith.constant 2 : index
    %c2_57 = arith.constant 2 : index
    %c0_58 = arith.constant 0 : index
    %55 = vector.load %arg2[%c0_55, %c2_56, %c2_57, %c0_58] : memref<1x18x18x4xbf16, #tpu.memory_space<vmem>>, vector<1x16x16x4xbf16>
    %56 = vector.shape_cast %55 : vector<1x16x16x4xbf16> to vector<16x16x4xbf16>
    %57 = vector.shape_cast %56 : vector<16x16x4xbf16> to vector<256x4xbf16>
    %c8 = arith.constant 8 : index
    %c0_59 = arith.constant 0 : index
    %c0_60 = arith.constant 0 : index
    %58 = vector.load %arg3[%c8, %c0_59, %c0_60] : memref<9x4x8xbf16, #tpu.memory_space<vmem>>, vector<1x4x8xbf16>
    %59 = vector.shape_cast %58 : vector<1x4x8xbf16> to vector<4x8xbf16>
    %cst_61 = arith.constant dense<0.000000e+00> : vector<256x8xf32>
    %60 = tpu.matmul %57, %59, %cst_61 {dimension_numbers = #tpu.dot_dimension_numbers<[1], [0], [0], [1], [0, 0, 1, 1], [], []>} : vector<256x4xbf16>, vector<4x8xbf16>, vector<256x8xf32> -> vector<256x8xf32>
    %61 = arith.addf %54, %60 : vector<256x8xf32>
    %c0_62 = arith.constant 0 : index
    %c0_63 = arith.constant 0 : index
    %c0_64 = arith.constant 0 : index
    %62 = vector.load %arg4[%c0_62, %c0_63, %c0_64] : memref<1x256x8xf32, #tpu.memory_space<vmem>>, vector<1x256x8xf32>
    %63 = vector.shape_cast %62 : vector<1x256x8xf32> to vector<256x8xf32>
    %64 = vector.shape_cast %61 : vector<256x8xf32> to vector<1x256x8xf32>
    tpu.vector_store %arg4[%c0_62, %c0_63, %c0_64], %64 {strides = array<i32>} : memref<1x256x8xf32, #tpu.memory_space<vmem>>, vector<1x256x8xf32>,
    return
  }
  func.func @transform_0(%arg0: i32, %arg1: i32) -> (i32, i32, i32, i32) {
    %c0_i32 = arith.constant 0 : i32
    %c0_i32_0 = arith.constant 0 : i32
    %c0_i32_1 = arith.constant 0 : i32
    %c0_i32_2 = arith.constant 0 : i32
    return %arg0, %c0_i32, %c0_i32_0, %c0_i32_1 : i32, i32, i32, i32
  }
  func.func @transform_1(%arg0: i32, %arg1: i32) -> (i32, i32, i32) {
    %c0_i32 = arith.constant 0 : i32
    %c0_i32_0 = arith.constant 0 : i32
    %c0_i32_1 = arith.constant 0 : i32
    return %c0_i32, %c0_i32_0, %arg1 : i32, i32, i32
  }
  func.func @transform_2(%arg0: i32, %arg1: i32) -> (i32, i32, i32) {
    %c0_i32 = arith.constant 0 : i32
    %c0_i32_0 = arith.constant 0 : i32
    return %arg0, %c0_i32, %arg1 : i32, i32, i32
  }
}

</mosaic_0001>

<bundles_post_ra>
// kernel: refconv_forward.2
= control target key start
LH: loop header
LB: loop body
LE: loop exit
PB: predicated region body
PF: predicated region fallthrough
CT: control target
= control target key end

     0   :  { %vm153_vm0 = vcmask 1041408   ;;  %vm154_vm1 = vsmask.f32 1280  ;;  %s402_s0 = inlined_call_operand.vmem [shape: f32[1,3,3,3,3,128], index: 0, kind: input, shape index: {}]   ;;  %s403_s1 = inlined_call_operand.vmem [shape: f32[1,3,3,1,1,128], index: 1, kind: input, shape index: {}]   ;;  %s404_s2 = inlined_call_operand.vmem [shape: f32[3,3,128], index: 2, kind: input, shape index: {}]   ;;  %s405_s3 = inlined_call_operand.vmem [shape: bf16[3,3,128], index: 3, kind: output, shape index: {}]  }
   0x1   :  { %v14_v0 = vld [vmem:[%s404_s2] sm:$0x7]  ;;  %v169_v3 = vld [vmem:[%s402_s0 + $0xc] sm:$0x7]  ;;  %v173_v5 = vld [vmem:[%s402_s0 + $0x18] sm:$0x7] }
   0x2   :  { %v17_v1 = vld [vmem:[%s402_s0] sm:$0x7]  ;;  %v177_v9 = vld [vmem:[%s402_s0 + $0x24] sm:$0x7]  ;;  %v204_v10 = vld [vmem:[%s403_s1 + $0x3] ss:$0 sm:$0xff] }
   0x3   :  { %v201_v2 = vld [vmem:[%s403_s1] ss:$0 sm:$0xff]  ;;  %v202_v4 = vld [vmem:[%s403_s1 + $0x1] ss:$0 sm:$0xff]  ;;  %v203_v7 = vld [vmem:[%s403_s1 + $0x2] ss:$0 sm:$0xff]  ;;  %v69_v16 = vmul.f32 %v204_v10, %v177_v9 }
   0x4   :  { %v24_v6 = vmul.f32 %v201_v2, %v17_v1  ;;  %v39_v8 = vmul.f32 %v202_v4, %v169_v3  ;;  %v54_v12 = vmul.f32 %v203_v7, %v173_v5  ;;  %v260_v13 = vld [vmem:[%s403_s1 + $0x4] ss:$0 sm:$0xff]  ;;  %v181_v14 = vld [vmem:[%s402_s0 + $0x30] sm:$0x7]  ;;  %v268_v17 = vld [vmem:[%s403_s1 + $0x5] ss:$0 sm:$0xff] }
   0x5   :  { %v185_v18 = vld [vmem:[%s402_s0 + $0x3c] sm:$0x7]  ;;  %v84_v20 = vmul.f32 %v260_v13, %v181_v14  ;;  %v189_v21 = vld [vmem:[%s402_s0 + $0x48] sm:$0x7]  ;;  %v280_v22 = vld [vmem:[%s403_s1 + $0x6] ss:$0 sm:$0xff] }
   0x6   :  { %v27_v11 = vadd.f32 %v24_v6, %v14_v0  ;;  %v285_v23 = vld [vmem:[%s403_s1 + $0x7] ss:$0 sm:$0xff]  ;;  %v15_v24 = vld [vmem:[%s404_s2 + $0x4] sm:$0x7]  ;;  %v170_v26 = vld [vmem:[%s402_s0 + $0x10] sm:$0x7]  ;;  %v99_v28 = vmul.f32 %v268_v17, %v185_v18  ;;  %v114_v36 = vmul.f32 %v280_v22, %v189_v21 }
   0x7   :  { %v18_v25 = vld [vmem:[%s402_s0 + $0x4] sm:$0x7]  ;;  %v193_v29 = vld [vmem:[%s402_s0 + $0x54] sm:$0x7]  ;;  %v40_v31 = vmul.f32 %v202_v4, %v170_v26  ;;  %v174_v32 = vld [vmem:[%s402_s0 + $0x1c] sm:$0x7] }
   0x8   :  { %v42_v15 = vadd.f32 %v39_v8, %v27_v11  ;;  %v25_v30 = vmul.f32 %v201_v2, %v18_v25  ;;  %v178_v33 = vld [vmem:[%s402_s0 + $0x28] sm:$0x7]  ;;  %v197_v37 = vld [vmem:[%s402_s0 + $0x60] sm:$0x7]  ;;  %v55_v39 = vmul.f32 %v203_v7, %v174_v32  ;;  %v182_v40 = vld [vmem:[%s402_s0 + $0x34] sm:$0x7]  ;;  %v129_v42 = vmul.f32 %v285_v23, %v193_v29 }
   0x9   :  { %v309_v34 = vld [vmem:[%s403_s1 + $0x8] ss:$0 sm:$0xff]  ;;  %v70_v43 = vmul.f32 %v204_v10, %v178_v33  ;;  %v171_v45 = vld [vmem:[%s402_s0 + $0x14] sm:$0x7]  ;;  %v175_v46 = vld [vmem:[%s402_s0 + $0x20] sm:$0x7]  ;;  %v85_v53 = vmul.f32 %v260_v13, %v182_v40 }
   0xa   :  { %v57_v19 = vadd.f32 %v54_v12, %v42_v15  ;;  %v28_v38 = vadd.f32 %v25_v30, %v15_v24  ;;  %v16_v41 = vld [vmem:[%s404_s2 + $0x8] sm:$0x7]  ;;  %v186_v49 = vld [vmem:[%s402_s0 + $0x40] sm:$0x7]  ;;  %v41_v51 = vmul.f32 %v202_v4, %v171_v45  ;;  %v144_v52 = vmul.f32 %v309_v34, %v197_v37  ;;  %v179_v54 = vld [vmem:[%s402_s0 + $0x2c] sm:$0x7] }
   0xb   :  { %v19_v44 = vld [vmem:[%s402_s0 + $0x8] sm:$0x7]  ;;  %v190_v57 = vld [vmem:[%s402_s0 + $0x4c] sm:$0x7]  ;;  %v56_v59 = vmul.f32 %v203_v7, %v175_v46  ;;  %v100_v60 = vmul.f32 %v268_v17, %v186_v49  ;;  %v183_v61 = vld [vmem:[%s402_s0 + $0x38] sm:$0x7] }
   0xc   :  { %v72_v27 = vadd.f32 %v69_v16, %v57_v19  ;;  %v43_v48 = vadd.f32 %v40_v31, %v28_v38  ;;  %v26_v50 = vmul.f32 %v201_v2, %v19_v44  ;;  %v194_v0 = vld [vmem:[%s402_s0 + $0x58] sm:$0x7]  ;;  %v71_v2 = vmul.f32 %v204_v10, %v179_v54  ;;  %v187_v4 = vld [vmem:[%s402_s0 + $0x44] sm:$0x7]  ;;  %vm359_vm2 = vmand %vm153_vm0, %vm154_vm1 }
   0xd   :  { %v115_v3 = vmul.f32 %v280_v22, %v190_v57  ;;  %v198_v7 = vld [vmem:[%s402_s0 + $0x64] sm:$0x7]  ;;  %v86_v9 = vmul.f32 %v260_v13, %v183_v61  ;;  %v156_v10 = vld [vmem:[%s405_s3] sm:$0x3]  ;;  %v130_v12 = vmul.f32 %v285_v23, %v194_v0  ;;  %v191_v14 = vld [vmem:[%s402_s0 + $0x50] sm:$0x7]  ;;  %v101_v13 = vmul.f32 %v268_v17, %v187_v4 }
   0xe   :  { %v87_v35 = vadd.f32 %v84_v20, %v72_v27  ;;  %v58_v56 = vadd.f32 %v55_v39, %v43_v48  ;;  %v29_v58 = vadd.f32 %v26_v50, %v16_v41  ;;  %v145_v19 = vmul.f32 %v309_v34, %v198_v7  ;;  %v195_v20 = vld [vmem:[%s402_s0 + $0x5c] sm:$0x7]  ;;  %v199_v17 = vld [vmem:[%s402_s0 + $0x68] sm:$0x7] }
   0xf   :  { %v116_v26 = vmul.f32 %v280_v22, %v191_v14  ;;  %v131_v29 = vmul.f32 %v285_v23, %v195_v20  ;;  %v146_v32 = vmul.f32 %v309_v34, %v199_v17  ;;  %v159_v22 = vld [vmem:[%s405_s3 + $0x2] sm:$0x3]  ;;  %v162_v23 = vld [vmem:[%s405_s3 + $0x4] sm:$0x3] }
  0x10   :  { %v102_v47 = vadd.f32 %v99_v28, %v87_v35  ;;  %v73_v63 = vadd.f32 %v70_v43, %v58_v56  ;;  %v44_v1 = vadd.f32 %v41_v51, %v29_v58 }
  0x12   :  { %v117_v55 = vadd.f32 %v114_v36, %v102_v47  ;;  %v88_v6 = vadd.f32 %v85_v53, %v73_v63  ;;  %v59_v8 = vadd.f32 %v56_v59, %v44_v1 }
  0x14   :  { %v132_v62 = vadd.f32 %v129_v42, %v117_v55  ;;  %v103_v16 = vadd.f32 %v100_v60, %v88_v6  ;;  %v74_v18 = vadd.f32 %v71_v2, %v59_v8 }
  0x16   :  { %v147_v5 = vadd.f32 %v144_v52, %v132_v62  ;;  %v118_v24 = vadd.f32 %v115_v3, %v103_v16  ;;  %v89_v25 = vadd.f32 %v86_v9, %v74_v18 }
  0x18   :  { %v150_v15 = vpack.c.bf16 %v147_v5, %v147_v5  ;;  %v133_v27 = vadd.f32 %v130_v12, %v118_v24  ;;  %v104_v28 = vadd.f32 %v101_v13, %v89_v25 }
  0x1a   :  { %v157_v21 = vsel %vm359_vm2, %v150_v15, %v156_v10  ;;  %v148_v30 = vadd.f32 %v145_v19, %v133_v27  ;;  %v119_v31 = vadd.f32 %v116_v26, %v104_v28 }
  0x1b   :  { %158 = vst [vmem:[%s405_s3] sm:$0x3] %v157_v21 }
  0x1c   :  { %v151_v33 = vpack.c.bf16 %v148_v30, %v148_v30  ;;  %v134_v35 = vadd.f32 %v131_v29, %v119_v31 }
  0x1e   :  { %v160_v36 = vsel %vm359_vm2, %v151_v33, %v159_v22  ;;  %v149_v37 = vadd.f32 %v146_v32, %v134_v35 }
  0x1f   :  { %161 = vst [vmem:[%s405_s3 + $0x2] sm:$0x3] %v160_v36 }
  0x20   :  { %v152_v38 = vpack.c.bf16 %v149_v37, %v149_v37 }
  0x22   :  { %v163_v34 = vsel %vm359_vm2, %v152_v38, %v162_v23 }
  0x23   :  { %164 = vst [vmem:[%s405_s3 + $0x4] sm:$0x3] %v163_v34 }

// kernel: refconv_forward.3
= control target key start
LH: loop header
LB: loop body
LE: loop exit
PB: predicated region body
PF: predicated region fallthrough
CT: control target
= control target key end

     0   :  { %s4980_s9 = smov 0   ;;  %s4982_s10 = smov 0   ;;  %s6391_s0 = inlined_call_operand.vmem [shape: bf16[2,18,18,4], index: 0, kind: input, shape index: {}]   ;;  %s6392_s1 = inlined_call_operand.vmem [shape: bf16[9,4,8], index: 1, kind: input, shape index: {}]   ;;  %s6393_s2 = inlined_call_operand.vmem [shape: f32[2,256,8], index: 2, kind: output, shape index: {}]  }
   0x1   :  { %s4984_s11 = smov 0  }
   0x2 LB: > { %s24_s12 = sadd.s32 1, %s4959_s10  ;;  %p4224_p0 = scmp.ge.s32.totalorder %s4963_s11, 1  ;;  %s4963_s11 = sphi %s4984_s11, %s12_s11   ;;  %s4959_s10 = sphi %s4982_s10, %s6405_s10   ;;  %s4955_s9 = sphi %s4980_s9, %s6404_s9  }
   0x3   : > { %p26_p1 = scmp.ge.s32.totalorder %s24_s12, 2  ;;  %p135_p2 = scmp.lt.s32.totalorder %s4963_s11, 3 }
   0x5   : > { %s6407_s12 = smov (%p26_p1, %s24_s12), 0  ;;  %p136_p3 = pnand %p4224_p0, %p135_p2 }
   0x7   : > { %139 = sbr.rel (%p136_p3) target bundleno = 755 (0x2f3), region = 28 }
   0xc   : > { %v4228_v0 = vld [vmem:[%s6392_s1 + $0x2] sm:$0x3]  ;;  %vm717_vm0 = vcmask 1041408   ;;  %p164_p4 = scmp.lt.s32.totalorder %s4955_s9, 1  ;;  %v4341_v2 = vld [vmem:[%s6392_s1 + $0x4] sm:$0x3] }
   0xd   : > { %v719_v1 = vsel %vm717_vm0, %v4228_v0, 0  ;;  %v1292_v3 = vsel %vm717_vm0, %v4341_v2, 0  ;;  %v4390_v4 = vld [vmem:[%s6392_s1 + $0x6] sm:$0x3]  ;;  %v214_v5 = vld [vmem:[%s6392_s1] sm:$0x3] }
   0xe   : > { %4863 = vmatpush.bf16.msra.mxu1 %v719_v1  ;;  %4864 = vmatpush.bf16.msra.mxu2 %v719_v1  ;;  %s6409_s9 = smov (!%p164_p4, %s4955_s9), 1  ;;  %v4519_v6 = vld [vmem:[%s6392_s1 + $0x8] sm:$0x3]  ;;  %v1579_v7 = vsel %vm717_vm0, %v4390_v4, 0  ;;  %v939_v8 = vsel %vm717_vm0, %v214_v5, 0  ;;  %vm668_vm4 = vcmask 31744  }
   0xf   : > { %4865 = vmatpush.bf16.msra.mxu3 %v719_v1  ;;  %728 = vmatpush.bf16.msra.mxu0 %v719_v1  ;;  %s4866_s23 = smul.u32 216, %s6409_s9  ;;  %v2233_v9 = vsel %vm717_vm0, %v4519_v6, 0  ;;  %vm231_vm1 = vsmask.f32 3328  ;;  %vm232_vm2 = vsmask.f32 7440 }
  0x10   : > { %vm5036_vm3 = vmor %vm231_vm1, %vm232_vm2  ;;  %vm1078_vm5 = vcmask 1042432   ;;  %vm1079_vm6 = vcmask 1046532   ;;  %s4814_s7 = sshll.u32 %s6409_s9, 8  ;;  %vm4093_vm8 = vcmask 64512  }
  0x11   : > { %s5024_s26 = scalar_lea.vmem %s6391_s0, %s4866_s23  ;;  %vm5210_vm7 = vmor %vm1078_vm5, %vm1079_vm6  ;;  %s6074_s13 = scalar_lea.vmem %s6393_s2, %s4814_s7 }
  0x12   : > { %1301 = vmatpush.bf16.msrb.mxu2 %v1292_v3  ;;  %948 = vmatpush.bf16.msrb.mxu1 %v939_v8  ;;  %v190_v10 = vld [vmem:[%s5024_s26 + $0x30] sm:$0xf]  ;;  %v191_v11 = vld [vmem:[%s5024_s26 + $0x34] sm:$0xf]  ;;  %v219_v12 = vld [vmem:[%s5024_s26 + $0x38] sm:$0x1] }
  0x13   : > { %1588 = vmatpush.bf16.msrb.mxu3 %v1579_v7  ;;  %2242 = vmatpush.bf16.msrb.mxu0 %v2233_v9  ;;  %v331_v13 = vshrl.u32 %v190_v10, 16  ;;  %v334_v14 = vshll.u32 %v190_v10, 16  ;;  %v340_v15 = vshll.u32 %v191_v11, 16  ;;  %v344_v16 = vshrl.u32 %v191_v11, 16  ;;  %v198_v17 = vld [vmem:[%s5024_s26 + $0x60] sm:$0xf] }
  0x14   : > { %v350_v18 = vshll.u32 %v219_v12, 16  ;;  %v199_v19 = vld [vmem:[%s5024_s26 + $0x64] sm:$0xf]  ;;  %v223_v20 = vld [vmem:[%s5024_s26 + $0x68] sm:$0x1]  ;;  %v427_v21 = vshrl.u32 %v198_v17, 16 }
  0x15   : > { %v333_v22 = vrot.slane %v331_v13, 4  ;;  %v336_v23 = vrot.slane %v334_v14, 5  ;;  %v342_v24 = vrot.slane %v340_v15, 5  ;;  %v346_v25 = vrot.slane %v344_v16, 4  ;;  %v206_v26 = vld [vmem:[%s5024_s26 + $0x90] sm:$0xf] }
  0x16   : > { %v352_v27 = vrot.slane %v350_v18, 5  ;;  %v429_v28 = vrot.slane %v427_v21, 4  ;;  %v430_v29 = vshll.u32 %v198_v17, 16  ;;  %v436_v30 = vshll.u32 %v199_v19, 16  ;;  %v207_v35 = vld [vmem:[%s5024_s26 + $0x94] sm:$0xf] }
  0x17   : > { %v337_v31 = vor.u32 %v336_v23, %v333_v22  ;;  %v347_v32 = vor.u32 %v346_v25, %v342_v24  ;;  %v440_v33 = vshrl.u32 %v199_v19, 16  ;;  %v446_v34 = vshll.u32 %v223_v20, 16  ;;  %v227_v45 = vld [vmem:[%s5024_s26 + $0x98] sm:$0x1]  ;;  %v182_v61 = vld [vmem:[%s5024_s26] sm:$0xf] }
  0x18   : > { %v432_v37 = vrot.slane %v430_v29, 5  ;;  %v438_v38 = vrot.slane %v436_v30, 5  ;;  %v523_v39 = vshrl.u32 %v206_v26, 16  ;;  %v526_v47 = vshll.u32 %v206_v26, 16  ;;  %v5049_v1 = vld [vmem:[%s5024_s26 + $0x4] sm:$0xf] }
  0x19   : > { %v338_v40 = vrot.slane %v337_v31, 4  ;;  %v348_v41 = vrot.slane %v347_v32, 4  ;;  %v442_v42 = vrot.slane %v440_v33, 4  ;;  %v448_v43 = vrot.slane %v446_v34, 5  ;;  %v5052_v2 = vld [vmem:[%s5024_s26 + $0x8] sm:$0x1] }
  0x1a   : > { %v433_v44 = vor.u32 %v432_v37, %v429_v28  ;;  %v525_v46 = vrot.slane %v523_v39, 4  ;;  %v532_v48 = vshll.u32 %v207_v35, 16  ;;  %v536_v52 = vshrl.u32 %v207_v35, 16  ;;  %v192_v19 = vld [vmem:[%s5024_s26 + $0x3c] sm:$0xf] }
  0x1b   : > { %v343_v49 = vsel %vm5036_vm3, %v338_v40, %v342_v24  ;;  %v353_v50 = vsel %vm5036_vm3, %v348_v41, %v352_v27  ;;  %v443_v51 = vor.u32 %v442_v42, %v438_v38  ;;  %v528_v56 = vrot.slane %v526_v47, 5  ;;  %v5064_v20 = vld [vmem:[%s5024_s26 + $0x40] sm:$0xf]  ;;  %v5069_v25 = vld [vmem:[%s5024_s26 + $0x44] sm:$0x1] }
  0x1c   : > { %v628_v53 = vunpack.c.l.b16 %v343_v49  ;;  %v629_v54 = vunpack.c.l.b16 %v353_v50  ;;  %v434_v55 = vrot.slane %v433_v44, 4  ;;  %v534_v58 = vrot.slane %v532_v48, 5  ;;  %v200_v33 = vld [vmem:[%s5024_s26 + $0x6c] sm:$0xf]  ;;  %v224_v47 = vld [vmem:[%s5024_s26 + $0x74] sm:$0x1] }
  0x1d   : > { %v444_v57 = vrot.slane %v443_v51, 4  ;;  %v538_v59 = vrot.slane %v536_v52, 4  ;;  %v542_v60 = vshll.u32 %v227_v45, 16  ;;  %v529_v0 = vor.u32 %v528_v56, %v525_v46 }
  0x1e   : > { %v656_v62 = vpack.c.b16 %v629_v54, %v628_v53  ;;  %v439_v63 = vsel %vm5036_vm3, %v434_v55, %v438_v38  ;;  %v235_v9 = vshrl.u32 %v182_v61, 16  ;;  %v238_v10 = vshll.u32 %v182_v61, 16  ;;  %v208_v61 = vld [vmem:[%s5024_s26 + $0x9c] sm:$0xf] }
  0x1f   : > { %v449_v3 = vsel %vm5036_vm3, %v444_v57, %v448_v43  ;;  %v636_v4 = vunpack.c.l.b16 %v439_v63  ;;  %v539_v5 = vor.u32 %v538_v59, %v534_v58  ;;  %v544_v6 = vrot.slane %v542_v60, 5  ;;  %v201_v43 = vld [vmem:[%s5024_s26 + $0x70] sm:$0xf] }
  0x20   : > { %4233 = vmatmul.msk.bf16.vlgmr.msra.gmra.mxu1 %vm668_vm4, %v656_v62  ;;  %v637_v7 = vunpack.c.l.b16 %v449_v3  ;;  %v530_v8 = vrot.slane %v529_v0, 4  ;;  %v244_v12 = vshll.u32 %v5049_v1, 16  ;;  %v248_v13 = vshrl.u32 %v5049_v1, 16  ;;  %v209_v3 = vld [vmem:[%s5024_s26 + $0xa0] sm:$0xf] }
  0x21   : > { %v540_v11 = vrot.slane %v539_v5, 4  ;;  %v254_v14 = vshll.u32 %v5052_v2, 16  ;;  %v237_v17 = vrot.slane %v235_v9, 4  ;;  %v240_v18 = vrot.slane %v238_v10, 5 }
  0x22   : > { %v660_v15 = vpack.c.b16 %v637_v7, %v636_v4  ;;  %v535_v16 = vsel %vm5036_vm3, %v530_v8, %v534_v58  ;;  %v246_v23 = vrot.slane %v244_v12, 5  ;;  %v250_v24 = vrot.slane %v248_v13, 4  ;;  %v228_v8 = vld [vmem:[%s5024_s26 + $0xa4] sm:$0x1] }
  0x23   : > { %v545_v21 = vsel %vm5036_vm3, %v540_v11, %v544_v6  ;;  %v644_v22 = vunpack.c.l.b16 %v535_v16  ;;  %v241_v27 = vor.u32 %v240_v18, %v237_v17  ;;  %v256_v28 = vrot.slane %v254_v14, 5 }
  0x24   : > { %4237 = vmatmul.msk.bf16.vlgmr.msra.gmra.mxu2 %vm668_vm4, %v660_v15  ;;  %v645_v26 = vunpack.c.l.b16 %v545_v21  ;;  %v251_v29 = vor.u32 %v250_v24, %v246_v23  ;;  %v355_v30 = vshrl.u32 %v192_v19, 16  ;;  %v358_v31 = vshll.u32 %v192_v19, 16 }
  0x25   : > { %v364_v32 = vshll.u32 %v5064_v20, 16  ;;  %v242_v35 = vrot.slane %v241_v27, 4  ;;  %v368_v37 = vshrl.u32 %v5064_v20, 16  ;;  %v374_v38 = vshll.u32 %v5069_v25, 16 }
  0x26   : > { %v664_v34 = vpack.c.b16 %v645_v26, %v644_v22  ;;  %v252_v39 = vrot.slane %v251_v29, 4  ;;  %v357_v40 = vrot.slane %v355_v30, 4  ;;  %v360_v41 = vrot.slane %v358_v31, 5  ;;  %v184_v22 = vld [vmem:[%s5024_s26 + $0xc] sm:$0xf] }
  0x27   : > { %v366_v42 = vrot.slane %v364_v32, 5  ;;  %v247_v44 = vsel %vm5036_vm3, %v242_v35, %v246_v23  ;;  %v370_v45 = vrot.slane %v368_v37, 4  ;;  %v376_v46 = vrot.slane %v374_v38, 5  ;;  %v5098_v32 = vld [vmem:[%s5024_s26 + $0x14] sm:$0x1] }
  0x28   : > { %4241 = vmatmul.msk.bf16.vlgmr.msra.gmra.mxu3 %vm668_vm4, %v664_v34  ;;  %v451_v48 = vshrl.u32 %v200_v33, 16  ;;  %v257_v49 = vsel %vm5036_vm3, %v252_v39, %v256_v28  ;;  %v620_v50 = vunpack.c.l.b16 %v247_v44  ;;  %v361_v51 = vor.u32 %v360_v41, %v357_v40  ;;  %v5095_v28 = vld [vmem:[%s5024_s26 + $0x10] sm:$0xf] }
  0x29   : > { %v454_v52 = vshll.u32 %v200_v33, 16  ;;  %v621_v53 = vunpack.c.l.b16 %v257_v49  ;;  %v371_v54 = vor.u32 %v370_v45, %v366_v42  ;;  %v460_v56 = vshll.u32 %v201_v43, 16 }
  0x2a   : > { %v453_v55 = vrot.slane %v451_v48, 4  ;;  %v362_v57 = vrot.slane %v361_v51, 4  ;;  %v464_v59 = vshrl.u32 %v201_v43, 16  ;;  %v470_v60 = vshll.u32 %v224_v47, 16  ;;  %v5108_v47 = vld [vmem:[%s5024_s26 + $0x4c] sm:$0xf] }
  0x2b   : > { %v456_v58 = vrot.slane %v454_v52, 5  ;;  %v652_v62 = vpack.c.b16 %v621_v53, %v620_v50  ;;  %v372_v63 = vrot.slane %v371_v54, 4  ;;  %v462_v0 = vrot.slane %v460_v56, 5  ;;  %v5113_v56 = vld [vmem:[%s5024_s26 + $0x50] sm:$0x1] }
  0x2c   : > { %v367_v4 = vsel %vm5036_vm3, %v362_v57, %v366_v42  ;;  %v466_v6 = vrot.slane %v464_v59, 4  ;;  %v472_v7 = vrot.slane %v470_v60, 5  ;;  %v547_v11 = vshrl.u32 %v208_v61, 16  ;;  %v194_v42 = vld [vmem:[%s5024_s26 + $0x48] sm:$0xf] }
  0x2d   : > { %v457_v5 = vor.u32 %v456_v58, %v453_v55  ;;  %4229 = vmatmul.msk.bf16.vlgmr.msra.gmra.mxu0 %vm668_vm4, %v652_v62  ;;  %v377_v9 = vsel %vm5036_vm3, %v372_v63, %v376_v46  ;;  %v630_v10 = vunpack.c.l.b16 %v367_v4  ;;  %v550_v12 = vshll.u32 %v208_v61, 16 }
  0x2e   : > { %v631_v13 = vunpack.c.l.b16 %v377_v9  ;;  %v467_v15 = vor.u32 %v466_v6, %v462_v0  ;;  %v556_v16 = vshll.u32 %v209_v3, 16  ;;  %v549_v17 = vrot.slane %v547_v11, 4 }
  0x2f   : > { %v458_v14 = vrot.slane %v457_v5, 4  ;;  %v552_v18 = vrot.slane %v550_v12, 5  ;;  %v560_v19 = vshrl.u32 %v209_v3, 16  ;;  %v566_v21 = vshll.u32 %v228_v8, 16  ;;  %v202_v3 = vld [vmem:[%s5024_s26 + $0x78] sm:$0xf] }
  0x30   : > { %v657_v23 = vpack.c.b16 %v631_v13, %v630_v10  ;;  %v468_v26 = vrot.slane %v467_v15, 4  ;;  %v558_v27 = vrot.slane %v556_v16, 5  ;;  %v259_v35 = vshrl.u32 %v184_v22, 16  ;;  %v203_v8 = vld [vmem:[%s5024_s26 + $0x7c] sm:$0xf] }
  0x31   : > { %v463_v24 = vsel %vm5036_vm3, %v458_v14, %v462_v0  ;;  %v553_v30 = vor.u32 %v552_v18, %v549_v17  ;;  %v562_v31 = vrot.slane %v560_v19, 4  ;;  %v568_v34 = vrot.slane %v566_v21, 5  ;;  %v225_v16 = vld [vmem:[%s5024_s26 + $0x80] sm:$0x1] }
  0x32   : > { %v638_v29 = vunpack.c.l.b16 %v463_v24  ;;  %4234 = vmatmul.msk.bf16.gmra.mxu1 %vm668_vm4, %v657_v23  ;;  %v473_v33 = vsel %vm5036_vm3, %v468_v26, %v472_v7  ;;  %v262_v37 = vshll.u32 %v184_v22, 16  ;;  %v268_v41 = vshll.u32 %v5095_v28, 16 }
  0x33   : > { %v639_v38 = vunpack.c.l.b16 %v473_v33  ;;  %v554_v39 = vrot.slane %v553_v30, 4  ;;  %v563_v40 = vor.u32 %v562_v31, %v558_v27  ;;  %v261_v43 = vrot.slane %v259_v35, 4 }
  0x34   : > { %v264_v44 = vrot.slane %v262_v37, 5  ;;  %v272_v45 = vshrl.u32 %v5095_v28, 16  ;;  %v278_v46 = vshll.u32 %v5098_v32, 16  ;;  %v270_v51 = vrot.slane %v268_v41, 5 }
  0x35   : > { %v661_v48 = vpack.c.b16 %v639_v38, %v638_v29  ;;  %v559_v49 = vsel %vm5036_vm3, %v554_v39, %v558_v27  ;;  %v564_v50 = vrot.slane %v563_v40, 4  ;;  %v379_v58 = vshrl.u32 %v194_v42, 16  ;;  %v211_v39 = vld [vmem:[%s5024_s26 + $0xac] sm:$0xf]  ;;  %v229_v40 = vld [vmem:[%s5024_s26 + $0xb0] sm:$0x1] }
  0x36   : > { %v646_v52 = vunpack.c.l.b16 %v559_v49  ;;  %v265_v53 = vor.u32 %v264_v44, %v261_v43  ;;  %v274_v54 = vrot.slane %v272_v45, 4  ;;  %v280_v55 = vrot.slane %v278_v46, 5 }
  0x37   : > { %4238 = vmatmul.msk.bf16.gmra.mxu2 %vm668_vm4, %v661_v48  ;;  %v569_v57 = vsel %vm5036_vm3, %v564_v50, %v568_v34  ;;  %v382_v59 = vshll.u32 %v194_v42, 16  ;;  %v388_v60 = vshll.u32 %v5108_v47, 16  ;;  %v392_v0 = vshrl.u32 %v5108_v47, 16  ;;  %v210_v34 = vld [vmem:[%s5024_s26 + $0xa8] sm:$0xf] }
  0x38   : > { %v647_v61 = vunpack.c.l.b16 %v569_v57  ;;  %v266_v62 = vrot.slane %v265_v53, 4  ;;  %v275_v63 = vor.u32 %v274_v54, %v270_v51  ;;  %v381_v4 = vrot.slane %v379_v58, 4 }
  0x39   : > { %v384_v5 = vrot.slane %v382_v59, 5  ;;  %v390_v6 = vrot.slane %v388_v60, 5  ;;  %v398_v7 = vshll.u32 %v5113_v56, 16  ;;  %v394_v12 = vrot.slane %v392_v0, 4  ;;  %v186_v59 = vld [vmem:[%s5024_s26 + $0x18] sm:$0xf] }
  0x3a   : > { %v665_v9 = vpack.c.b16 %v647_v61, %v646_v52  ;;  %v271_v10 = vsel %vm5036_vm3, %v266_v62, %v270_v51  ;;  %v276_v11 = vrot.slane %v275_v63, 4  ;;  %v475_v17 = vshrl.u32 %v202_v3, 16  ;;  %v5141_v63 = vld [vmem:[%s5024_s26 + $0x1c] sm:$0xf]  ;;  %v5144_v0 = vld [vmem:[%s5024_s26 + $0x20] sm:$0x1] }
  0x3b   : > { %v622_v13 = vunpack.c.l.b16 %v271_v10  ;;  %v385_v14 = vor.u32 %v384_v5, %v381_v4  ;;  %v400_v15 = vrot.slane %v398_v7, 5  ;;  %v395_v19 = vor.u32 %v394_v12, %v390_v6 }
  0x3c   : > { %4242 = vmatmul.msk.bf16.gmra.mxu3 %vm668_vm4, %v665_v9  ;;  %v281_v18 = vsel %vm5036_vm3, %v276_v11, %v280_v55  ;;  %v478_v21 = vshll.u32 %v202_v3, 16  ;;  %v484_v22 = vshll.u32 %v203_v8, 16  ;;  %v477_v26 = vrot.slane %v475_v17, 4 }
  0x3d   : > { %v623_v23 = vunpack.c.l.b16 %v281_v18  ;;  %v386_v24 = vrot.slane %v385_v14, 4  ;;  %v488_v27 = vshrl.u32 %v203_v8, 16  ;;  %v396_v29 = vrot.slane %v395_v19, 4 }
  0x3e   : > { %v480_v30 = vrot.slane %v478_v21, 5  ;;  %v486_v31 = vrot.slane %v484_v22, 5  ;;  %v494_v33 = vshll.u32 %v225_v16, 16  ;;  %v571_v48 = vshrl.u32 %v210_v34, 16  ;;  %v5154_v21 = vld [vmem:[%s5024_s26 + $0x58] sm:$0xf] }
  0x3f   : > { %v653_v35 = vpack.c.b16 %v623_v23, %v622_v13  ;;  %v391_v37 = vsel %vm5036_vm3, %v386_v24, %v390_v6  ;;  %v490_v38 = vrot.slane %v488_v27, 4  ;;  %v401_v41 = vsel %vm5036_vm3, %v396_v29, %v400_v15  ;;  %v196_v15 = vld [vmem:[%s5024_s26 + $0x54] sm:$0xf]  ;;  %v5159_v27 = vld [vmem:[%s5024_s26 + $0x5c] sm:$0x1] }
  0x40   : > { %v632_v42 = vunpack.c.l.b16 %v391_v37  ;;  %v481_v43 = vor.u32 %v480_v30, %v477_v26  ;;  %v496_v44 = vrot.slane %v494_v33, 5  ;;  %v633_v45 = vunpack.c.l.b16 %v401_v41 }
  0x41   : > { %4230 = vmatmul.msk.bf16.gmra.mxu0 %vm668_vm4, %v653_v35  ;;  %v491_v46 = vor.u32 %v490_v38, %v486_v31  ;;  %v574_v49 = vshll.u32 %v210_v34, 16  ;;  %v580_v51 = vshll.u32 %v211_v39, 16  ;;  %v584_v52 = vshrl.u32 %v211_v39, 16  ;;  %v204_v39 = vld [vmem:[%s5024_s26 + $0x84] sm:$0xf] }
  0x42   : > { %v482_v50 = vrot.slane %v481_v43, 4  ;;  %v590_v53 = vshll.u32 %v229_v40, 16  ;;  %v658_v54 = vpack.c.b16 %v633_v45, %v632_v42  ;;  %v573_v57 = vrot.slane %v571_v48, 4 }
  0x43   : > { %v492_v55 = vrot.slane %v491_v46, 4  ;;  %v576_v58 = vrot.slane %v574_v49, 5  ;;  %v582_v61 = vrot.slane %v580_v51, 5  ;;  %v586_v62 = vrot.slane %v584_v52, 4  ;;  %v205_v49 = vld [vmem:[%s5024_s26 + $0x88] sm:$0xf] }
  0x44   : > { %v487_v60 = vsel %vm5036_vm3, %v482_v50, %v486_v31  ;;  %4235 = vmatmul.msk.bf16.gmra.mxu1 %vm668_vm4, %v658_v54  ;;  %v592_v6 = vrot.slane %v590_v53, 5  ;;  %v283_v9 = vshrl.u32 %v186_v59, 16  ;;  %v286_v10 = vshll.u32 %v186_v59, 16  ;;  %v226_v53 = vld [vmem:[%s5024_s26 + $0x8c] sm:$0x1] }
  0x45   : > { %v497_v3 = vsel %vm5036_vm3, %v492_v55, %v496_v44  ;;  %v640_v4 = vunpack.c.l.b16 %v487_v60  ;;  %v577_v5 = vor.u32 %v576_v58, %v573_v57  ;;  %v587_v8 = vor.u32 %v586_v62, %v582_v61 }
  0x46   : > { %v641_v7 = vunpack.c.l.b16 %v497_v3  ;;  %v292_v12 = vshll.u32 %v5141_v63, 16  ;;  %v296_v13 = vshrl.u32 %v5141_v63, 16  ;;  %v302_v14 = vshll.u32 %v5144_v0, 16 }
  0x47   : > { %v578_v11 = vrot.slane %v577_v5, 4  ;;  %v588_v17 = vrot.slane %v587_v8, 4  ;;  %v285_v18 = vrot.slane %v283_v9, 4  ;;  %v288_v19 = vrot.slane %v286_v10, 5  ;;  %v212_v8 = vld [vmem:[%s5024_s26 + $0xb4] sm:$0xf] }
  0x48   : > { %v662_v16 = vpack.c.b16 %v641_v7, %v640_v4  ;;  %v294_v23 = vrot.slane %v292_v12, 5  ;;  %v298_v24 = vrot.slane %v296_v13, 4  ;;  %v304_v26 = vrot.slane %v302_v14, 5  ;;  %v213_v12 = vld [vmem:[%s5024_s26 + $0xb8] sm:$0xf] }
  0x49   : > { %v583_v22 = vsel %vm5036_vm3, %v578_v11, %v582_v61  ;;  %v593_v29 = vsel %vm5036_vm3, %v588_v17, %v592_v6  ;;  %v289_v31 = vor.u32 %v288_v19, %v285_v18  ;;  %v403_v33 = vshrl.u32 %v196_v15, 16  ;;  %v230_v17 = vld [vmem:[%s5024_s26 + $0xbc] sm:$0x1] }
  0x4a   : > { %4239 = vmatmul.msk.bf16.gmra.mxu2 %vm668_vm4, %v662_v16  ;;  %v648_v30 = vunpack.c.l.b16 %v583_v22  ;;  %v649_v34 = vunpack.c.l.b16 %v593_v29  ;;  %v299_v35 = vor.u32 %v298_v24, %v294_v23  ;;  %v406_v37 = vshll.u32 %v196_v15, 16 }
  0x4b   : > { %v412_v38 = vshll.u32 %v5154_v21, 16  ;;  %v290_v40 = vrot.slane %v289_v31, 4  ;;  %v405_v41 = vrot.slane %v403_v33, 4  ;;  %v416_v42 = vshrl.u32 %v5154_v21, 16 }
  0x4c   : > { %v422_v43 = vshll.u32 %v5159_v27, 16  ;;  %v666_v44 = vpack.c.b16 %v649_v34, %v648_v30  ;;  %v300_v45 = vrot.slane %v299_v35, 4  ;;  %v408_v46 = vrot.slane %v406_v37, 5  ;;  %v188_v37 = vld [vmem:[%s5024_s26 + $0x24] sm:$0xf] }
  0x4d   : > { %v414_v48 = vrot.slane %v412_v38, 5  ;;  %v295_v50 = vsel %vm5036_vm3, %v290_v40, %v294_v23  ;;  %v418_v51 = vrot.slane %v416_v42, 4  ;;  %v499_v54 = vshrl.u32 %v204_v39, 16  ;;  %v5187_v42 = vld [vmem:[%s5024_s26 + $0x28] sm:$0xf] }
  0x4e   : > { %v424_v52 = vrot.slane %v422_v43, 5  ;;  %4243 = vmatmul.msk.bf16.gmra.mxu3 %vm668_vm4, %v666_v44  ;;  %v305_v55 = vsel %vm5036_vm3, %v300_v45, %v304_v26  ;;  %v624_v57 = vunpack.c.l.b16 %v295_v50  ;;  %v409_v58 = vor.u32 %v408_v46, %v405_v41 }
  0x4f   : > { %v502_v59 = vshll.u32 %v204_v39, 16  ;;  %v625_v60 = vunpack.c.l.b16 %v305_v55  ;;  %v419_v61 = vor.u32 %v418_v51, %v414_v48  ;;  %v501_v62 = vrot.slane %v499_v54, 4 }
  0x50   : > { %v508_v3 = vshll.u32 %v205_v49, 16  ;;  %v410_v4 = vrot.slane %v409_v58, 4  ;;  %v512_v6 = vshrl.u32 %v205_v49, 16  ;;  %v518_v7 = vshll.u32 %v226_v53, 16 }
  0x51   : > { %v504_v5 = vrot.slane %v502_v59, 5  ;;  %v654_v9 = vpack.c.b16 %v625_v60, %v624_v57  ;;  %v420_v10 = vrot.slane %v419_v61, 4  ;;  %v595_v22 = vshrl.u32 %v212_v8, 16  ;;  %v1030_v61 = vld [vmem:[%s5024_s26] sm:$0xe] }
  0x52   : > { %v510_v11 = vrot.slane %v508_v3, 5  ;;  %v415_v13 = vsel %vm5036_vm3, %v410_v4, %v414_v48  ;;  %v514_v15 = vrot.slane %v512_v6, 4  ;;  %v520_v16 = vrot.slane %v518_v7, 5  ;;  %v5191_v48 = vld [vmem:[%s5024_s26 + $0x2c] sm:$0x1] }
  0x53   : > { %v505_v14 = vor.u32 %v504_v5, %v501_v62  ;;  %4231 = vmatmul.msk.bf16.gmra.mxu0 %vm668_vm4, %v654_v9  ;;  %v425_v18 = vsel %vm5036_vm3, %v420_v10, %v424_v52  ;;  %v634_v19 = vunpack.c.l.b16 %v415_v13  ;;  %v598_v23 = vshll.u32 %v212_v8, 16  ;;  %v4471_v6 = vld [vmem:[%s5024_s26 + $0xc] sm:$0xf] }
  0x54   : > { %v635_v24 = vunpack.c.l.b16 %v425_v18  ;;  %v515_v29 = vor.u32 %v514_v15, %v510_v11  ;;  %v604_v30 = vshll.u32 %v213_v12, 16  ;;  %v597_v31 = vrot.slane %v595_v22, 4 }
  0x55   : > { %v506_v26 = vrot.slane %v505_v14, 4  ;;  %v600_v33 = vrot.slane %v598_v23, 5  ;;  %v608_v34 = vshrl.u32 %v213_v12, 16  ;;  %v614_v35 = vshll.u32 %v230_v17, 16  ;;  %v4472_v12 = vld [vmem:[%s5024_s26 + $0x10] sm:$0xf] }
  0x56   : > { %v659_v38 = vpack.c.b16 %v635_v24, %v634_v19  ;;  %v516_v40 = vrot.slane %v515_v29, 4  ;;  %v606_v41 = vrot.slane %v604_v30, 5  ;;  %v1086_v43 = vrot.slane %v5052_v2, 5 }
  0x57   : > { %v511_v39 = vsel %vm5036_vm3, %v506_v26, %v510_v11  ;;  %v601_v45 = vor.u32 %v600_v33, %v597_v31  ;;  %v610_v46 = vrot.slane %v608_v34, 4  ;;  %v616_v50 = vrot.slane %v614_v35, 5  ;;  %v4617_v11 = vld [vmem:[%s6392_s1 + $0xc] sm:$0x3] }
  0x58   : > { %v642_v44 = vunpack.c.l.b16 %v511_v39  ;;  %4236 = vmatmul.msk.bf16.gmra.mxu1 %vm668_vm4, %v659_v38  ;;  %v521_v49 = vsel %vm5036_vm3, %v516_v40, %v520_v16  ;;  %v307_v51 = vshrl.u32 %v188_v37, 16  ;;  %v310_v52 = vshll.u32 %v188_v37, 16  ;;  %v4473_v38 = vld [vmem:[%s5024_s26 + $0x14] sm:$0x1] }
  0x59   : > { %v643_v53 = vunpack.c.l.b16 %v521_v49  ;;  %v602_v54 = vrot.slane %v601_v45, 4  ;;  %v611_v55 = vor.u32 %v610_v46, %v606_v41  ;;  %v316_v2 = vshll.u32 %v5187_v42, 16  ;;  %v4746_v45 = vld [vmem:[%s6392_s1 + $0xe] sm:$0x3] }
  0x5a   : > { %v309_v57 = vrot.slane %v307_v51, 4  ;;  %v312_v58 = vrot.slane %v310_v52, 5  ;;  %v320_v59 = vshrl.u32 %v5187_v42, 16  ;;  %v326_v60 = vshll.u32 %v5191_v48, 16  ;;  %v4815_v51 = vld [vmem:[%s5024_s26] sm:$0xff] }
  0x5b   : > { %v663_v62 = vpack.c.b16 %v643_v53, %v642_v44  ;;  %v607_v3 = vsel %vm5036_vm3, %v602_v54, %v606_v41  ;;  %v612_v4 = vrot.slane %v611_v55, 4  ;;  %v318_v5 = vrot.slane %v316_v2, 5  ;;  %v4795_v2 = vld [vmem:[%s6392_s1 + $0x10] sm:$0x3] }
  0x5c   : > { %v650_v7 = vunpack.c.l.b16 %v607_v3  ;;  %v313_v8 = vor.u32 %v312_v58, %v309_v57  ;;  %v322_v9 = vrot.slane %v320_v59, 4  ;;  %v328_v10 = vrot.slane %v326_v60, 5 }
  0x5d   : > { %4240 = vmatmul.msk.bf16.gmra.mxu2 %vm668_vm4, %v663_v62  ;;  %v617_v13 = vsel %vm5036_vm3, %v612_v4, %v616_v50  ;;  %v4325_v14 = vrot.slane %v1030_v61, 9  ;;  %v1083_v19 = vrot.slane %v5049_v1, 5  ;;  %v2918_v22 = vsel %vm717_vm0, %v4617_v11, 0  ;;  %v4568_v50 = vld [vmem:[%s6392_s1 + $0xa] sm:$0x3] }
  0x5e   : > { %v651_v15 = vunpack.c.l.b16 %v617_v13  ;;  %v314_v16 = vrot.slane %v313_v8, 4  ;;  %v323_v17 = vor.u32 %v322_v9, %v318_v5  ;;  %v1751_v23 = vshrl.u32 %v4471_v6, 16  ;;  %2927 = vmatpush.bf16.msra.mxu2 %v2918_v22  ;;  %v1031_v8 = vld [vmem:[%s5024_s26 + $0xc] sm:$0xe] }
  0x5f   : > { %v1754_v24 = vshll.u32 %v4471_v6, 16  ;;  %v1760_v26 = vshll.u32 %v4472_v12, 16  ;;  %v1084_v33 = vsel %vm5210_vm7, %v4325_v14, %v1083_v19  ;;  %v1085_v35 = vrot.slane %v1083_v19, 4  ;;  %v4475_v6 = vld [vmem:[%s5024_s26 + $0x1c] sm:$0xf] }
  0x60   : > { %v667_v29 = vpack.c.b16 %v651_v15, %v650_v7  ;;  %v319_v30 = vsel %vm5036_vm3, %v314_v16, %v318_v5  ;;  %v324_v31 = vrot.slane %v323_v17, 4  ;;  %v1195_v37 = vunpack.c.l.b16 %v1084_v33  ;;  %v4474_v5 = vld [vmem:[%s5024_s26 + $0x18] sm:$0xf]  ;;  %v4831_v15 = vld [vmem:[%s5024_s26 + $0xc] sm:$0xff] }
  0x61   : > { %v626_v34 = vunpack.c.l.b16 %v319_v30  ;;  %v1753_v1 = vrot.slane %v1751_v23, 4  ;;  %v1756_v40 = vrot.slane %v1754_v24, 5  ;;  %v1762_v41 = vrot.slane %v1760_v26, 5  ;;  %v4476_v30 = vld [vmem:[%s5024_s26 + $0x20] sm:$0x1] }
  0x62   : > { %4244 = vmatmul.msk.bf16.gmra.mxu3 %vm668_vm4, %v667_v29  ;;  %v329_v39 = vsel %vm5036_vm3, %v324_v31, %v328_v10  ;;  %v1764_v44 = vshrl.u32 %v4472_v12, 16  ;;  %v1087_v49 = vsel %vm5210_vm7, %v1085_v35, %v1086_v43  ;;  %v1770_v55 = vshll.u32 %v4473_v38, 16  ;;  %v4816_v35 = vld [vmem:[%s5024_s26 + $0xc] sm:$0xff] }
  0x63   : > { %v627_v46 = vunpack.c.l.b16 %v329_v39  ;;  %v1196_v52 = vunpack.c.l.b16 %v1087_v49  ;;  %v1757_v53 = vor.u32 %v1756_v40, %v1753_v1  ;;  %v3572_v58 = vsel %vm717_vm0, %v4746_v45, 0 }
  0x64   : > { %v1766_v54 = vrot.slane %v1764_v44, 4  ;;  %3581 = vmatpush.bf16.msra.mxu3 %v3572_v58  ;;  %v2631_v60 = vsel %vm717_vm0, %v4568_v50, 0  ;;  %v3970_v61 = vsel %vm717_vm0, %v4795_v2, 0  ;;  %v1772_v4 = vrot.slane %v1770_v55, 5  ;;  %v1032_v50 = vld [vmem:[%s5024_s26 + $0x18] sm:$0xe] }
  0x65   : > { %v655_v57 = vpack.c.b16 %v627_v46, %v626_v34  ;;  %v1227_v43 = vpack.c.b16 %v1196_v52, %v1195_v37  ;;  %2640 = vmatpush.bf16.msra.mxu1 %v2631_v60  ;;  %v1758_v62 = vrot.slane %v1757_v53, 4  ;;  %3979 = vmatpush.bf16.msra.mxu0 %v3970_v61  ;;  %v1090_v7 = vrot.slane %v5095_v28, 5  ;;  %v4478_v46 = vld [vmem:[%s5024_s26 + $0x28] sm:$0xf] }
  0x66   : > { %v1767_v59 = vor.u32 %v1766_v54, %v1762_v41  ;;  %v1775_v9 = vshrl.u32 %v4474_v5, 16  ;;  %v1778_v10 = vshll.u32 %v4474_v5, 16  ;;  %v1784_v13 = vshll.u32 %v4475_v6, 16 }
  0x67   : > { %4232 = vmatmul.msk.bf16.gmra.mxu0 %vm668_vm4, %v655_v57  ;;  %v1763_v11 = vsel %vm5036_vm3, %v1758_v62, %v1762_v41  ;;  %v1788_v14 = vshrl.u32 %v4475_v6, 16  ;;  %v4326_v16 = vrot.slane %v1031_v8, 9  ;;  %v1092_v17 = vrot.slane %v1090_v7, 4  ;;  %v4477_v41 = vld [vmem:[%s5024_s26 + $0x24] sm:$0xf] }
  0x68   : > { %4309 = vmatmul.msk.bf16.vlgmr.msrb.gmra.mxu1 %vm668_vm4, %v4815_v51  ;;  %v1768_v3 = vrot.slane %v1767_v59, 4  ;;  %v1093_v28 = vrot.slane %v5098_v32, 5  ;;  %v2136_v19 = vunpack.c.l.b16 %v1763_v11  ;;  %v1777_v23 = vrot.slane %v1775_v9, 4  ;;  %v4479_v6 = vld [vmem:[%s5024_s26 + $0x2c] sm:$0x1] }
  0x69   : > { %v1780_v24 = vrot.slane %v1778_v10, 5  ;;  %v1786_v26 = vrot.slane %v1784_v13, 5  ;;  %v1790_v29 = vrot.slane %v1788_v14, 4  ;;  %v1091_v31 = vsel %vm5210_vm7, %v4326_v16, %v1090_v7 }
  0x6a   : > { %v1773_v12 = vsel %vm5036_vm3, %v1768_v3, %v1772_v4  ;;  %v1094_v33 = vsel %vm5210_vm7, %v1092_v17, %v1093_v28  ;;  %v1794_v38 = vshll.u32 %v4476_v30, 16  ;;  %v1197_v1 = vunpack.c.l.b16 %v1091_v31 }
  0x6b   : > { %v2137_v22 = vunpack.c.l.b16 %v1773_v12  ;;  %v1781_v32 = vor.u32 %v1780_v24, %v1777_v23  ;;  %v1791_v37 = vor.u32 %v1790_v29, %v1786_v26  ;;  %v1198_v39 = vunpack.c.l.b16 %v1094_v33  ;;  %v4817_v12 = vld [vmem:[%s5024_s26 + $0x18] sm:$0xff]  ;;  %v1033_v29 = vld [vmem:[%s5024_s26 + $0x24] sm:$0xe] }
  0x6c   : > { %v1796_v45 = vrot.slane %v1794_v38, 5  ;;  %v1097_v51 = vrot.slane %v5141_v63, 5  ;;  %v1799_v52 = vshrl.u32 %v4477_v41, 16  ;;  %v1802_v54 = vshll.u32 %v4477_v41, 16 }
  0x6d   : > { %4342 = vmatmul.msk.bf16.vlgmr.msrb.gmra.mxu2 %vm668_vm4, %v1227_v43  ;;  %v2168_v34 = vpack.c.b16 %v2137_v22, %v2136_v19  ;;  %v1782_v40 = vrot.slane %v1781_v32, 4  ;;  %v1792_v44 = vrot.slane %v1791_v37, 4  ;;  %v1228_v49 = vpack.c.b16 %v1198_v39, %v1197_v1  ;;  %v4832_v43 = vld [vmem:[%s5024_s26 + $0x18] sm:$0xff]  ;;  %v4480_v19 = vld [vmem:[%s5024_s26 + $0x30] sm:$0xf]  ;;  %v4833_v32 = vld [vmem:[%s5024_s26 + $0x24] sm:$0xff] }
  0x6e   : > { %v1808_v55 = vshll.u32 %v4478_v46, 16  ;;  %v1812_v2 = vshrl.u32 %v4478_v46, 16  ;;  %v4327_v58 = vrot.slane %v1032_v50, 9  ;;  %v1099_v60 = vrot.slane %v1097_v51, 4  ;;  %v4481_v22 = vld [vmem:[%s5024_s26 + $0x34] sm:$0xf] }
  0x6f   : > { %v1787_v53 = vsel %vm5036_vm3, %v1782_v40, %v1786_v26  ;;  %v1797_v57 = vsel %vm5036_vm3, %v1792_v44, %v1796_v45  ;;  %v1100_v63 = vrot.slane %v5144_v0, 5  ;;  %v1801_v61 = vrot.slane %v1799_v52, 4  ;;  %v4482_v45 = vld [vmem:[%s5024_s26 + $0x38] sm:$0x1] }
  0x70   : > { %v2138_v59 = vunpack.c.l.b16 %v1787_v53  ;;  %v2139_v62 = vunpack.c.l.b16 %v1797_v57  ;;  %v1804_v3 = vrot.slane %v1802_v54, 5  ;;  %v1810_v4 = vrot.slane %v1808_v55, 5  ;;  %v4484_v57 = vld [vmem:[%s5024_s26 + $0x40] sm:$0xf] }
  0x71   : > { %v1814_v5 = vrot.slane %v1812_v2, 4  ;;  %v1098_v7 = vsel %vm5210_vm7, %v4327_v58, %v1097_v51  ;;  %v1101_v8 = vsel %vm5210_vm7, %v1099_v60, %v1100_v63  ;;  %v1818_v0 = vshll.u32 %v4479_v6, 16  ;;  %v4483_v2 = vld [vmem:[%s5024_s26 + $0x3c] sm:$0xf]  ;;  %v4891_v63 = vld [vmem:[%s5024_s26 + $0x34] sm:$0xf] }
  0x72   : > { %4455 = vmatmul.msk.bf16.vlgmr.msrb.gmra.mxu3 %vm668_vm4, %v4831_v15  ;;  %v2169_v9 = vpack.c.b16 %v2139_v62, %v2138_v59  ;;  %v1805_v10 = vor.u32 %v1804_v3, %v1801_v61  ;;  %v1199_v13 = vunpack.c.l.b16 %v1098_v7  ;;  %v1200_v14 = vunpack.c.l.b16 %v1101_v8  ;;  %v1034_v62 = vld [vmem:[%s5024_s26 + $0x30] sm:$0xe] }
  0x73   : > { %v1815_v11 = vor.u32 %v1814_v5, %v1810_v4  ;;  %v1820_v17 = vrot.slane %v1818_v0, 5  ;;  %v1104_v23 = vrot.slane %v5187_v42, 5  ;;  %v1823_v30 = vshrl.u32 %v4480_v19, 16  ;;  %v4892_v0 = vld [vmem:[%s5024_s26 + $0x38] sm:$0x1] }
  0x74   : > { %v1806_v15 = vrot.slane %v1805_v10, 4  ;;  %v1229_v28 = vpack.c.b16 %v1200_v14, %v1199_v13  ;;  %v1826_v31 = vshll.u32 %v4480_v19, 16  ;;  %v1832_v33 = vshll.u32 %v4481_v22, 16  ;;  %v4834_v13 = vld [vmem:[%s5024_s26 + $0x30] sm:$0xff] }
  0x75   : > { %v1816_v16 = vrot.slane %v1815_v11, 4  ;;  %v1106_v37 = vrot.slane %v1104_v23, 4  ;;  %v1107_v42 = vrot.slane %v5191_v48, 5  ;;  %v1825_v39 = vrot.slane %v1823_v30, 4  ;;  %v4818_v48 = vld [vmem:[%s5024_s26 + $0x24] sm:$0xff] }
  0x76   : > { %v1811_v24 = vsel %vm5036_vm3, %v1806_v15, %v1810_v4  ;;  %v1828_v40 = vrot.slane %v1826_v31, 5  ;;  %v1834_v41 = vrot.slane %v1832_v33, 5  ;;  %v1842_v53 = vshll.u32 %v4482_v45, 16  ;;  %v4819_v33 = vld [vmem:[%s5024_s26 + $0x30] sm:$0xff] }
  0x77   : > { %4520 = vmatmul.msk.bf16.vlgmr.msrb.gmra.mxu0 %vm668_vm4, %v2168_v34  ;;  %v1821_v26 = vsel %vm5036_vm3, %v1816_v16, %v1820_v17  ;;  %v1836_v34 = vshrl.u32 %v4481_v22, 16  ;;  %v2140_v38 = vunpack.c.l.b16 %v1811_v24  ;;  %v1111_v61 = vrot.slane %v4891_v63, 5  ;;  %v4485_v22 = vld [vmem:[%s5024_s26 + $0x44] sm:$0x1] }
  0x78   : > { %4310 = vmatmul.msk.bf16.gmra.mxu1 %vm668_vm4, %v4816_v35  ;;  %v4328_v35 = vrot.slane %v1033_v29, 9  ;;  %v2141_v1 = vunpack.c.l.b16 %v1821_v26  ;;  %v1829_v51 = vor.u32 %v1828_v40, %v1825_v39  ;;  %v1844_v59 = vrot.slane %v1842_v53, 5  ;;  %v4486_v39 = vld [vmem:[%s5024_s26 + $0x48] sm:$0xf]  ;;  %v4487_v40 = vld [vmem:[%s5024_s26 + $0x4c] sm:$0xf] }
  0x79   : > { %v1838_v44 = vrot.slane %v1836_v34, 4  ;;  %v1847_v3 = vshrl.u32 %v4483_v2, 16  ;;  %v1850_v4 = vshll.u32 %v4483_v2, 16  ;;  %v1856_v5 = vshll.u32 %v4484_v57, 16  ;;  %v4835_v2 = vld [vmem:[%s5024_s26 + $0x3c] sm:$0xff] }
  0x7a   : > { %v1105_v46 = vsel %vm5210_vm7, %v4328_v35, %v1104_v23  ;;  %v2170_v50 = vpack.c.b16 %v2141_v1, %v2140_v38  ;;  %v1830_v58 = vrot.slane %v1829_v51, 4  ;;  %v1860_v6 = vshrl.u32 %v4484_v57, 16 }
  0x7b   : > { %v1839_v52 = vor.u32 %v1838_v44, %v1834_v41  ;;  %v1201_v54 = vunpack.c.l.b16 %v1105_v46  ;;  %v4329_v10 = vrot.slane %v1034_v62, 9  ;;  %v1113_v11 = vrot.slane %v1111_v61, 4 }
  0x7c   : > { %v1835_v8 = vsel %vm5036_vm3, %v1830_v58, %v1834_v41  ;;  %v1849_v14 = vrot.slane %v1847_v3, 4  ;;  %v1852_v15 = vrot.slane %v1850_v4, 5  ;;  %v1858_v16 = vrot.slane %v1856_v5, 5  ;;  %v4488_v4 = vld [vmem:[%s5024_s26 + $0x50] sm:$0x1] }
  0x7d   : > { %4343 = vmatmul.msk.bf16.gmra.mxu2 %vm668_vm4, %v1228_v49  ;;  %v1108_v49 = vsel %vm5210_vm7, %v1106_v37, %v1107_v42  ;;  %v1862_v17 = vrot.slane %v1860_v6, 4  ;;  %v1112_v23 = vsel %vm5210_vm7, %v4329_v10, %v1111_v61  ;;  %v1866_v30 = vshll.u32 %v4485_v22, 16 }
  0x7e   : > { %v1202_v55 = vunpack.c.l.b16 %v1108_v49  ;;  %v1853_v26 = vor.u32 %v1852_v15, %v1849_v14  ;;  %v1871_v51 = vshrl.u32 %v4486_v39, 16  ;;  %v1880_v53 = vshll.u32 %v4487_v40, 16 }
  0x7f   : > { %v1863_v29 = vor.u32 %v1862_v17, %v1858_v16  ;;  %v1868_v1 = vrot.slane %v1866_v30, 5 }
  0x80   : > { %v1230_v60 = vpack.c.b16 %v1202_v55, %v1201_v54  ;;  %v1854_v42 = vrot.slane %v1853_v26, 4  ;;  %v1884_v54 = vshrl.u32 %v4487_v40, 16  ;;  %v1882_v62 = vrot.slane %v1880_v53, 5 }
  0x81   : > { %v1864_v38 = vrot.slane %v1863_v29, 4  ;;  %v1125_v26 = vrot.slane %v5108_v47, 5 }
  0x82   : > { %4456 = vmatmul.msk.bf16.gmra.mxu3 %vm668_vm4, %v4832_v43  ;;  %v1840_v43 = vrot.slane %v1839_v52, 4  ;;  %v1859_v45 = vsel %vm5036_vm3, %v1854_v42, %v1858_v16  ;;  %v1874_v52 = vshll.u32 %v4486_v39, 16  ;;  %v1886_v3 = vrot.slane %v1884_v54, 4  ;;  %v4491_v54 = vld [vmem:[%s5024_s26 + $0x5c] sm:$0x1] }
  0x83   : > { %v1869_v46 = vsel %vm5036_vm3, %v1864_v38, %v1868_v1  ;;  %v2144_v55 = vunpack.c.l.b16 %v1859_v45  ;;  %v4836_v1 = vld [vmem:[%s5024_s26 + $0x48] sm:$0xff]  ;;  %v1127_v40 = vrot.slane %v1125_v26, 4 }
  0x84   : > { %v2145_v57 = vunpack.c.l.b16 %v1869_v46  ;;  %v1876_v61 = vrot.slane %v1874_v52, 5  ;;  %v1887_v10 = vor.u32 %v1886_v3, %v1882_v62 }
  0x86   : > { %v1888_v16 = vrot.slane %v1887_v10, 4 }
  0x87   : > { %4521 = vmatmul.msk.bf16.gmra.mxu0 %vm668_vm4, %v2169_v9  ;;  %v1845_v9 = vsel %vm5036_vm3, %v1840_v43, %v1844_v59 }
  0x88   : > { %4311 = vmatmul.msk.bf16.gmra.mxu1 %vm668_vm4, %v4817_v12  ;;  %v1114_v12 = vrot.slane %v4892_v0, 5  ;;  %v2143_v19 = vunpack.c.l.b16 %v1845_v9 }
  0x8a   : > { %v1115_v24 = vsel %vm5210_vm7, %v1113_v11, %v1114_v12  ;;  %v1890_v11 = vshll.u32 %v4488_v4, 16  ;;  %v4820_v12 = vld [vmem:[%s5024_s26 + $0x3c] sm:$0xff] }
  0x8b   : > { %v1204_v35 = vunpack.c.l.b16 %v1115_v24  ;;  %v4490_v24 = vld [vmem:[%s5024_s26 + $0x58] sm:$0xf]  ;;  %v4492_v4 = vld [vmem:[%s5024_s26 + $0x60] sm:$0xf] }
  0x8c   : > { %v1892_v17 = vrot.slane %v1890_v11, 5  ;;  %v1908_v42 = vshrl.u32 %v4490_v24, 16 }
  0x8d   : > { %4344 = vmatmul.msk.bf16.gmra.mxu2 %vm668_vm4, %v1229_v28  ;;  %v2142_v28 = vunpack.c.l.b16 %v1835_v8  ;;  %v2172_v8 = vpack.c.b16 %v2145_v57, %v2144_v55 }
  0x8e   : > { %v1893_v30 = vsel %vm5036_vm3, %v1888_v16, %v1892_v17  ;;  %v1910_v52 = vrot.slane %v1908_v42, 4 }
  0x8f   : > { %v2171_v31 = vpack.c.b16 %v2143_v19, %v2142_v28  ;;  %v2147_v46 = vunpack.c.l.b16 %v1893_v30 }
  0x92   : > { %4457 = vmatmul.msk.bf16.gmra.mxu3 %vm668_vm4, %v4833_v32  ;;  %v1203_v32 = vunpack.c.l.b16 %v1112_v23  ;;  %v4489_v23 = vld [vmem:[%s5024_s26 + $0x54] sm:$0xf] }
  0x94   : > { %v1231_v44 = vpack.c.b16 %v1204_v35, %v1203_v32  ;;  %v1898_v32 = vshll.u32 %v4489_v23, 16  ;;  %v1904_v35 = vshll.u32 %v4490_v24, 16 }
  0x97   : > { %4522 = vmatmul.msk.bf16.gmra.mxu0 %vm668_vm4, %v2170_v50  ;;  %v1118_v50 = vrot.slane %v5064_v20, 5  ;;  %v1873_v20 = vrot.slane %v1871_v51, 4  ;;  %v1906_v51 = vrot.slane %v1904_v35, 5  ;;  %v1135_v35 = vrot.slane %v5159_v27, 5 }
  0x98   : > { %4312 = vmatmul.msk.bf16.gmra.mxu1 %vm668_vm4, %v4818_v48  ;;  %v1035_v48 = vld [vmem:[%s5024_s26 + $0x3c] sm:$0xe] }
  0x99   : > { %v4330_v43 = vrot.slane %v1035_v48, 9  ;;  %v1120_v59 = vrot.slane %v1118_v50, 4  ;;  %v1900_v48 = vrot.slane %v1898_v32, 5 }
  0x9b   : > { %v1119_v5 = vsel %vm5210_vm7, %v4330_v43, %v1118_v50  ;;  %v4821_v43 = vld [vmem:[%s5024_s26 + $0x48] sm:$0xff] }
  0x9d   : > { %v5305_v7 = vpop.f32.mrf.mxu1  ;;  %4345 = vmatmul.msk.bf16.gmra.mxu2 %vm668_vm4, %v1230_v60  ;;  %v1121_v60 = vrot.slane %v5069_v25, 5  ;;  %v1877_v25 = vor.u32 %v1876_v61, %v1873_v20  ;;  %v1914_v20 = vshll.u32 %v4491_v54, 16  ;;  %v4822_v54 = vld [vmem:[%s5024_s26 + $0x54] sm:$0xff] }
  0x9f   : > { %v1122_v6 = vsel %vm5210_vm7, %v1120_v59, %v1121_v60  ;;  %v1878_v15 = vrot.slane %v1877_v25, 4  ;;  %v1911_v60 = vor.u32 %v1910_v52, %v1906_v51  ;;  %v1916_v10 = vrot.slane %v1914_v20, 5 }
  0xa0   : > { %v1206_v14 = vunpack.c.l.b16 %v1122_v6 }
  0xa1   : > { %v1883_v29 = vsel %vm5036_vm3, %v1878_v15, %v1882_v62  ;;  %v1912_v25 = vrot.slane %v1911_v60, 4  ;;  %v1132_v15 = vrot.slane %v5154_v21, 5 }
  0xa2   : > { %4458 = vmatmul.msk.bf16.gmra.mxu3 %vm668_vm4, %v4834_v13  ;;  %v1205_v13 = vunpack.c.l.b16 %v1119_v5  ;;  %v2146_v45 = vunpack.c.l.b16 %v1883_v29  ;;  %v4493_v5 = vld [vmem:[%s5024_s26 + $0x64] sm:$0xf] }
  0xa3   : > { %v1932_v16 = vshrl.u32 %v4493_v5, 16  ;;  %v1917_v24 = vsel %vm5036_vm3, %v1912_v25, %v1916_v10  ;;  %v1134_v32 = vrot.slane %v1132_v15, 4  ;;  %v4893_v10 = vld [vmem:[%s5024_s26 + $0x64] sm:$0xf] }
  0xa4   : > { %v1232_v19 = vpack.c.b16 %v1206_v14, %v1205_v13  ;;  %v2173_v57 = vpack.c.b16 %v2147_v46, %v2146_v45  ;;  %v1922_v13 = vshll.u32 %v4492_v4, 16  ;;  %v1928_v14 = vshll.u32 %v4493_v5, 16 }
  0xa5   : > { %v5321_v34 = vpop.f32.mrf.mxu1  ;;  %v1934_v42 = vrot.slane %v1932_v16, 4 }
  0xa6   : > { %v1924_v30 = vrot.slane %v1922_v13, 5  ;;  %v1038_v13 = vld [vmem:[%s5024_s26 + $0x60] sm:$0xe] }
  0xa7   : > { %v5323_v37 = vpop.f32.mrf.mxu2  ;;  %4523 = vmatmul.msk.bf16.gmra.mxu0 %vm668_vm4, %v2171_v31  ;;  %v1036_v31 = vld [vmem:[%s5024_s26 + $0x48] sm:$0xe] }
  0xa8   : > { %4313 = vmatmul.msk.bf16.gmra.mxu1 %vm668_vm4, %v4819_v33  ;;  %v1895_v33 = vshrl.u32 %v4489_v23, 16  ;;  %v4331_v47 = vrot.slane %v1036_v31, 9  ;;  %v1930_v31 = vrot.slane %v1928_v14, 5 }
  0xaa   : > { %v5329_v41 = vpop.f32.mrf.mxu0  ;;  %v1897_v50 = vrot.slane %v1895_v33, 4  ;;  %v4837_v33 = vld [vmem:[%s5024_s26 + $0x54] sm:$0xff]  ;;  %v1935_v27 = vor.u32 %v1934_v42, %v1930_v31 }
  0xab   : > { %v5335_v49 = vpop.f32.mrf.mxu3 }
  0xac   : > { %v1901_v59 = vor.u32 %v1900_v48, %v1897_v50  ;;  %v1136_v48 = vsel %vm5210_vm7, %v1134_v32, %v1135_v35  ;;  %v1936_v60 = vrot.slane %v1935_v27, 4 }
  0xad   : > { %4346 = vmatmul.msk.bf16.gmra.mxu2 %vm668_vm4, %v1231_v44  ;;  %v1128_v44 = vrot.slane %v5113_v56, 5 }
  0xaf   : > { %v5341_v58 = vpop.f32.mrf.mxu1  ;;  %v5344_v63 = vpop.f32.mrf.mxu2  ;;  %v1129_v56 = vsel %vm5210_vm7, %v1127_v40, %v1128_v44  ;;  %v4494_v40 = vld [vmem:[%s5024_s26 + $0x68] sm:$0x1] }
  0xb0   : > { %v1208_v62 = vunpack.c.l.b16 %v1129_v56 }
  0xb2   : > { %4459 = vmatmul.msk.bf16.gmra.mxu3 %vm668_vm4, %v4835_v2  ;;  %v5352_v9 = vpop.f32.mrf.mxu0  ;;  %v1126_v2 = vsel %vm5210_vm7, %v4331_v47, %v1125_v26  ;;  %v2149_v47 = vunpack.c.l.b16 %v1917_v24 }
  0xb3   : > { %v5354_v0 = vpop.f32.mrf.mxu3  ;;  %v1207_v61 = vunpack.c.l.b16 %v1126_v2 }
  0xb5   : > { %v1233_v11 = vpack.c.b16 %v1208_v62, %v1207_v61  ;;  %v4495_v61 = vld [vmem:[%s5024_s26 + $0x6c] sm:$0xf]  ;;  %v4496_v62 = vld [vmem:[%s5024_s26 + $0x70] sm:$0xf] }
  0xb6   : > { %v1943_v14 = vshrl.u32 %v4495_v61, 16  ;;  %v1952_v16 = vshll.u32 %v4496_v62, 16 }
  0xb7   : > { %4524 = vmatmul.msk.bf16.gmra.mxu0 %vm668_vm4, %v2172_v8  ;;  %v5358_v28 = vpop.f32.mrf.mxu1  ;;  %v1902_v8 = vrot.slane %v1901_v59, 4 }
  0xb8   : > { %4314 = vmatmul.msk.bf16.gmra.mxu1 %vm668_vm4, %v4820_v12  ;;  %v1919_v12 = vshrl.u32 %v4492_v4, 16  ;;  %v1945_v35 = vrot.slane %v1943_v14, 4  ;;  %v4499_v14 = vld [vmem:[%s5024_s26 + $0x7c] sm:$0xf] }
  0xb9   : > { %v1907_v23 = vsel %vm5036_vm3, %v1902_v8, %v1906_v51  ;;  %v1938_v51 = vshll.u32 %v4494_v40, 16 }
  0xba   : > { %v5361_v22 = vpop.f32.mrf.mxu2  ;;  %v1921_v29 = vrot.slane %v1919_v12, 4 }
  0xbb   : > { %v1940_v20 = vrot.slane %v1938_v51, 5 }
  0xbc   : > { %v1925_v46 = vor.u32 %v1924_v30, %v1921_v29  ;;  %v4838_v30 = vld [vmem:[%s5024_s26 + $0x60] sm:$0xff] }
  0xbd   : > { %4347 = vmatmul.msk.bf16.gmra.mxu2 %vm668_vm4, %v1232_v19  ;;  %v1037_v19 = vld [vmem:[%s5024_s26 + $0x54] sm:$0xe]  ;;  %v1941_v25 = vsel %vm5036_vm3, %v1936_v60, %v1940_v20 }
  0xbe   : > { %v5371_v38 = vpop.f32.mrf.mxu0  ;;  %v4332_v21 = vrot.slane %v1037_v19, 9  ;;  %v1926_v59 = vrot.slane %v1925_v46, 4  ;;  %v1956_v19 = vshrl.u32 %v4496_v62, 16  ;;  %v4497_v46 = vld [vmem:[%s5024_s26 + $0x74] sm:$0x1] }
  0xbf   : > { %v5375_v39 = vpop.f32.mrf.mxu3 }
  0xc0   : > { %v1133_v50 = vsel %vm5210_vm7, %v4332_v21, %v1132_v15  ;;  %v1931_v8 = vsel %vm5036_vm3, %v1926_v59, %v1930_v31  ;;  %v1946_v15 = vshll.u32 %v4495_v61, 16  ;;  %v4333_v21 = vrot.slane %v1038_v13, 9  ;;  %v4498_v13 = vld [vmem:[%s5024_s26 + $0x78] sm:$0xf] }
  0xc1   : > { %v5378_v53 = vpop.f32.mrf.mxu1  ;;  %v1209_v56 = vunpack.c.l.b16 %v1133_v50  ;;  %v2150_v31 = vunpack.c.l.b16 %v1931_v8 }
  0xc2   : > { %4460 = vmatmul.msk.bf16.gmra.mxu3 %vm668_vm4, %v4836_v1  ;;  %v5382_v55 = vpop.f32.mrf.mxu2  ;;  %v2148_v1 = vunpack.c.l.b16 %v1907_v23  ;;  %v4894_v23 = vld [vmem:[%s5024_s26 + $0x68] sm:$0x1]  ;;  %v1948_v42 = vrot.slane %v1946_v15, 5  ;;  %v4895_v15 = vld [vmem:[%s5024_s26 + $0x70] sm:$0xf] }
  0xc3   : > { %v1142_v24 = vrot.slane %v4894_v23, 5  ;;  %v1039_v23 = vld [vmem:[%s5024_s26 + $0x6c] sm:$0xe] }
  0xc4   : > { %v2174_v52 = vpack.c.b16 %v2149_v47, %v2148_v1  ;;  %v1954_v1 = vrot.slane %v1952_v16, 5  ;;  %v1958_v47 = vrot.slane %v1956_v19, 4  ;;  %v1949_v51 = vor.u32 %v1948_v42, %v1945_v35  ;;  %v4896_v42 = vld [vmem:[%s5024_s26 + $0x74] sm:$0x1] }
  0xc5   : > { %v1146_v16 = vrot.slane %v4895_v15, 5 }
  0xc6   : > { %v5389_v3 = vpop.f32.mrf.mxu0 }
  0xc7   : > { %4525 = vmatmul.msk.bf16.gmra.mxu0 %vm668_vm4, %v2173_v57  ;;  %v5394_v6 = vpop.f32.mrf.mxu3  ;;  %v1210_v57 = vunpack.c.l.b16 %v1136_v48 }
  0xc8   : > { %4315 = vmatmul.msk.bf16.gmra.mxu1 %vm668_vm4, %v4821_v43 }
  0xc9   : > { %v5398_v17 = vpop.f32.mrf.mxu1  ;;  %v1234_v4 = vpack.c.b16 %v1210_v57, %v1209_v56  ;;  %v4823_v57 = vld [vmem:[%s5024_s26 + $0x60] sm:$0xff] }
  0xcd   : > { %v5405_v26 = vpop.f32.mrf.mxu2  ;;  %4348 = vmatmul.msk.bf16.gmra.mxu2 %vm668_vm4, %v1233_v11  ;;  %v1139_v11 = vrot.slane %v4893_v10, 5 }
  0xcf   : > { %v1141_v32 = vrot.slane %v1139_v11, 4  ;;  %v1140_v50 = vsel %vm5210_vm7, %v4333_v21, %v1139_v11  ;;  %v1980_v21 = vshrl.u32 %v4499_v14, 16 }
  0xd0   : > { %v5411_v44 = vpop.f32.mrf.mxu0  ;;  %v1211_v20 = vunpack.c.l.b16 %v1140_v50  ;;  %v4334_v50 = vrot.slane %v1039_v23, 9 }
  0xd1   : > { %v5413_v45 = vpop.f32.mrf.mxu3  ;;  %v1143_v48 = vsel %vm5210_vm7, %v1141_v32, %v1142_v24 }
  0xd2   : > { %4461 = vmatmul.msk.bf16.gmra.mxu3 %vm668_vm4, %v4837_v33  ;;  %v2151_v33 = vunpack.c.l.b16 %v1941_v25  ;;  %v1212_v61 = vunpack.c.l.b16 %v1143_v48  ;;  %v1148_v48 = vrot.slane %v1146_v16, 4 }
  0xd4   : > { %v2175_v27 = vpack.c.b16 %v2151_v33, %v2150_v31  ;;  %v1235_v11 = vpack.c.b16 %v1212_v61, %v1211_v20  ;;  %v1970_v31 = vshll.u32 %v4498_v13, 16  ;;  %v1976_v33 = vshll.u32 %v4499_v14, 16 }
  0xd5   : > { %v5421_v2 = vpop.f32.mrf.mxu1  ;;  %v5423_v43 = vpop.f32.mrf.mxu2  ;;  %v1982_v20 = vrot.slane %v1980_v21, 4 }
  0xd7   : > { %4526 = vmatmul.msk.bf16.gmra.mxu0 %vm668_vm4, %v2174_v52  ;;  %v1959_v52 = vor.u32 %v1958_v47, %v1954_v1  ;;  %v1149_v47 = vrot.slane %v4896_v42, 5 }
  0xd8   : > { %4316 = vmatmul.msk.bf16.gmra.mxu1 %vm668_vm4, %v4822_v54  ;;  %v5429_v5 = vpop.f32.mrf.mxu0  ;;  %v1962_v54 = vshll.u32 %v4497_v46, 16  ;;  %v4839_v46 = vld [vmem:[%s5024_s26 + $0x6c] sm:$0xff] }
  0xd9   : > { %v5436_v12 = vpop.f32.mrf.mxu3  ;;  %v1960_v8 = vrot.slane %v1959_v52, 4 }
  0xda   : > { %v1964_v25 = vrot.slane %v1962_v54, 5 }
  0xdd   : > { %4349 = vmatmul.msk.bf16.gmra.mxu2 %vm668_vm4, %v1234_v4  ;;  %v5441_v29 = vpop.f32.mrf.mxu1  ;;  %v1950_v4 = vrot.slane %v1949_v51, 4 }
  0xdf   : > { %v1955_v19 = vsel %vm5036_vm3, %v1950_v4, %v1954_v1  ;;  %v4500_v4 = vld [vmem:[%s5024_s26 + $0x80] sm:$0x1] }
  0xe0   : > { %v5444_v40 = vpop.f32.mrf.mxu2 }
  0xe2   : > { %4462 = vmatmul.msk.bf16.gmra.mxu3 %vm668_vm4, %v4838_v30  ;;  %v1967_v30 = vshrl.u32 %v4498_v13, 16  ;;  %v4824_v13 = vld [vmem:[%s5024_s26 + $0x6c] sm:$0xff] }
  0xe4   : > { %v5452_v56 = vpop.f32.mrf.mxu0  ;;  %v1969_v54 = vrot.slane %v1967_v30, 4 }
  0xe5   : > { %v5455_v59 = vpop.f32.mrf.mxu3  ;;  %v950_v60 = vpop.f32.mrf.mxu1 }
  0xe6   : > { %v951_v62 = vadd.f32 %v950_v60, %v5329_v41  ;;  %v1965_v41 = vsel %vm5036_vm3, %v1960_v8, %v1964_v25  ;;  %v1978_v60 = vrot.slane %v1976_v33, 5  ;;  %v1147_v8 = vsel %vm5210_vm7, %v4334_v50, %v1146_v16 }
  0xe7   : > { %4527 = vmatmul.msk.bf16.gmra.mxu0 %vm668_vm4, %v2175_v27  ;;  %v2152_v27 = vunpack.c.l.b16 %v1955_v19  ;;  %v2153_v51 = vunpack.c.l.b16 %v1965_v41  ;;  %v1986_v19 = vshll.u32 %v4500_v4, 16 }
  0xe8   : > { %v5459_v10 = vpop.f32.mrf.mxu2  ;;  %4317 = vmatmul.msk.bf16.gmra.mxu1 %vm668_vm4, %v4823_v57  ;;  %v1972_v57 = vrot.slane %v1970_v31, 5  ;;  %v1983_v15 = vor.u32 %v1982_v20, %v1978_v60 }
  0xe9   : > { %v2176_v25 = vpack.c.b16 %v2153_v51, %v2152_v27  ;;  %v1988_v42 = vrot.slane %v1986_v19, 5  ;;  %v4502_v27 = vld [vmem:[%s5024_s26 + $0x88] sm:$0xf]  ;;  %v4897_v51 = vld [vmem:[%s5024_s26 + $0x7c] sm:$0xf] }
  0xea   : > { %v1973_v14 = vor.u32 %v1972_v57, %v1969_v54  ;;  %v1040_v54 = vld [vmem:[%s5024_s26 + $0x78] sm:$0xe] }
  0xec   : > { %v5470_v24 = vpop.f32.mrf.mxu0  ;;  %v1974_v21 = vrot.slane %v1973_v14, 4 }
  0xed   : > { %v5472_v32 = vpop.f32.mrf.mxu3  ;;  %4350 = vmatmul.msk.bf16.gmra.mxu2 %vm668_vm4, %v1235_v11  ;;  %v952_v35 = vpop.f32.mrf.mxu1 }
  0xee   : > { %v953_v1 = vadd.f32 %v952_v35, %v5352_v9  ;;  %v1150_v9 = vsel %vm5210_vm7, %v1148_v48, %v1149_v47  ;;  %v1984_v35 = vrot.slane %v1983_v15, 4  ;;  %v4501_v47 = vld [vmem:[%s5024_s26 + $0x84] sm:$0xf]  ;;  %v4840_v15 = vld [vmem:[%s5024_s26 + $0x78] sm:$0xff] }
  0xef   : > { %v1214_v30 = vunpack.c.l.b16 %v1150_v9  ;;  %v1994_v57 = vshll.u32 %v4501_v47, 16  ;;  %v2004_v9 = vshrl.u32 %v4502_v27, 16 }
  0xf0   : > { %v1303_v52 = vpop.f32.mrf.mxu2  ;;  %v1989_v4 = vsel %vm5036_vm3, %v1984_v35, %v1988_v42 }
  0xf1   : > { %v1383_v61 = vadd.f32 %v1303_v52, %v951_v62  ;;  %v1213_v62 = vunpack.c.l.b16 %v1147_v8  ;;  %v1153_v52 = vrot.slane %v4897_v51, 5  ;;  %v2000_v8 = vshll.u32 %v4502_v27, 16 }
  0xf2   : > { %4463 = vmatmul.msk.bf16.gmra.mxu3 %vm668_vm4, %v4839_v46  ;;  %v2006_v35 = vrot.slane %v2004_v9, 4 }
  0xf3   : > { %v1236_v48 = vpack.c.b16 %v1214_v30, %v1213_v62 }
  0xf4   : > { %v2244_v11 = vpop.f32.mrf.mxu0 }
  0xf5   : > { %v1590_v41 = vpop.f32.mrf.mxu3  ;;  %v955_v23 = vpop.f32.mrf.mxu1 }
  0xf6   : > { %v1670_v31 = vadd.f32 %v1590_v41, %v1383_v61  ;;  %v956_v16 = vadd.f32 %v955_v23, %v5371_v38  ;;  %v1991_v38 = vshrl.u32 %v4501_v47, 16  ;;  %v1979_v61 = vsel %vm5036_vm3, %v1974_v21, %v1978_v60 }
  0xf7   : > { %4528 = vmatmul.msk.bf16.gmra.mxu0 %vm668_vm4, %v2176_v25  ;;  %v4898_v25 = vld [vmem:[%s5024_s26 + $0x80] sm:$0x1]  ;;  %v4335_v41 = vrot.slane %v1040_v54, 9  ;;  %v1155_v23 = vrot.slane %v1153_v52, 4  ;;  %v2154_v62 = vunpack.c.l.b16 %v1979_v61  ;;  %v2155_v60 = vunpack.c.l.b16 %v1989_v4 }
  0xf8   : > { %v1305_v33 = vpop.f32.mrf.mxu2  ;;  %4318 = vmatmul.msk.bf16.gmra.mxu1 %vm668_vm4, %v4824_v13  ;;  %v5489_v46 = vadd.f32 %v2244_v11, %v1670_v31  ;;  %v1156_v11 = vrot.slane %v4898_v25, 5  ;;  %v1993_v30 = vrot.slane %v1991_v38, 4  ;;  %v1996_v31 = vrot.slane %v1994_v57, 5  ;;  %v4825_v38 = vld [vmem:[%s5024_s26 + $0x78] sm:$0xff] }
  0xf9   : > { %v1384_v50 = vadd.f32 %v1305_v33, %v953_v1  ;;  %v2002_v21 = vrot.slane %v2000_v8, 5  ;;  %v2177_v27 = vpack.c.b16 %v2155_v60, %v2154_v62  ;;  %v4505_v62 = vld [vmem:[%s5024_s26 + $0x94] sm:$0xf]  ;;  %v4899_v60 = vld [vmem:[%s5024_s26 + $0x88] sm:$0xf] }
  0xfa   : > { %v1997_v51 = vor.u32 %v1996_v31, %v1993_v30  ;;  %v1160_v30 = vrot.slane %v4899_v60, 5  ;;  %v1041_v31 = vld [vmem:[%s5024_s26 + $0x84] sm:$0xe] }
  0xfb   : > { %v2007_v57 = vor.u32 %v2006_v35, %v2002_v21 }
  0xfc   : > { %v2246_v20 = vpop.f32.mrf.mxu0  ;;  %v1998_v25 = vrot.slane %v1997_v51, 4 }
  0xfd   : > { %v1592_v1 = vpop.f32.mrf.mxu3  ;;  %4351 = vmatmul.msk.bf16.gmra.mxu2 %vm668_vm4, %v1236_v48  ;;  %v957_v13 = vpop.f32.mrf.mxu1  ;;  %v4503_v48 = vld [vmem:[%s5024_s26 + $0x8c] sm:$0x1] }
  0xfe   : > { %v1671_v14 = vadd.f32 %v1592_v1, %v1384_v50  ;;  %v958_v19 = vadd.f32 %v957_v13, %v5389_v3  ;;  %v1154_v50 = vsel %vm5210_vm7, %v4335_v41, %v1153_v52  ;;  %v1157_v3 = vsel %vm5210_vm7, %v1155_v23, %v1156_v11 }
  0xff   : > { %v2010_v61 = vshll.u32 %v4503_v48, 16  ;;  %v1216_v8 = vunpack.c.l.b16 %v1157_v3  ;;  %v2008_v1 = vrot.slane %v2007_v57, 4  ;;  %v2028_v3 = vshrl.u32 %v4505_v62, 16  ;;  %v4841_v57 = vld [vmem:[%s5024_s26 + $0x84] sm:$0xff] }
 0x100   : > { %v1308_v33 = vpop.f32.mrf.mxu2  ;;  %v5502_v42 = vadd.f32 %v2246_v20, %v1671_v14  ;;  %v4504_v14 = vld [vmem:[%s5024_s26 + $0x90] sm:$0xf] }
 0x101   : > { %v1385_v47 = vadd.f32 %v1308_v33, %v956_v16  ;;  %v1215_v16 = vunpack.c.l.b16 %v1154_v50  ;;  %v2012_v13 = vrot.slane %v2010_v61, 5  ;;  %v2015_v33 = vshrl.u32 %v4504_v14, 16 }
 0x102   : > { %4464 = vmatmul.msk.bf16.gmra.mxu3 %vm668_vm4, %v4840_v15  ;;  %v2018_v48 = vshll.u32 %v4504_v14, 16  ;;  %v2024_v50 = vshll.u32 %v4505_v62, 16  ;;  %v4336_v61 = vrot.slane %v1041_v31, 9 }
 0x103   : > { %v1237_v23 = vpack.c.b16 %v1216_v8, %v1215_v16  ;;  %v2017_v8 = vrot.slane %v2015_v33, 4 }
 0x104   : > { %v2249_v54 = vpop.f32.mrf.mxu0 }
 0x105   : > { %v1595_v4 = vpop.f32.mrf.mxu3  ;;  %v960_v20 = vpop.f32.mrf.mxu1 }
 0x106   : > { %v1672_v9 = vadd.f32 %v1595_v4, %v1385_v47  ;;  %v961_v52 = vadd.f32 %v960_v20, %v5411_v44  ;;  %v2003_v44 = vsel %vm5036_vm3, %v1998_v25, %v2002_v21  ;;  %v2013_v47 = vsel %vm5036_vm3, %v2008_v1, %v2012_v13 }
 0x107   : > { %4529 = vmatmul.msk.bf16.gmra.mxu0 %vm668_vm4, %v2177_v27  ;;  %v4900_v27 = vld [vmem:[%s5024_s26 + $0x8c] sm:$0x1]  ;;  %v1162_v4 = vrot.slane %v1160_v30, 4  ;;  %v2156_v20 = vunpack.c.l.b16 %v2003_v44  ;;  %v2157_v16 = vunpack.c.l.b16 %v2013_v47  ;;  %v2020_v25 = vrot.slane %v2018_v48, 5  ;;  %v4826_v44 = vld [vmem:[%s5024_s26 + $0x84] sm:$0xff] }
 0x108   : > { %v1310_v11 = vpop.f32.mrf.mxu2  ;;  %4319 = vmatmul.msk.bf16.gmra.mxu1 %vm668_vm4, %v4825_v38  ;;  %v5515_v15 = vadd.f32 %v2249_v54, %v1672_v9  ;;  %v1163_v51 = vrot.slane %v4900_v27, 5  ;;  %v2030_v1 = vrot.slane %v2028_v3, 4 }
 0x109   : > { %v1386_v41 = vadd.f32 %v1310_v11, %v958_v19  ;;  %v2026_v11 = vrot.slane %v2024_v50, 5  ;;  %v2178_v62 = vpack.c.b16 %v2157_v16, %v2156_v20  ;;  %v2021_v31 = vor.u32 %v2020_v25, %v2017_v8  ;;  %v4508_v20 = vld [vmem:[%s5024_s26 + $0xa0] sm:$0xf]  ;;  %v1042_v25 = vld [vmem:[%s5024_s26 + $0x90] sm:$0xe] }
 0x10b   : > { %v2031_v33 = vor.u32 %v2030_v1, %v2026_v11 }
 0x10c   : > { %v2251_v35 = vpop.f32.mrf.mxu0 }
 0x10d   : > { %v1597_v19 = vpop.f32.mrf.mxu3  ;;  %4352 = vmatmul.msk.bf16.gmra.mxu2 %vm668_vm4, %v1237_v23  ;;  %v962_v54 = vpop.f32.mrf.mxu1  ;;  %v4506_v23 = vld [vmem:[%s5024_s26 + $0x98] sm:$0x1] }
 0x10e   : > { %v1673_v38 = vadd.f32 %v1597_v19, %v1386_v41  ;;  %v963_v21 = vadd.f32 %v962_v54, %v5429_v5  ;;  %v1161_v5 = vsel %vm5210_vm7, %v4336_v61, %v1160_v30  ;;  %v1164_v41 = vsel %vm5210_vm7, %v1162_v4, %v1163_v51  ;;  %v4507_v30 = vld [vmem:[%s5024_s26 + $0x9c] sm:$0xf] }
 0x10f   : > { %v2034_v47 = vshll.u32 %v4506_v23, 16  ;;  %v1218_v50 = vunpack.c.l.b16 %v1164_v41  ;;  %v2022_v19 = vrot.slane %v2021_v31, 4  ;;  %v2032_v54 = vrot.slane %v2031_v33, 4 }
 0x110   : > { %v1313_v9 = vpop.f32.mrf.mxu2  ;;  %v5528_v13 = vadd.f32 %v2251_v35, %v1673_v38  ;;  %v2039_v16 = vshrl.u32 %v4507_v30, 16  ;;  %v2042_v8 = vshll.u32 %v4507_v30, 16  ;;  %v2052_v41 = vshrl.u32 %v4508_v20, 16 }
 0x111   : > { %v1387_v14 = vadd.f32 %v1313_v9, %v961_v52  ;;  %v1217_v52 = vunpack.c.l.b16 %v1161_v5  ;;  %v2036_v38 = vrot.slane %v2034_v47, 5  ;;  %v4901_v9 = vld [vmem:[%s5024_s26 + $0x94] sm:$0xf]  ;;  %v2048_v5 = vshll.u32 %v4508_v20, 16 }
 0x112   : > { %4465 = vmatmul.msk.bf16.gmra.mxu3 %vm668_vm4, %v4841_v57  ;;  %v2041_v31 = vrot.slane %v2039_v16, 4  ;;  %v2044_v33 = vrot.slane %v2042_v8, 5 }
 0x113   : > { %v1238_v4 = vpack.c.b16 %v1218_v50, %v1217_v52  ;;  %v2037_v23 = vsel %vm5036_vm3, %v2032_v54, %v2036_v38  ;;  %v4337_v52 = vrot.slane %v1042_v25, 9 }
 0x114   : > { %v2254_v60 = vpop.f32.mrf.mxu0  ;;  %v2045_v20 = vor.u32 %v2044_v33, %v2041_v31  ;;  %v4511_v31 = vld [vmem:[%s5024_s26 + $0xac] sm:$0xf] }
 0x115   : > { %v1600_v48 = vpop.f32.mrf.mxu3  ;;  %v965_v35 = vpop.f32.mrf.mxu1 }
 0x116   : > { %v1674_v3 = vadd.f32 %v1600_v48, %v1387_v14  ;;  %v966_v27 = vadd.f32 %v965_v35, %v5452_v56  ;;  %v1167_v56 = vrot.slane %v4901_v9, 5  ;;  %v2027_v14 = vsel %vm5036_vm3, %v2022_v19, %v2026_v11  ;;  %v4842_v48 = vld [vmem:[%s5024_s26 + $0x90] sm:$0xff] }
 0x117   : > { %4530 = vmatmul.msk.bf16.gmra.mxu0 %vm668_vm4, %v2178_v62  ;;  %v4902_v62 = vld [vmem:[%s5024_s26 + $0x98] sm:$0x1]  ;;  %v2158_v50 = vunpack.c.l.b16 %v2027_v14  ;;  %v2054_v19 = vrot.slane %v2052_v41, 4  ;;  %v4827_v9 = vld [vmem:[%s5024_s26 + $0x90] sm:$0xff] }
 0x118   : > { %v1315_v51 = vpop.f32.mrf.mxu2  ;;  %4320 = vmatmul.msk.bf16.gmra.mxu1 %vm668_vm4, %v4826_v44  ;;  %v5541_v57 = vadd.f32 %v2254_v60, %v1674_v3  ;;  %v1170_v60 = vrot.slane %v4902_v62, 5  ;;  %v1169_v11 = vrot.slane %v1167_v56, 4  ;;  %v2159_v3 = vunpack.c.l.b16 %v2037_v23 }
 0x119   : > { %v1388_v61 = vadd.f32 %v1315_v51, %v963_v21  ;;  %v2050_v51 = vrot.slane %v2048_v5, 5  ;;  %v2046_v62 = vrot.slane %v2045_v20, 4  ;;  %v4904_v20 = vld [vmem:[%s5024_s26 + $0xa4] sm:$0x1] }
 0x11a   : > { %v2179_v16 = vpack.c.b16 %v2159_v3, %v2158_v50  ;;  %v4903_v50 = vld [vmem:[%s5024_s26 + $0xa0] sm:$0xf] }
 0x11b   : > { %v2055_v25 = vor.u32 %v2054_v19, %v2050_v51  ;;  %v1174_v3 = vrot.slane %v4903_v50, 5  ;;  %v1043_v19 = vld [vmem:[%s5024_s26 + $0x9c] sm:$0xe] }
 0x11c   : > { %v2256_v1 = vpop.f32.mrf.mxu0 }
 0x11d   : > { %v1602_v21 = vpop.f32.mrf.mxu3  ;;  %4353 = vmatmul.msk.bf16.gmra.mxu2 %vm668_vm4, %v1238_v4  ;;  %v967_v44 = vpop.f32.mrf.mxu1  ;;  %v4509_v4 = vld [vmem:[%s5024_s26 + $0xa4] sm:$0x1] }
 0x11e   : > { %v1675_v47 = vadd.f32 %v1602_v21, %v1388_v61  ;;  %v968_v35 = vadd.f32 %v967_v44, %v5470_v24  ;;  %v1168_v61 = vsel %vm5210_vm7, %v4337_v52, %v1167_v56  ;;  %v1171_v24 = vsel %vm5210_vm7, %v1169_v11, %v1170_v60  ;;  %v4510_v21 = vld [vmem:[%s5024_s26 + $0xa8] sm:$0xf] }
 0x11f   : > { %v2058_v14 = vshll.u32 %v4509_v4, 16  ;;  %v1220_v5 = vunpack.c.l.b16 %v1171_v24  ;;  %v2056_v60 = vrot.slane %v2055_v25, 4  ;;  %v2063_v52 = vshrl.u32 %v4510_v21, 16 }
 0x120   : > { %v1318_v30 = vpop.f32.mrf.mxu2  ;;  %v5554_v54 = vadd.f32 %v2256_v1, %v1675_v47  ;;  %v2051_v11 = vsel %vm5036_vm3, %v2046_v62, %v2050_v51  ;;  %v2076_v4 = vshrl.u32 %v4511_v31, 16 }
 0x121   : > { %v1389_v38 = vadd.f32 %v1318_v30, %v966_v27  ;;  %v1219_v27 = vunpack.c.l.b16 %v1168_v61  ;;  %v2060_v44 = vrot.slane %v2058_v14, 5  ;;  %v2066_v30 = vshll.u32 %v4510_v21, 16  ;;  %v4843_v14 = vld [vmem:[%s5024_s26 + $0x9c] sm:$0xff] }
 0x122   : > { %4466 = vmatmul.msk.bf16.gmra.mxu3 %vm668_vm4, %v4842_v48  ;;  %v2065_v51 = vrot.slane %v2063_v52, 4 }
 0x123   : > { %v1239_v48 = vpack.c.b16 %v1220_v5, %v1219_v27  ;;  %v2061_v24 = vsel %vm5036_vm3, %v2056_v60, %v2060_v44  ;;  %v1176_v27 = vrot.slane %v1174_v3, 4  ;;  %v2068_v5 = vrot.slane %v2066_v30, 5  ;;  %v4512_v44 = vld [vmem:[%s5024_s26 + $0xb0] sm:$0x1] }
 0x124   : > { %v2259_v8 = vpop.f32.mrf.mxu0  ;;  %v2161_v62 = vunpack.c.l.b16 %v2061_v24 }
 0x125   : > { %v1605_v1 = vpop.f32.mrf.mxu3  ;;  %v970_v23 = vpop.f32.mrf.mxu1  ;;  %v2069_v52 = vor.u32 %v2068_v5, %v2065_v51 }
 0x126   : > { %v1676_v41 = vadd.f32 %v1605_v1, %v1389_v38  ;;  %v2072_v38 = vshll.u32 %v4511_v31, 16  ;;  %v4338_v1 = vrot.slane %v1043_v19, 9  ;;  %v4828_v19 = vld [vmem:[%s5024_s26 + $0x9c] sm:$0xff] }
 0x127   : > { %4531 = vmatmul.msk.bf16.gmra.mxu0 %vm668_vm4, %v2179_v16  ;;  %v1177_v16 = vrot.slane %v4904_v20, 5 }
 0x128   : > { %v1320_v56 = vpop.f32.mrf.mxu2  ;;  %4321 = vmatmul.msk.bf16.gmra.mxu1 %vm668_vm4, %v4827_v9  ;;  %v5567_v33 = vadd.f32 %v2259_v8, %v1676_v41  ;;  %v2160_v8 = vunpack.c.l.b16 %v2051_v11  ;;  %v971_v41 = vadd.f32 %v970_v23, %v5305_v7  ;;  %v2074_v21 = vrot.slane %v2072_v38, 5 }
 0x129   : > { %v1390_v47 = vadd.f32 %v1320_v56, %v968_v35  ;;  %v2078_v56 = vrot.slane %v2076_v4, 4  ;;  %v2082_v11 = vshll.u32 %v4512_v44, 16 }
 0x12a   : > { %v2180_v7 = vpack.c.b16 %v2161_v62, %v2160_v8  ;;  %v4513_v8 = vld [vmem:[%s5024_s26 + $0xb4] sm:$0xf] }
 0x12b   : > { %v2079_v23 = vor.u32 %v2078_v56, %v2074_v21  ;;  %v2084_v51 = vrot.slane %v2082_v11, 5  ;;  %v2090_v44 = vshll.u32 %v4513_v8, 16 }
 0x12c   : > { %v2261_v61 = vpop.f32.mrf.mxu0 }
 0x12d   : > { %v1607_v35 = vpop.f32.mrf.mxu3  ;;  %4354 = vmatmul.msk.bf16.gmra.mxu2 %vm668_vm4, %v1239_v48  ;;  %v972_v9 = vpop.f32.mrf.mxu1  ;;  %v1178_v48 = vsel %vm5210_vm7, %v1176_v27, %v1177_v16  ;;  %v2080_v16 = vrot.slane %v2079_v23, 4 }
 0x12e   : > { %v1677_v25 = vadd.f32 %v1607_v35, %v1390_v47  ;;  %v1175_v47 = vsel %vm5210_vm7, %v4338_v1, %v1174_v3  ;;  %v1222_v24 = vunpack.c.l.b16 %v1178_v48  ;;  %v2070_v35 = vrot.slane %v2069_v52, 4  ;;  %v4906_v52 = vld [vmem:[%s5024_s26 + $0xb0] sm:$0x1] }
 0x12f   : > { %v973_v3 = vadd.f32 %v972_v9, %v5321_v34  ;;  %v2087_v34 = vshrl.u32 %v4513_v8, 16  ;;  %v2085_v9 = vsel %vm5036_vm3, %v2080_v16, %v2084_v51 }
 0x130   : > { %v1323_v60 = vpop.f32.mrf.mxu2  ;;  %v5580_v31 = vadd.f32 %v2261_v61, %v1677_v25  ;;  %v1221_v61 = vunpack.c.l.b16 %v1175_v47  ;;  %v2075_v56 = vsel %vm5036_vm3, %v2070_v35, %v2074_v21 }
 0x131   : > { %v1391_v50 = vadd.f32 %v1323_v60, %v971_v41  ;;  %v4905_v41 = vld [vmem:[%s5024_s26 + $0xac] sm:$0xf]  ;;  %v1044_v60 = vld [vmem:[%s5024_s26 + $0xa8] sm:$0xe] }
 0x132   : > { %4467 = vmatmul.msk.bf16.gmra.mxu3 %vm668_vm4, %v4843_v14  ;;  %v4514_v14 = vld [vmem:[%s5024_s26 + $0xb8] sm:$0xf]  ;;  %v1240_v5 = vpack.c.b16 %v1222_v24, %v1221_v61  ;;  %v1181_v62 = vrot.slane %v4905_v41, 5  ;;  %v2162_v61 = vunpack.c.l.b16 %v2075_v56  ;;  %v2163_v24 = vunpack.c.l.b16 %v2085_v9  ;;  %v4515_v41 = vld [vmem:[%s5024_s26 + $0xbc] sm:$0x1] }
 0x133   : > { %v2100_v47 = vshrl.u32 %v4514_v14, 16 }
 0x134   : > { %v2264_v30 = vpop.f32.mrf.mxu0 }
 0x135   : > { %v1610_v38 = vpop.f32.mrf.mxu3  ;;  %v975_v4 = vpop.f32.mrf.mxu1  ;;  %v2102_v51 = vrot.slane %v2100_v47, 4 }
 0x136   : > { %v1678_v20 = vadd.f32 %v1610_v38, %v1391_v50  ;;  %v2096_v50 = vshll.u32 %v4514_v14, 16  ;;  %v4844_v38 = vld [vmem:[%s5024_s26 + $0xa8] sm:$0xff]  ;;  %v976_v35 = vadd.f32 %v975_v4, %v5341_v58  ;;  %v2181_v58 = vpack.c.b16 %v2163_v24, %v2162_v61 }
 0x137   : > { %4532 = vmatmul.msk.bf16.gmra.mxu0 %vm668_vm4, %v2180_v7  ;;  %v1184_v7 = vrot.slane %v4906_v52, 5 }
 0x138   : > { %v1325_v25 = vpop.f32.mrf.mxu2  ;;  %4322 = vmatmul.msk.bf16.gmra.mxu1 %vm668_vm4, %v4828_v19  ;;  %v5593_v1 = vadd.f32 %v2264_v30, %v1678_v20  ;;  %v4339_v30 = vrot.slane %v1044_v60, 9  ;;  %v1183_v19 = vrot.slane %v1181_v62, 4  ;;  %v2089_v20 = vrot.slane %v2087_v34, 4  ;;  %v4829_v34 = vld [vmem:[%s5024_s26 + $0xa8] sm:$0xff] }
 0x139   : > { %v1392_v27 = vadd.f32 %v1325_v25, %v973_v3  ;;  %v2092_v3 = vrot.slane %v2090_v44, 5  ;;  %v5605_v16 = vrot.slane %v2096_v50, 5  ;;  %v2106_v50 = vshll.u32 %v4515_v41, 16 }
 0x13b   : > { %v2093_v4 = vor.u32 %v2092_v3, %v2089_v20  ;;  %v2103_v56 = vor.u32 %v2102_v51, %v5605_v16  ;;  %v2108_v20 = vrot.slane %v2106_v50, 5 }
 0x13c   : > { %v2266_v48 = vpop.f32.mrf.mxu0 }
 0x13d   : > { %v1612_v23 = vpop.f32.mrf.mxu3  ;;  %4355 = vmatmul.msk.bf16.gmra.mxu2 %vm668_vm4, %v1240_v5  ;;  %v977_v11 = vpop.f32.mrf.mxu1  ;;  %v1182_v5 = vsel %vm5210_vm7, %v4339_v30, %v1181_v62  ;;  %v4516_v62 = vld [vmem:[%s5024_s26 + $0xc0] sm:$0xf]  ;;  %v4907_v30 = vld [vmem:[%s5024_s26 + $0x10] sm:$0xf] }
 0x13e   : > { %v1679_v21 = vadd.f32 %v1612_v23, %v1392_v27  ;;  %v1185_v27 = vsel %vm5210_vm7, %v1183_v19, %v1184_v7  ;;  %v1223_v9 = vunpack.c.l.b16 %v1182_v5  ;;  %v4517_v23 = vld [vmem:[%s5024_s26 + $0xc4] sm:$0xf]  ;;  %v2422_v7 = vrot.slane %v4907_v30, 5 }
 0x13f   : > { %v1224_v44 = vunpack.c.l.b16 %v1185_v27  ;;  %v978_v19 = vadd.f32 %v977_v11, %v5358_v28  ;;  %v2114_v3 = vshll.u32 %v4516_v62, 16  ;;  %v4908_v27 = vld [vmem:[%s5024_s26 + $0xb8] sm:$0xf]  ;;  %v1045_v11 = vld [vmem:[%s5024_s26 + $0xb4] sm:$0xe] }
 0x140   : > { %v1328_v8 = vpop.f32.mrf.mxu2  ;;  %v5607_v25 = vadd.f32 %v2266_v48, %v1679_v21  ;;  %v2094_v21 = vrot.slane %v2093_v4, 4  ;;  %v1188_v41 = vrot.slane %v4908_v27, 5  ;;  %v2424_v4 = vrot.slane %v2422_v7, 4  ;;  %v4845_v27 = vld [vmem:[%s5024_s26 + $0xb4] sm:$0xff] }
 0x141   : > { %v1393_v14 = vadd.f32 %v1328_v8, %v976_v35  ;;  %v1241_v24 = vpack.c.b16 %v1224_v44, %v1223_v9  ;;  %v2111_v35 = vshrl.u32 %v4516_v62, 16  ;;  %v2120_v8 = vshll.u32 %v4517_v23, 16 }
 0x142   : > { %4468 = vmatmul.msk.bf16.gmra.mxu3 %vm668_vm4, %v4844_v38  ;;  %v2104_v38 = vrot.slane %v2103_v56, 4  ;;  %v4910_v56 = vld [vmem:[%s5024_s26 + $0x14] sm:$0x1]  ;;  %v2099_v9 = vsel %vm5036_vm3, %v2094_v21, %v5605_v16 }
 0x143   : > { %v2113_v62 = vrot.slane %v2111_v35, 4  ;;  %v2164_v21 = vunpack.c.l.b16 %v2099_v9 }
 0x144   : > { %v2269_v60 = vpop.f32.mrf.mxu0  ;;  %v2109_v44 = vsel %vm5036_vm3, %v2104_v38, %v2108_v20 }
 0x145   : > { %v1615_v47 = vpop.f32.mrf.mxu3  ;;  %v980_v48 = vpop.f32.mrf.mxu1  ;;  %v2165_v38 = vunpack.c.l.b16 %v2109_v44 }
 0x146   : > { %v1680_v52 = vadd.f32 %v1615_v47, %v1393_v14  ;;  %v2124_v14 = vshrl.u32 %v4517_v23, 16  ;;  %v2425_v47 = vrot.slane %v4910_v56, 5  ;;  %v5635_v23 = vrot.slane %v2120_v8, 5 }
 0x147   : > { %4533 = vmatmul.msk.bf16.gmra.mxu0 %vm668_vm4, %v2181_v58  ;;  %v4909_v58 = vld [vmem:[%s5024_s26 + $0xbc] sm:$0x1]  ;;  %v1190_v56 = vrot.slane %v1188_v41, 4  ;;  %v981_v16 = vadd.f32 %v980_v48, %v5378_v53 }
 0x148   : > { %v1330_v61 = vpop.f32.mrf.mxu2  ;;  %4323 = vmatmul.msk.bf16.gmra.mxu1 %vm668_vm4, %v4829_v34  ;;  %v5623_v5 = vadd.f32 %v2269_v60, %v1680_v52  ;;  %v1191_v28 = vrot.slane %v4909_v58, 5  ;;  %v2116_v52 = vrot.slane %v2114_v3, 5  ;;  %v2126_v30 = vrot.slane %v2124_v14, 4 }
 0x149   : > { %v1394_v51 = vadd.f32 %v1330_v61, %v978_v19  ;;  %v4536_v19 = vld [vmem:[%s5024_s26 + $0xc] sm:$0xe]  ;;  %v4340_v58 = vrot.slane %v1045_v11, 9  ;;  %v2426_v3 = vsel %vm5210_vm7, %v2424_v4, %v2425_v47  ;;  %v4698_v4 = vld [vmem:[%s5024_s26 + $0x18] sm:$0xf] }
 0x14a   : > { %6398 = vst [vmem:[#allocation2_spill] sm:$0xff] %v5623_v5  ;;  %v4552_v5 = vrot.slane %v4536_v19, 9  ;;  %v2117_v8 = vor.u32 %v2116_v52, %v2113_v62  ;;  %v2535_v11 = vunpack.c.l.b16 %v2426_v3  ;;  %v1192_v48 = vsel %vm5210_vm7, %v1190_v56, %v1191_v28  ;;  %v4830_v62 = vld [vmem:[%s5024_s26 + $0xb4] sm:$0xff]  ;;  %v5658_v52 = vld [vmem:[%s5024_s26 + $0x1c] sm:$0xf] }
 0x14b   : > { %v1189_v53 = vsel %vm5210_vm7, %v4340_v58, %v1188_v41  ;;  %v2127_v9 = vor.u32 %v2126_v30, %v5635_v23  ;;  %v1226_v41 = vunpack.c.l.b16 %v1192_v48  ;;  %v3090_v56 = vshrl.u32 %v4698_v4, 16 }
 0x14c   : > { %v2271_v34 = vpop.f32.mrf.mxu0  ;;  %v2423_v35 = vsel %vm5210_vm7, %v4552_v5, %v2422_v7  ;;  %v2182_v7 = vpack.c.b16 %v2165_v38, %v2164_v21  ;;  %v2118_v58 = vrot.slane %v2117_v8, 4  ;;  %v3093_v30 = vshll.u32 %v4698_v4, 16 }
 0x14d   : > { %v1617_v60 = vpop.f32.mrf.mxu3  ;;  %4356 = vmatmul.msk.bf16.gmra.mxu2 %vm668_vm4, %v1241_v24  ;;  %v982_v50 = vpop.f32.mrf.mxu1  ;;  %v4518_v24 = vld [vmem:[%s5024_s26 + $0xc8] sm:$0x1]  ;;  %v2534_v14 = vunpack.c.l.b16 %v2423_v35  ;;  %v2128_v28 = vrot.slane %v2127_v9, 4  ;;  %v3103_v38 = vshrl.u32 %v5658_v52, 16  ;;  %v3092_v8 = vrot.slane %v3090_v56, 4 }
 0x14e   : > { %v1681_v61 = vadd.f32 %v1617_v60, %v1394_v51  ;;  %v2130_v5 = vshll.u32 %v4518_v24, 16  ;;  %v983_v21 = vadd.f32 %v982_v50, %v5398_v17  ;;  %v2123_v17 = vsel %vm5036_vm3, %v2118_v58, %v5635_v23  ;;  %v4700_v9 = vld [vmem:[%s5024_s26 + $0x20] sm:$0x1]  ;;  %v4701_v56 = vld [vmem:[%s5024_s26 + $0x24] sm:$0xf] }
 0x14f   : > { %v5651_v44 = vpack.c.b16 %v2535_v11, %v2534_v14  ;;  %v3095_v14 = vrot.slane %v3093_v30, 5  ;;  %v3109_v58 = vshll.u32 %v4700_v9, 16  ;;  %v5678_v30 = vld [vmem:[%s5024_s26 + $0x28] sm:$0xf] }
 0x150   : > { %v1333_v20 = vpop.f32.mrf.mxu2  ;;  %v5654_v47 = vadd.f32 %v2271_v34, %v1681_v61  ;;  %v2132_v34 = vrot.slane %v2130_v5, 5  ;;  %v3099_v61 = vshll.u32 %v5658_v52, 16 }
 0x151   : > { %v1395_v51 = vadd.f32 %v1333_v20, %v981_v16  ;;  %v1225_v16 = vunpack.c.l.b16 %v1189_v53  ;;  %v3105_v53 = vrot.slane %v3103_v38, 4  ;;  %v3111_v38 = vrot.slane %v3109_v58, 5 }
 0x152   : > { %4469 = vmatmul.msk.bf16.gmra.mxu3 %vm668_vm4, %v4845_v27  ;;  %v2133_v50 = vsel %vm5036_vm3, %v2128_v28, %v2132_v34  ;;  %v3101_v11 = vrot.slane %v3099_v61, 5 }
 0x153   : > { %v1242_v3 = vpack.c.b16 %v1226_v41, %v1225_v16  ;;  %v3096_v16 = vor.u32 %v3095_v14, %v3092_v8  ;;  %v3117_v8 = vshll.u32 %v4701_v56, 16  ;;  %v3123_v14 = vshll.u32 %v5678_v30, 16 }
 0x154   : > { %v2274_v60 = vpop.f32.mrf.mxu0  ;;  %v3106_v41 = vor.u32 %v3105_v53, %v3101_v11 }
 0x155   : > { %v1620_v19 = vpop.f32.mrf.mxu3  ;;  %v985_v27 = vpop.f32.mrf.mxu1  ;;  %v3097_v34 = vrot.slane %v3096_v16, 4 }
 0x156   : > { %v1682_v20 = vadd.f32 %v1620_v19, %v1395_v51  ;;  %v2167_v19 = vunpack.c.l.b16 %v2133_v50  ;;  %v986_v23 = vadd.f32 %v985_v27, %v5421_v2  ;;  %v3107_v61 = vrot.slane %v3106_v41, 4 }
 0x157   : > { %4534 = vmatmul.msk.bf16.gmra.mxu0 %vm668_vm4, %v2182_v7 }
 0x158   : > { %v1335_v24 = vpop.f32.mrf.mxu2  ;;  %4324 = vmatmul.msk.bf16.gmra.mxu1 %vm668_vm4, %v4830_v62  ;;  %v5665_v51 = vadd.f32 %v2274_v60, %v1682_v20  ;;  %v4846_v60 = vld [vmem:[%s5024_s26 + $0xc0] sm:$0xff]  ;;  %v2166_v62 = vunpack.c.l.b16 %v2123_v17  ;;  %v3127_v17 = vshrl.u32 %v5678_v30, 16  ;;  %v3112_v41 = vsel %vm5036_vm3, %v3107_v61, %v3111_v38  ;;  %v5704_v38 = vld [vmem:[%s5024_s26 + $0x2c] sm:$0x1] }
 0x159   : > { %v1396_v35 = vadd.f32 %v1335_v24, %v983_v21  ;;  %v4763_v24 = vld [vmem:[%s5024_s26 + $0x18] sm:$0xe]  ;;  %v3476_v61 = vunpack.c.l.b16 %v3112_v41 }
 0x15a   : > { %v2183_v21 = vpack.c.b16 %v2167_v19, %v2166_v62  ;;  %v4912_v62 = vld [vmem:[%s5024_s26 + $0x20] sm:$0x1] }
 0x15b   : > { %v2432_v19 = vrot.slane %v4912_v62, 5 }
 0x15c   : > { %v2276_v48 = vpop.f32.mrf.mxu0 }
 0x15d   : > { %v1622_v7 = vpop.f32.mrf.mxu3  ;;  %4357 = vmatmul.msk.bf16.gmra.mxu2 %vm668_vm4, %v1242_v3  ;;  %v987_v5 = vpop.f32.mrf.mxu1  ;;  %v3114_v3 = vshrl.u32 %v4701_v56, 16 }
 0x15e   : > { %v1683_v4 = vadd.f32 %v1622_v7, %v1396_v35  ;;  %v3761_v35 = vrot.slane %v5658_v52, 5  ;;  %v4911_v7 = vld [vmem:[%s5024_s26 + $0x1c] sm:$0xf]  ;;  %v3102_v52 = vsel %vm5036_vm3, %v3097_v34, %v3101_v11  ;;  %v3129_v11 = vrot.slane %v3127_v17, 4 }
 0x160   : > { %v1338_v20 = vpop.f32.mrf.mxu2  ;;  %v5683_v2 = vadd.f32 %v2276_v48, %v1683_v4  ;;  %v4779_v48 = vrot.slane %v4763_v24, 9  ;;  %v4537_v4 = vld [vmem:[%s5024_s26 + $0x18] sm:$0xe]  ;;  %v3763_v58 = vrot.slane %v3761_v35, 4 }
 0x161   : > { %v1397_v28 = vadd.f32 %v1338_v20, %v986_v23  ;;  %v988_v23 = vadd.f32 %v987_v5, %v5441_v29  ;;  %v3764_v20 = vrot.slane %v4700_v9, 5  ;;  %v4847_v24 = vld [vmem:[%s5024_s26 + $0x18] sm:$0xff]  ;;  %v3475_v5 = vunpack.c.l.b16 %v3102_v52 }
 0x162   : > { %4470 = vmatmul.msk.bf16.gmra.mxu3 %vm668_vm4, %v4846_v60  ;;  %6399 = vst [vmem:[#allocation3_spill] sm:$0xff] %v5683_v2  ;;  %v2429_v60 = vrot.slane %v4911_v7, 5  ;;  %v5698_v7 = vrot.slane %v3123_v14, 5  ;;  %v3762_v2 = vsel %vm5210_vm7, %v4779_v48, %v3761_v35  ;;  %v3133_v35 = vshll.u32 %v5704_v38, 16 }
 0x163   : > { %v3507_v48 = vpack.c.b16 %v3476_v61, %v3475_v5  ;;  %v4913_v5 = vld [vmem:[%s5024_s26 + $0x28] sm:$0xf] }
 0x164   : > { %v2279_v27 = vpop.f32.mrf.mxu0  ;;  %v2431_v62 = vrot.slane %v2429_v60, 4  ;;  %v2436_v61 = vrot.slane %v4913_v5, 5 }
 0x165   : > { %v1625_v50 = vpop.f32.mrf.mxu3  ;;  %v990_v53 = vpop.f32.mrf.mxu1 }
 0x166   : > { %v1684_v16 = vadd.f32 %v1625_v50, %v1397_v28  ;;  %v3116_v28 = vrot.slane %v3114_v3, 4  ;;  %v3119_v50 = vrot.slane %v3117_v8, 5  ;;  %v2433_v17 = vsel %vm5210_vm7, %v2431_v62, %v2432_v19  ;;  %v5723_v62 = vld [vmem:[%s5024_s26 + $0x34] sm:$0xf] }
 0x167   : > { %4535 = vmatmul.msk.bf16.gmra.mxu0 %vm668_vm4, %v2183_v21  ;;  %v4553_v21 = vrot.slane %v4537_v4, 9  ;;  %v991_v4 = vadd.f32 %v990_v53, %v5323_v37 }
 0x168   : > { %v1340_v56 = vpop.f32.mrf.mxu2  ;;  %4569 = vmatmul.msk.bf16.vlgmr.msra.gmra.mxu1 %vm668_vm4, %v5651_v44  ;;  %v5701_v29 = vadd.f32 %v2279_v27, %v1684_v16  ;;  %v3765_v44 = vsel %vm5210_vm7, %v3763_v58, %v3764_v20  ;;  %v3120_v3 = vor.u32 %v3119_v50, %v3116_v28  ;;  %v3130_v16 = vor.u32 %v3129_v11, %v5698_v7  ;;  %v4764_v11 = vld [vmem:[%s5024_s26 + $0x24] sm:$0xe] }
 0x169   : > { %v1398_v34 = vadd.f32 %v1340_v56, %v988_v23  ;;  %v2430_v27 = vsel %vm5210_vm7, %v4553_v21, %v2429_v60  ;;  %v3873_v23 = vunpack.c.l.b16 %v3762_v2  ;;  %v3874_v41 = vunpack.c.l.b16 %v3765_v44 }
 0x16a   : > { %v2536_v20 = vunpack.c.l.b16 %v2430_v27  ;;  %v2537_v60 = vunpack.c.l.b16 %v2433_v17  ;;  %v3121_v28 = vrot.slane %v3120_v3, 4  ;;  %v3131_v19 = vrot.slane %v3130_v16, 4 }
 0x16b   : > { %v3135_v50 = vrot.slane %v3133_v35, 5  ;;  %v3768_v21 = vrot.slane %v5678_v30, 5  ;;  %v4780_v17 = vrot.slane %v4764_v11, 9  ;;  %v4538_v30 = vld [vmem:[%s5024_s26 + $0x24] sm:$0xe] }
 0x16c   : > { %v2281_v9 = vpop.f32.mrf.mxu0  ;;  %v2567_v53 = vpack.c.b16 %v2537_v60, %v2536_v20 }
 0x16d   : > { %v1627_v8 = vpop.f32.mrf.mxu3  ;;  %4682 = vmatmul.msk.bf16.vlgmr.msra.gmra.mxu2 %vm668_vm4, %v4847_v24  ;;  %v992_v14 = vpop.f32.mrf.mxu1  ;;  %v4704_v24 = vld [vmem:[%s5024_s26 + $0x30] sm:$0xf]  ;;  %v3136_v27 = vsel %vm5036_vm3, %v3131_v19, %v3135_v50  ;;  %v4848_v50 = vld [vmem:[%s5024_s26 + $0x24] sm:$0xff] }
 0x16e   : > { %v1685_v52 = vadd.f32 %v1627_v8, %v1398_v34  ;;  %v3905_v34 = vpack.c.b16 %v3874_v41, %v3873_v23  ;;  %v3126_v8 = vsel %vm5036_vm3, %v3121_v28, %v5698_v7  ;;  %v3138_v16 = vshrl.u32 %v4704_v24, 16  ;;  %v4914_v41 = vld [vmem:[%s5024_s26 + $0x2c] sm:$0x1] }
 0x16f   : > { %v3770_v23 = vrot.slane %v3768_v21, 4  ;;  %v3771_v7 = vrot.slane %v5704_v38, 5  ;;  %v3477_v60 = vunpack.c.l.b16 %v3126_v8  ;;  %v2438_v28 = vrot.slane %v2436_v61, 4 }
 0x170   : > { %v1343_v58 = vpop.f32.mrf.mxu2  ;;  %v5725_v37 = vadd.f32 %v2281_v9, %v1685_v52  ;;  %v3141_v9 = vshll.u32 %v4704_v24, 16  ;;  %v3147_v52 = vshll.u32 %v5723_v62, 16  ;;  %v3478_v11 = vunpack.c.l.b16 %v3136_v27 }
 0x171   : > { %v1399_v56 = vadd.f32 %v1343_v58, %v991_v4  ;;  %v993_v4 = vadd.f32 %v992_v14, %v5344_v63  ;;  %v2439_v58 = vrot.slane %v4914_v41, 5  ;;  %v3769_v24 = vsel %vm5210_vm7, %v4780_v17, %v3768_v21 }
 0x172   : > { %4747 = vmatmul.msk.bf16.vlgmr.msra.gmra.mxu3 %vm668_vm4, %v3507_v48  ;;  %v3151_v48 = vshrl.u32 %v5723_v62, 16  ;;  %v3140_v63 = vrot.slane %v3138_v16, 4  ;;  %v3143_v14 = vrot.slane %v3141_v9, 5  ;;  %v5746_v38 = vrot.slane %v3147_v52, 5 }
 0x173   : > { %v2440_v27 = vsel %vm5210_vm7, %v2438_v28, %v2439_v58  ;;  %v3875_v17 = vunpack.c.l.b16 %v3769_v24  ;;  %v4765_v24 = vld [vmem:[%s5024_s26 + $0x30] sm:$0xe] }
 0x174   : > { %v2284_v2 = vpop.f32.mrf.mxu0  ;;  %v3153_v5 = vrot.slane %v3151_v48, 4  ;;  %v3144_v52 = vor.u32 %v3143_v14, %v3140_v63 }
 0x175   : > { %v1630_v44 = vpop.f32.mrf.mxu3  ;;  %v995_v3 = vpop.f32.mrf.mxu1 }
 0x176   : > { %v1686_v35 = vadd.f32 %v1630_v44, %v1399_v56  ;;  %v4554_v56 = vrot.slane %v4538_v30, 9  ;;  %v5755_v30 = vld [vmem:[%s5024_s26 + $0x38] sm:$0x1]  ;;  %v3154_v48 = vor.u32 %v3153_v5, %v5746_v38  ;;  %v3145_v28 = vrot.slane %v3144_v52, 4 }
 0x177   : > { %4796 = vmatmul.msk.bf16.vlgmr.msra.gmra.mxu0 %vm668_vm4, %v3905_v34 }
 0x178   : > { %v1345_v20 = vpop.f32.mrf.mxu2  ;;  %4570 = vmatmul.msk.bf16.gmra.mxu1 %vm668_vm4, %v2567_v53  ;;  %v5744_v34 = vadd.f32 %v2284_v2, %v1686_v35  ;;  %v3772_v53 = vsel %vm5210_vm7, %v3770_v23, %v3771_v7  ;;  %v2437_v8 = vsel %vm5210_vm7, %v4554_v56, %v2436_v61  ;;  %v3508_v2 = vpack.c.b16 %v3478_v11, %v3477_v60  ;;  %v5763_v56 = vld [vmem:[%s5024_s26 + $0x40] sm:$0xf] }
 0x179   : > { %v1400_v19 = vadd.f32 %v1345_v20, %v993_v4  ;;  %v3876_v9 = vunpack.c.l.b16 %v3772_v53  ;;  %v996_v61 = vadd.f32 %v995_v3, %v5361_v22  ;;  %v2538_v4 = vunpack.c.l.b16 %v2437_v8  ;;  %v4707_v20 = vld [vmem:[%s5024_s26 + $0x3c] sm:$0xf] }
 0x17a   : > { %v2539_v23 = vunpack.c.l.b16 %v2440_v27  ;;  %v3157_v7 = vshll.u32 %v5755_v30, 16  ;;  %v3775_v22 = vrot.slane %v5723_v62, 5  ;;  %v3162_v14 = vshrl.u32 %v4707_v20, 16 }
 0x17b   : > { %v3906_v60 = vpack.c.b16 %v3876_v9, %v3875_v17  ;;  %v3165_v5 = vshll.u32 %v4707_v20, 16  ;;  %v3171_v53 = vshll.u32 %v5763_v56, 16  ;;  %v3175_v8 = vshrl.u32 %v5763_v56, 16  ;;  %v4916_v9 = vld [vmem:[%s5024_s26 + $0x38] sm:$0x1] }
 0x17c   : > { %v2286_v44 = vpop.f32.mrf.mxu0  ;;  %v3159_v11 = vrot.slane %v3157_v7, 5  ;;  %v2446_v52 = vrot.slane %v4916_v9, 5  ;;  %v3778_v62 = vrot.slane %v5755_v30, 5  ;;  %v3777_v7 = vrot.slane %v3775_v22, 4  ;;  %v5790_v9 = vld [vmem:[%s5024_s26 + $0x44] sm:$0x1] }
 0x17d   : > { %v1632_v21 = vpop.f32.mrf.mxu3  ;;  %4683 = vmatmul.msk.bf16.gmra.mxu2 %vm668_vm4, %v4848_v50  ;;  %v997_v16 = vpop.f32.mrf.mxu1  ;;  %v2568_v50 = vpack.c.b16 %v2539_v23, %v2538_v4  ;;  %v3150_v4 = vsel %vm5036_vm3, %v3145_v28, %v5746_v38  ;;  %v3167_v20 = vrot.slane %v3165_v5, 5  ;;  %v5784_v30 = vrot.slane %v3171_v53, 5 }
 0x17e   : > { %v1687_v35 = vadd.f32 %v1632_v21, %v1400_v19  ;;  %v3155_v19 = vrot.slane %v3154_v48, 4  ;;  %v3479_v38 = vunpack.c.l.b16 %v3150_v4 }
 0x180   : > { %v1348_v41 = vpop.f32.mrf.mxu2  ;;  %v5768_v3 = vadd.f32 %v2286_v44, %v1687_v35  ;;  %v4539_v44 = vld [vmem:[%s5024_s26 + $0x30] sm:$0xe]  ;;  %v998_v35 = vadd.f32 %v997_v16, %v5382_v55  ;;  %v3160_v23 = vsel %vm5036_vm3, %v3155_v19, %v3159_v11 }
 0x181   : > { %v1401_v58 = vadd.f32 %v1348_v41, %v996_v61  ;;  %v4781_v61 = vrot.slane %v4765_v24, 9  ;;  %v3177_v24 = vrot.slane %v3175_v8, 4  ;;  %v4555_v55 = vrot.slane %v4539_v44, 9 }
 0x182   : > { %4748 = vmatmul.msk.bf16.gmra.mxu3 %vm668_vm4, %v3508_v2  ;;  %v4915_v2 = vld [vmem:[%s5024_s26 + $0x34] sm:$0xf]  ;;  %v3480_v28 = vunpack.c.l.b16 %v3160_v23 }
 0x183   : > { %v2443_v17 = vrot.slane %v4915_v2, 5  ;;  %v3776_v11 = vsel %vm5210_vm7, %v4781_v61, %v3775_v22  ;;  %v3181_v22 = vshll.u32 %v5790_v9, 16 }
 0x184   : > { %v2289_v63 = vpop.f32.mrf.mxu0  ;;  %v3509_v44 = vpack.c.b16 %v3480_v28, %v3479_v38  ;;  %v4917_v28 = vld [vmem:[%s5024_s26 + $0x40] sm:$0xf] }
 0x185   : > { %v1635_v27 = vpop.f32.mrf.mxu3  ;;  %v1000_v21 = vpop.f32.mrf.mxu1  ;;  %v2445_v16 = vrot.slane %v2443_v17, 4 }
 0x186   : > { %v1688_v48 = vadd.f32 %v1635_v27, %v1401_v58  ;;  %v3164_v58 = vrot.slane %v3162_v14, 4  ;;  %v4849_v27 = vld [vmem:[%s5024_s26 + $0x30] sm:$0xff] }
 0x187   : > { %4797 = vmatmul.msk.bf16.gmra.mxu0 %vm668_vm4, %v3906_v60  ;;  %v2447_v8 = vsel %vm5210_vm7, %v2445_v16, %v2446_v52  ;;  %v5809_v16 = vld [vmem:[%s5024_s26 + $0x4c] sm:$0xf] }
 0x188   : > { %v1350_v41 = vpop.f32.mrf.mxu2  ;;  %4571 = vmatmul.msk.bf16.gmra.mxu1 %vm668_vm4, %v2568_v50  ;;  %v5787_v2 = vadd.f32 %v2289_v63, %v1688_v48  ;;  %v3779_v50 = vsel %vm5210_vm7, %v3777_v7, %v3778_v62  ;;  %v3168_v14 = vor.u32 %v3167_v20, %v3164_v58  ;;  %v2444_v63 = vsel %vm5210_vm7, %v4555_v55, %v2443_v17 }
 0x189   : > { %v1402_v60 = vadd.f32 %v1350_v41, %v998_v35  ;;  %v3178_v48 = vor.u32 %v3177_v24, %v5784_v30  ;;  %v1001_v62 = vadd.f32 %v1000_v21, %v5405_v26  ;;  %v3877_v35 = vunpack.c.l.b16 %v3776_v11  ;;  %v4766_v24 = vld [vmem:[%s5024_s26 + $0x3c] sm:$0xe] }
 0x18a   : > { %v3878_v4 = vunpack.c.l.b16 %v3779_v50  ;;  %v2540_v7 = vunpack.c.l.b16 %v2444_v63  ;;  %v2541_v17 = vunpack.c.l.b16 %v2447_v8  ;;  %v3169_v58 = vrot.slane %v3168_v14, 4 }
 0x18b   : > { %v3179_v52 = vrot.slane %v3178_v48, 4  ;;  %v3183_v20 = vrot.slane %v3181_v22, 5  ;;  %v3782_v55 = vrot.slane %v5763_v56, 5  ;;  %v2450_v11 = vrot.slane %v4917_v28, 5  ;;  %v4540_v56 = vld [vmem:[%s5024_s26 + $0x3c] sm:$0xe] }
 0x18c   : > { %v2291_v19 = vpop.f32.mrf.mxu0  ;;  %v2569_v38 = vpack.c.b16 %v2541_v17, %v2540_v7  ;;  %v4782_v8 = vrot.slane %v4766_v24, 9 }
 0x18d   : > { %v1637_v5 = vpop.f32.mrf.mxu3  ;;  %4684 = vmatmul.msk.bf16.gmra.mxu2 %vm668_vm4, %v4849_v27  ;;  %v1002_v53 = vpop.f32.mrf.mxu1  ;;  %v4710_v27 = vld [vmem:[%s5024_s26 + $0x48] sm:$0xf]  ;;  %v3184_v63 = vsel %vm5036_vm3, %v3179_v52, %v3183_v20  ;;  %v4850_v20 = vld [vmem:[%s5024_s26 + $0x3c] sm:$0xff] }
 0x18e   : > { %v1689_v61 = vadd.f32 %v1637_v5, %v1402_v60  ;;  %v3907_v60 = vpack.c.b16 %v3878_v4, %v3877_v35  ;;  %v3174_v5 = vsel %vm5036_vm3, %v3169_v58, %v5784_v30  ;;  %v3186_v48 = vshrl.u32 %v4710_v27, 16  ;;  %v4918_v4 = vld [vmem:[%s5024_s26 + $0x44] sm:$0x1] }
 0x18f   : > { %v3784_v35 = vrot.slane %v3782_v55, 4  ;;  %v3785_v30 = vrot.slane %v5790_v9, 5  ;;  %v3481_v17 = vunpack.c.l.b16 %v3174_v5  ;;  %v2452_v58 = vrot.slane %v2450_v11, 4 }
 0x190   : > { %v1353_v23 = vpop.f32.mrf.mxu2  ;;  %v5811_v26 = vadd.f32 %v2291_v19, %v1689_v61  ;;  %v3189_v19 = vshll.u32 %v4710_v27, 16  ;;  %v3195_v61 = vshll.u32 %v5809_v16, 16  ;;  %v3482_v24 = vunpack.c.l.b16 %v3184_v63 }
 0x191   : > { %v1403_v41 = vadd.f32 %v1353_v23, %v1001_v62  ;;  %v1003_v62 = vadd.f32 %v1002_v53, %v5423_v43  ;;  %v2453_v23 = vrot.slane %v4918_v4, 5  ;;  %v3783_v27 = vsel %vm5210_vm7, %v4782_v8, %v3782_v55 }
 0x192   : > { %4749 = vmatmul.msk.bf16.gmra.mxu3 %vm668_vm4, %v3509_v44  ;;  %v3199_v44 = vshrl.u32 %v5809_v16, 16  ;;  %v3188_v43 = vrot.slane %v3186_v48, 4  ;;  %v3191_v53 = vrot.slane %v3189_v19, 5  ;;  %v5832_v9 = vrot.slane %v3195_v61, 5 }
 0x193   : > { %v2454_v63 = vsel %vm5210_vm7, %v2452_v58, %v2453_v23  ;;  %v3879_v8 = vunpack.c.l.b16 %v3783_v27  ;;  %v4767_v27 = vld [vmem:[%s5024_s26 + $0x48] sm:$0xe] }
 0x194   : > { %v2294_v21 = vpop.f32.mrf.mxu0  ;;  %v3201_v28 = vrot.slane %v3199_v44, 4  ;;  %v3192_v61 = vor.u32 %v3191_v53, %v3188_v43 }
 0x195   : > { %v1640_v50 = vpop.f32.mrf.mxu3  ;;  %v1005_v14 = vpop.f32.mrf.mxu1 }
 0x196   : > { %v1690_v22 = vadd.f32 %v1640_v50, %v1403_v41  ;;  %v4556_v41 = vrot.slane %v4540_v56, 9  ;;  %v5841_v56 = vld [vmem:[%s5024_s26 + $0x50] sm:$0x1]  ;;  %v3202_v44 = vor.u32 %v3201_v28, %v5832_v9  ;;  %v3193_v58 = vrot.slane %v3192_v61, 4 }
 0x197   : > { %4798 = vmatmul.msk.bf16.gmra.mxu0 %vm668_vm4, %v3907_v60 }
 0x198   : > { %v1355_v7 = vpop.f32.mrf.mxu2  ;;  %4572 = vmatmul.msk.bf16.gmra.mxu1 %vm668_vm4, %v2569_v38  ;;  %v5830_v60 = vadd.f32 %v2294_v21, %v1690_v22  ;;  %v3786_v38 = vsel %vm5210_vm7, %v3784_v35, %v3785_v30  ;;  %v2451_v5 = vsel %vm5210_vm7, %v4556_v41, %v2450_v11  ;;  %v3510_v21 = vpack.c.b16 %v3482_v24, %v3481_v17  ;;  %v5849_v41 = vld [vmem:[%s5024_s26 + $0x58] sm:$0xf] }
 0x199   : > { %v1404_v52 = vadd.f32 %v1355_v7, %v1003_v62  ;;  %v3880_v19 = vunpack.c.l.b16 %v3786_v38  ;;  %v1006_v11 = vadd.f32 %v1005_v14, %v5444_v40  ;;  %v2542_v62 = vunpack.c.l.b16 %v2451_v5  ;;  %v4713_v7 = vld [vmem:[%s5024_s26 + $0x54] sm:$0xf] }
 0x19a   : > { %v2543_v35 = vunpack.c.l.b16 %v2454_v63  ;;  %v3205_v30 = vshll.u32 %v5841_v56, 16  ;;  %v3789_v40 = vrot.slane %v5809_v16, 5  ;;  %v3210_v53 = vshrl.u32 %v4713_v7, 16 }
 0x19b   : > { %v3908_v17 = vpack.c.b16 %v3880_v19, %v3879_v8  ;;  %v3213_v28 = vshll.u32 %v4713_v7, 16  ;;  %v3219_v38 = vshll.u32 %v5849_v41, 16  ;;  %v3223_v5 = vshrl.u32 %v5849_v41, 16  ;;  %v4920_v19 = vld [vmem:[%s5024_s26 + $0x50] sm:$0x1] }
 0x19c   : > { %v2296_v50 = vpop.f32.mrf.mxu0  ;;  %v3207_v24 = vrot.slane %v3205_v30, 5  ;;  %v2460_v61 = vrot.slane %v4920_v19, 5  ;;  %v3792_v16 = vrot.slane %v5841_v56, 5  ;;  %v3791_v30 = vrot.slane %v3789_v40, 4  ;;  %v5876_v19 = vld [vmem:[%s5024_s26 + $0x5c] sm:$0x1] }
 0x19d   : > { %v1642_v55 = vpop.f32.mrf.mxu3  ;;  %4685 = vmatmul.msk.bf16.gmra.mxu2 %vm668_vm4, %v4850_v20  ;;  %v1007_v48 = vpop.f32.mrf.mxu1  ;;  %v2570_v20 = vpack.c.b16 %v2543_v35, %v2542_v62  ;;  %v3198_v62 = vsel %vm5036_vm3, %v3193_v58, %v5832_v9  ;;  %v3215_v7 = vrot.slane %v3213_v28, 5  ;;  %v5870_v56 = vrot.slane %v3219_v38, 5 }
 0x19e   : > { %v1691_v22 = vadd.f32 %v1642_v55, %v1404_v52  ;;  %v3203_v52 = vrot.slane %v3202_v44, 4  ;;  %v3483_v9 = vunpack.c.l.b16 %v3198_v62 }
 0x1a0   : > { %v1358_v4 = vpop.f32.mrf.mxu2  ;;  %v5854_v14 = vadd.f32 %v2296_v50, %v1691_v22  ;;  %v4541_v50 = vld [vmem:[%s5024_s26 + $0x48] sm:$0xe]  ;;  %v1008_v22 = vadd.f32 %v1007_v48, %v5459_v10  ;;  %v3208_v35 = vsel %vm5036_vm3, %v3203_v52, %v3207_v24 }
 0x1a1   : > { %v1405_v23 = vadd.f32 %v1358_v4, %v1006_v11  ;;  %v4783_v11 = vrot.slane %v4767_v27, 9  ;;  %v3225_v27 = vrot.slane %v3223_v5, 4  ;;  %v4557_v10 = vrot.slane %v4541_v50, 9 }
 0x1a2   : > { %4750 = vmatmul.msk.bf16.gmra.mxu3 %vm668_vm4, %v3510_v21  ;;  %v4919_v21 = vld [vmem:[%s5024_s26 + $0x4c] sm:$0xf]  ;;  %v3484_v58 = vunpack.c.l.b16 %v3208_v35 }
 0x1a3   : > { %v2457_v8 = vrot.slane %v4919_v21, 5  ;;  %v3790_v24 = vsel %vm5210_vm7, %v4783_v11, %v3789_v40  ;;  %v3229_v40 = vshll.u32 %v5876_v19, 16 }
 0x1a4   : > { %v2299_v43 = vpop.f32.mrf.mxu0  ;;  %v3511_v50 = vpack.c.b16 %v3484_v58, %v3483_v9  ;;  %v4921_v58 = vld [vmem:[%s5024_s26 + $0x58] sm:$0xf] }
 0x1a5   : > { %v1645_v63 = vpop.f32.mrf.mxu3  ;;  %v1010_v55 = vpop.f32.mrf.mxu1  ;;  %v2459_v48 = vrot.slane %v2457_v8, 4 }
 0x1a6   : > { %v1692_v44 = vadd.f32 %v1645_v63, %v1405_v23  ;;  %v3212_v23 = vrot.slane %v3210_v53, 4  ;;  %v4851_v63 = vld [vmem:[%s5024_s26 + $0x48] sm:$0xff] }
 0x1a7   : > { %4799 = vmatmul.msk.bf16.gmra.mxu0 %vm668_vm4, %v3908_v17  ;;  %v2461_v5 = vsel %vm5210_vm7, %v2459_v48, %v2460_v61  ;;  %v5895_v48 = vld [vmem:[%s5024_s26 + $0x64] sm:$0xf] }
 0x1a8   : > { %v1360_v4 = vpop.f32.mrf.mxu2  ;;  %4573 = vmatmul.msk.bf16.gmra.mxu1 %vm668_vm4, %v2570_v20  ;;  %v5873_v21 = vadd.f32 %v2299_v43, %v1692_v44  ;;  %v3793_v20 = vsel %vm5210_vm7, %v3791_v30, %v3792_v16  ;;  %v3216_v53 = vor.u32 %v3215_v7, %v3212_v23  ;;  %v2458_v43 = vsel %vm5210_vm7, %v4557_v10, %v2457_v8 }
 0x1a9   : > { %v1406_v17 = vadd.f32 %v1360_v4, %v1008_v22  ;;  %v3226_v44 = vor.u32 %v3225_v27, %v5870_v56  ;;  %v1011_v16 = vadd.f32 %v1010_v55, %v5335_v49  ;;  %v3881_v22 = vunpack.c.l.b16 %v3790_v24  ;;  %v4768_v27 = vld [vmem:[%s5024_s26 + $0x54] sm:$0xe] }
 0x1aa   : > { %v3882_v62 = vunpack.c.l.b16 %v3793_v20  ;;  %v2544_v30 = vunpack.c.l.b16 %v2458_v43  ;;  %v2545_v8 = vunpack.c.l.b16 %v2461_v5  ;;  %v3217_v23 = vrot.slane %v3216_v53, 4 }
 0x1ab   : > { %v3227_v61 = vrot.slane %v3226_v44, 4  ;;  %v3231_v7 = vrot.slane %v3229_v40, 5  ;;  %v3796_v10 = vrot.slane %v5849_v41, 5  ;;  %v2464_v24 = vrot.slane %v4921_v58, 5  ;;  %v4542_v41 = vld [vmem:[%s5024_s26 + $0x54] sm:$0xe] }
 0x1ac   : > { %v2301_v52 = vpop.f32.mrf.mxu0  ;;  %v2571_v9 = vpack.c.b16 %v2545_v8, %v2544_v30  ;;  %v4784_v5 = vrot.slane %v4768_v27, 9 }
 0x1ad   : > { %v1647_v28 = vpop.f32.mrf.mxu3  ;;  %4686 = vmatmul.msk.bf16.gmra.mxu2 %vm668_vm4, %v4851_v63  ;;  %v1012_v38 = vpop.f32.mrf.mxu1  ;;  %v4716_v63 = vld [vmem:[%s5024_s26 + $0x60] sm:$0xf]  ;;  %v3232_v43 = vsel %vm5036_vm3, %v3227_v61, %v3231_v7  ;;  %v4852_v7 = vld [vmem:[%s5024_s26 + $0x54] sm:$0xff] }
 0x1ae   : > { %v1693_v11 = vadd.f32 %v1647_v28, %v1406_v17  ;;  %v3909_v17 = vpack.c.b16 %v3882_v62, %v3881_v22  ;;  %v3222_v28 = vsel %vm5036_vm3, %v3217_v23, %v5870_v56  ;;  %v3234_v44 = vshrl.u32 %v4716_v63, 16  ;;  %v4922_v62 = vld [vmem:[%s5024_s26 + $0x5c] sm:$0x1] }
 0x1af   : > { %v3798_v22 = vrot.slane %v3796_v10, 4  ;;  %v3799_v56 = vrot.slane %v5876_v19, 5  ;;  %v3485_v8 = vunpack.c.l.b16 %v3222_v28  ;;  %v2466_v23 = vrot.slane %v2464_v24, 4 }
 0x1b0   : > { %v1363_v35 = vpop.f32.mrf.mxu2  ;;  %v5897_v49 = vadd.f32 %v2301_v52, %v1693_v11  ;;  %v3237_v52 = vshll.u32 %v4716_v63, 16  ;;  %v3243_v11 = vshll.u32 %v5895_v48, 16  ;;  %v3486_v27 = vunpack.c.l.b16 %v3232_v43 }
 0x1b1   : > { %v1407_v4 = vadd.f32 %v1363_v35, %v1011_v16  ;;  %v1013_v16 = vadd.f32 %v1012_v38, %v5354_v0  ;;  %v2467_v35 = vrot.slane %v4922_v62, 5  ;;  %v3797_v63 = vsel %vm5210_vm7, %v4784_v5, %v3796_v10 }
 0x1b2   : > { %4751 = vmatmul.msk.bf16.gmra.mxu3 %vm668_vm4, %v3511_v50  ;;  %v3247_v50 = vshrl.u32 %v5895_v48, 16  ;;  %v3236_v0 = vrot.slane %v3234_v44, 4  ;;  %v3239_v38 = vrot.slane %v3237_v52, 5  ;;  %v5918_v19 = vrot.slane %v3243_v11, 5 }
 0x1b3   : > { %v2468_v43 = vsel %vm5210_vm7, %v2466_v23, %v2467_v35  ;;  %v3883_v5 = vunpack.c.l.b16 %v3797_v63  ;;  %v4769_v63 = vld [vmem:[%s5024_s26 + $0x60] sm:$0xe] }
 0x1b4   : > { %v2304_v55 = vpop.f32.mrf.mxu0  ;;  %v3249_v58 = vrot.slane %v3247_v50, 4  ;;  %v3240_v11 = vor.u32 %v3239_v38, %v3236_v0 }
 0x1b5   : > { %v1650_v20 = vpop.f32.mrf.mxu3  ;;  %v1015_v53 = vpop.f32.mrf.mxu1 }
 0x1b6   : > { %v1694_v40 = vadd.f32 %v1650_v20, %v1407_v4  ;;  %v4558_v4 = vrot.slane %v4542_v41, 9  ;;  %v5927_v41 = vld [vmem:[%s5024_s26 + $0x68] sm:$0x1]  ;;  %v3250_v50 = vor.u32 %v3249_v58, %v5918_v19  ;;  %v3241_v23 = vrot.slane %v3240_v11, 4 }
 0x1b7   : > { %4800 = vmatmul.msk.bf16.gmra.mxu0 %vm668_vm4, %v3909_v17 }
 0x1b8   : > { %v1365_v30 = vpop.f32.mrf.mxu2  ;;  %4574 = vmatmul.msk.bf16.gmra.mxu1 %vm668_vm4, %v2571_v9  ;;  %v5916_v17 = vadd.f32 %v2304_v55, %v1694_v40  ;;  %v3800_v9 = vsel %vm5210_vm7, %v3798_v22, %v3799_v56  ;;  %v2465_v28 = vsel %vm5210_vm7, %v4558_v4, %v2464_v24  ;;  %v3512_v55 = vpack.c.b16 %v3486_v27, %v3485_v8  ;;  %v5935_v4 = vld [vmem:[%s5024_s26 + $0x70] sm:$0xf] }
 0x1b9   : > { %v1408_v61 = vadd.f32 %v1365_v30, %v1013_v16  ;;  %v3884_v52 = vunpack.c.l.b16 %v3800_v9  ;;  %v1016_v24 = vadd.f32 %v1015_v53, %v5375_v39  ;;  %v2546_v16 = vunpack.c.l.b16 %v2465_v28  ;;  %v4719_v30 = vld [vmem:[%s5024_s26 + $0x6c] sm:$0xf] }
 0x1ba   : > { %v2547_v22 = vunpack.c.l.b16 %v2468_v43  ;;  %v3253_v56 = vshll.u32 %v5927_v41, 16  ;;  %v3803_v39 = vrot.slane %v5895_v48, 5  ;;  %v3258_v38 = vshrl.u32 %v4719_v30, 16 }
 0x1bb   : > { %v3910_v8 = vpack.c.b16 %v3884_v52, %v3883_v5  ;;  %v3261_v58 = vshll.u32 %v4719_v30, 16  ;;  %v3267_v9 = vshll.u32 %v5935_v4, 16  ;;  %v3271_v28 = vshrl.u32 %v5935_v4, 16  ;;  %v4924_v52 = vld [vmem:[%s5024_s26 + $0x68] sm:$0x1] }
 0x1bc   : > { %v2306_v20 = vpop.f32.mrf.mxu0  ;;  %v3255_v27 = vrot.slane %v3253_v56, 5  ;;  %v2474_v11 = vrot.slane %v4924_v52, 5  ;;  %v3806_v48 = vrot.slane %v5927_v41, 5  ;;  %v3805_v56 = vrot.slane %v3803_v39, 4 }
 0x1bd   : > { %v1652_v10 = vpop.f32.mrf.mxu3  ;;  %4687 = vmatmul.msk.bf16.gmra.mxu2 %vm668_vm4, %v4852_v7  ;;  %v1017_v44 = vpop.f32.mrf.mxu1  ;;  %v2572_v7 = vpack.c.b16 %v2547_v22, %v2546_v16  ;;  %v3246_v16 = vsel %vm5036_vm3, %v3241_v23, %v5918_v19  ;;  %v3263_v30 = vrot.slane %v3261_v58, 5  ;;  %v3269_v41 = vrot.slane %v3267_v9, 5  ;;  %v5960_v23 = vld [vmem:[%s5024_s26 + $0x74] sm:$0x1] }
 0x1be   : > { %v1695_v40 = vadd.f32 %v1652_v10, %v1408_v61  ;;  %v3251_v61 = vrot.slane %v3250_v50, 4  ;;  %v3487_v52 = vunpack.c.l.b16 %v3246_v16 }
 0x1c0   : > { %v1368_v62 = vpop.f32.mrf.mxu2  ;;  %v5940_v53 = vadd.f32 %v2306_v20, %v1695_v40  ;;  %v4543_v20 = vld [vmem:[%s5024_s26 + $0x60] sm:$0xe]  ;;  %v1018_v40 = vadd.f32 %v1017_v44, %v5394_v6  ;;  %v3256_v22 = vsel %vm5036_vm3, %v3251_v61, %v3255_v27 }
 0x1c1   : > { %v1409_v35 = vadd.f32 %v1368_v62, %v1016_v24  ;;  %v4785_v24 = vrot.slane %v4769_v63, 9  ;;  %v3273_v63 = vrot.slane %v3271_v28, 4  ;;  %v3488_v19 = vunpack.c.l.b16 %v3256_v22 }
 0x1c2   : > { %4752 = vmatmul.msk.bf16.gmra.mxu3 %vm668_vm4, %v3512_v55  ;;  %6400 = vst [vmem:[#allocation4_spill] sm:$0xff] %v5940_v53  ;;  %v4923_v55 = vld [vmem:[%s5024_s26 + $0x64] sm:$0xf] }
 0x1c3   : > { %v2471_v5 = vrot.slane %v4923_v55, 5  ;;  %v4559_v55 = vrot.slane %v4543_v20, 9  ;;  %v3804_v61 = vsel %vm5210_vm7, %v4785_v24, %v3803_v39  ;;  %v3274_v28 = vor.u32 %v3273_v63, %v3269_v41 }
 0x1c4   : > { %v2309_v0 = vpop.f32.mrf.mxu0  ;;  %v3513_v24 = vpack.c.b16 %v3488_v19, %v3487_v52  ;;  %v3885_v20 = vunpack.c.l.b16 %v3804_v61 }
 0x1c5   : > { %v1655_v43 = vpop.f32.mrf.mxu3  ;;  %v1020_v10 = vpop.f32.mrf.mxu1  ;;  %v2473_v6 = vrot.slane %v2471_v5, 4 }
 0x1c6   : > { %v1696_v50 = vadd.f32 %v1655_v43, %v1409_v35  ;;  %v3260_v35 = vrot.slane %v3258_v38, 4 }
 0x1c7   : > { %4801 = vmatmul.msk.bf16.gmra.mxu0 %vm668_vm4, %v3910_v8  ;;  %v4853_v8 = vld [vmem:[%s5024_s26 + $0x60] sm:$0xff]  ;;  %v2475_v9 = vsel %vm5210_vm7, %v2473_v6, %v2474_v11  ;;  %v3810_v6 = vrot.slane %v5935_v4, 5 }
 0x1c8   : > { %v1370_v62 = vpop.f32.mrf.mxu2  ;;  %4575 = vmatmul.msk.bf16.gmra.mxu1 %vm668_vm4, %v2572_v7  ;;  %v5957_v44 = vadd.f32 %v2309_v0, %v1696_v50  ;;  %v3807_v7 = vsel %vm5210_vm7, %v3805_v56, %v3806_v48  ;;  %v3264_v27 = vor.u32 %v3263_v30, %v3260_v35  ;;  %v2472_v0 = vsel %vm5210_vm7, %v4559_v55, %v2471_v5  ;;  %v4722_v30 = vld [vmem:[%s5024_s26 + $0x78] sm:$0xf]  ;;  %v4770_v55 = vld [vmem:[%s5024_s26 + $0x6c] sm:$0xe] }
 0x1c9   : > { %v1410_v43 = vadd.f32 %v1370_v62, %v1018_v40  ;;  %v3277_v50 = vshll.u32 %v5960_v23, 16  ;;  %v1021_v48 = vadd.f32 %v1020_v10, %v5413_v45  ;;  %v3886_v40 = vunpack.c.l.b16 %v3807_v7 }
 0x1ca   : > { %v2548_v22 = vunpack.c.l.b16 %v2472_v0  ;;  %v2549_v56 = vunpack.c.l.b16 %v2475_v9  ;;  %v3265_v5 = vrot.slane %v3264_v27, 4  ;;  %v3275_v35 = vrot.slane %v3274_v28, 4  ;;  %v4544_v27 = vld [vmem:[%s5024_s26 + $0x6c] sm:$0xe] }
 0x1cb   : > { %v3279_v11 = vrot.slane %v3277_v50, 5  ;;  %v3911_v63 = vpack.c.b16 %v3886_v40, %v3885_v20  ;;  %v3282_v9 = vshrl.u32 %v4722_v30, 16  ;;  %v3285_v28 = vshll.u32 %v4722_v30, 16 }
 0x1cc   : > { %v2311_v53 = vpop.f32.mrf.mxu0  ;;  %v2573_v10 = vpack.c.b16 %v2549_v56, %v2548_v22  ;;  %v3270_v61 = vsel %vm5036_vm3, %v3265_v5, %v3269_v41  ;;  %v4786_v41 = vrot.slane %v4770_v55, 9  ;;  %v4560_v22 = vrot.slane %v4544_v27, 9  ;;  %v6001_v55 = vld [vmem:[%s5024_s26 + $0x80] sm:$0x1] }
 0x1cd   : > { %v1657_v38 = vpop.f32.mrf.mxu3  ;;  %4688 = vmatmul.msk.bf16.gmra.mxu2 %vm668_vm4, %v4853_v8  ;;  %v1022_v58 = vpop.f32.mrf.mxu1  ;;  %v3280_v7 = vsel %vm5036_vm3, %v3275_v35, %v3279_v11  ;;  %v3489_v20 = vunpack.c.l.b16 %v3270_v61  ;;  %v4926_v35 = vld [vmem:[%s5024_s26 + $0x74] sm:$0x1] }
 0x1ce   : > { %v1697_v39 = vadd.f32 %v1657_v38, %v1410_v43  ;;  %v5976_v43 = vld [vmem:[%s5024_s26 + $0x7c] sm:$0xf]  ;;  %v4925_v38 = vld [vmem:[%s5024_s26 + $0x70] sm:$0xf]  ;;  %v3490_v40 = vunpack.c.l.b16 %v3280_v7  ;;  %v2481_v11 = vrot.slane %v4926_v35, 5 }
 0x1cf   : > { %v2478_v0 = vrot.slane %v4925_v38, 5  ;;  %v3291_v50 = vshll.u32 %v5976_v43, 16  ;;  %v3295_v4 = vshrl.u32 %v5976_v43, 16  ;;  %v3817_v35 = vrot.slane %v5976_v43, 5 }
 0x1d0   : > { %v1373_v16 = vpop.f32.mrf.mxu2  ;;  %v5978_v8 = vadd.f32 %v2311_v53, %v1697_v39  ;;  %v1023_v39 = vadd.f32 %v1022_v58, %v5436_v12  ;;  %v3287_v12 = vrot.slane %v3285_v28, 5 }
 0x1d1   : > { %v1411_v62 = vadd.f32 %v1373_v16, %v1021_v48  ;;  %v3812_v16 = vrot.slane %v3810_v6, 4  ;;  %v2480_v5 = vrot.slane %v2478_v0, 4  ;;  %v5998_v58 = vrot.slane %v3291_v50, 5 }
 0x1d2   : > { %4753 = vmatmul.msk.bf16.gmra.mxu3 %vm668_vm4, %v3513_v24  ;;  %v3813_v24 = vrot.slane %v5960_v23, 5  ;;  %v3297_v23 = vrot.slane %v3295_v4, 4  ;;  %v2479_v38 = vsel %vm5210_vm7, %v4560_v22, %v2478_v0  ;;  %v3301_v50 = vshll.u32 %v6001_v55, 16  ;;  %v4725_v0 = vld [vmem:[%s5024_s26 + $0x84] sm:$0xf] }
 0x1d4   : > { %v2314_v45 = vpop.f32.mrf.mxu0  ;;  %v3814_v61 = vsel %vm5210_vm7, %v3812_v16, %v3813_v24 }
 0x1d5   : > { %v1660_v52 = vpop.f32.mrf.mxu3  ;;  %v1025_v19 = vpop.f32.mrf.mxu1 }
 0x1d6   : > { %v1698_v53 = vadd.f32 %v1660_v52, %v1411_v62  ;;  %v4854_v62 = vld [vmem:[%s5024_s26 + $0x6c] sm:$0xff]  ;;  %v1026_v4 = vadd.f32 %v1025_v19, %v5455_v59 }
 0x1d7   : > { %4802 = vmatmul.msk.bf16.gmra.mxu0 %vm668_vm4, %v3911_v63  ;;  %v3284_v63 = vrot.slane %v3282_v9, 4  ;;  %v2482_v9 = vsel %vm5210_vm7, %v2480_v5, %v2481_v11 }
 0x1d8   : > { %v1375_v48 = vpop.f32.mrf.mxu2  ;;  %4576 = vmatmul.msk.bf16.gmra.mxu1 %vm668_vm4, %v2573_v10  ;;  %v5996_v30 = vadd.f32 %v2314_v45, %v1698_v53  ;;  %v3811_v10 = vsel %vm5210_vm7, %v4786_v41, %v3810_v6  ;;  %v3514_v45 = vpack.c.b16 %v3490_v40, %v3489_v20  ;;  %v3298_v6 = vor.u32 %v3297_v23, %v5998_v58 }
 0x1d9   : > { %v1412_v56 = vadd.f32 %v1375_v48, %v1023_v39  ;;  %v3288_v28 = vor.u32 %v3287_v12, %v3284_v63  ;;  %v3887_v39 = vunpack.c.l.b16 %v3811_v10  ;;  %v3888_v41 = vunpack.c.l.b16 %v3814_v61  ;;  %v6022_v63 = vld [vmem:[%s5024_s26 + $0x88] sm:$0xf] }
 0x1da   : > { %v2550_v48 = vunpack.c.l.b16 %v2479_v38  ;;  %v2551_v20 = vunpack.c.l.b16 %v2482_v9  ;;  %v3299_v22 = vrot.slane %v3298_v6, 4  ;;  %v3306_v12 = vshrl.u32 %v4725_v0, 16  ;;  %v4927_v38 = vld [vmem:[%s5024_s26 + $0x7c] sm:$0xf] }
 0x1db   : > { %v3289_v16 = vrot.slane %v3288_v28, 4  ;;  %v3912_v5 = vpack.c.b16 %v3888_v41, %v3887_v39  ;;  %v3309_v23 = vshll.u32 %v4725_v0, 16  ;;  %v2485_v9 = vrot.slane %v4927_v38, 5 }
 0x1dc   : > { %v2316_v52 = vpop.f32.mrf.mxu0  ;;  %v2574_v11 = vpack.c.b16 %v2551_v20, %v2550_v48  ;;  %v3319_v39 = vshrl.u32 %v6022_v63, 16 }
 0x1dd   : > { %v1662_v7 = vpop.f32.mrf.mxu3  ;;  %4689 = vmatmul.msk.bf16.gmra.mxu2 %vm668_vm4, %v4854_v62  ;;  %v1027_v27 = vpop.f32.mrf.mxu1  ;;  %v4771_v62 = vld [vmem:[%s5024_s26 + $0x78] sm:$0xe]  ;;  %v3294_v43 = vsel %vm5036_vm3, %v3289_v16, %v5998_v58  ;;  %v3308_v58 = vrot.slane %v3306_v12, 4  ;;  %v3311_v48 = vrot.slane %v3309_v23, 5  ;;  %v2487_v0 = vrot.slane %v2485_v9, 4 }
 0x1de   : > { %v1699_v53 = vadd.f32 %v1662_v7, %v1412_v56  ;;  %v3303_v56 = vrot.slane %v3301_v50, 5  ;;  %v4787_v7 = vrot.slane %v4771_v62, 9  ;;  %v1028_v6 = vadd.f32 %v1027_v27, %v5472_v32  ;;  %v6046_v12 = vld [vmem:[%s5024_s26 + $0x8c] sm:$0x1] }
 0x1df   : > { %v3819_v50 = vrot.slane %v3817_v35, 4  ;;  %v3491_v32 = vunpack.c.l.b16 %v3294_v43 }
 0x1e0   : > { %v1378_v24 = vpop.f32.mrf.mxu2  ;;  %v6019_v59 = vadd.f32 %v2316_v52, %v1699_v53  ;;  %v3304_v52 = vsel %vm5036_vm3, %v3299_v22, %v3303_v56  ;;  %v3820_v53 = vrot.slane %v6001_v55, 5  ;;  %v4928_v55 = vld [vmem:[%s5024_s26 + $0x80] sm:$0x1]  ;;  %v3818_v56 = vsel %vm5210_vm7, %v4787_v7, %v3817_v35 }
 0x1e1   : > { %v1413_v40 = vadd.f32 %v1378_v24, %v1026_v4  ;;  %v3315_v4 = vshll.u32 %v6022_v63, 16  ;;  %v2488_v16 = vrot.slane %v4928_v55, 5  ;;  %v3492_v27 = vunpack.c.l.b16 %v3304_v52  ;;  %v4728_v55 = vld [vmem:[%s5024_s26 + $0x90] sm:$0xf] }
 0x1e2   : > { %4754 = vmatmul.msk.bf16.gmra.mxu3 %vm668_vm4, %v3514_v45  ;;  %v4545_v45 = vld [vmem:[%s5024_s26 + $0x78] sm:$0xe]  ;;  %v3821_v62 = vsel %vm5210_vm7, %v3819_v50, %v3820_v53  ;;  %v3312_v35 = vor.u32 %v3311_v48, %v3308_v58  ;;  %v3889_v43 = vunpack.c.l.b16 %v3818_v56  ;;  %v4772_v48 = vld [vmem:[%s5024_s26 + $0x84] sm:$0xe] }
 0x1e3   : > { %v4561_v24 = vrot.slane %v4545_v45, 9  ;;  %v2489_v38 = vsel %vm5210_vm7, %v2487_v0, %v2488_v16  ;;  %v3890_v52 = vunpack.c.l.b16 %v3821_v62  ;;  %v3824_v0 = vrot.slane %v6022_v63, 5 }
 0x1e4   : > { %v2319_v19 = vpop.f32.mrf.mxu0  ;;  %v3827_v63 = vrot.slane %v6046_v12, 5 }
 0x1e5   : > { %v1665_v10 = vpop.f32.mrf.mxu3  ;;  %v2642_v61 = vpop.f32.mrf.mxu1 }
 0x1e6   : > { %v1700_v28 = vadd.f32 %v1665_v10, %v1413_v40  ;;  %v4855_v40 = vld [vmem:[%s5024_s26 + $0x78] sm:$0xff]  ;;  %v2722_v50 = vadd.f32 %v2642_v61, %v5489_v46 }
 0x1e7   : > { %4803 = vmatmul.msk.bf16.gmra.mxu0 %vm668_vm4, %v3912_v5  ;;  %v3317_v5 = vrot.slane %v3315_v4, 5 }
 0x1e8   : > { %v1380_v41 = vpop.f32.mrf.mxu2  ;;  %4577 = vmatmul.msk.bf16.gmra.mxu1 %vm668_vm4, %v2574_v11  ;;  %v6039_v22 = vadd.f32 %v2319_v19, %v1700_v28  ;;  %v3321_v11 = vrot.slane %v3319_v39, 4  ;;  %v2486_v19 = vsel %vm5210_vm7, %v4561_v24, %v2485_v9  ;;  %v3515_v28 = vpack.c.b16 %v3492_v27, %v3491_v32  ;;  %v6063_v32 = vld [vmem:[%s5024_s26 + $0x94] sm:$0xf] }
 0x1e9   : > { %v1414_v20 = vadd.f32 %v1380_v41, %v1028_v6  ;;  %v3325_v6 = vshll.u32 %v6046_v12, 16  ;;  %v2552_v39 = vunpack.c.l.b16 %v2486_v19  ;;  %v2553_v9 = vunpack.c.l.b16 %v2489_v38 }
 0x1ea   : > { %v3322_v53 = vor.u32 %v3321_v11, %v3317_v5  ;;  %v3313_v41 = vrot.slane %v3312_v35, 4  ;;  %v3913_v24 = vpack.c.b16 %v3890_v52, %v3889_v43  ;;  %v4788_v11 = vrot.slane %v4772_v48, 9 }
 0x1eb   : > { %v2575_v61 = vpack.c.b16 %v2553_v9, %v2552_v39  ;;  %v3330_v35 = vshrl.u32 %v4728_v55, 16  ;;  %v3339_v43 = vshll.u32 %v6063_v32, 16  ;;  %v3343_v12 = vshrl.u32 %v6063_v32, 16 }
 0x1ec   : > { %v2321_v10 = vpop.f32.mrf.mxu0  ;;  %v3318_v62 = vsel %vm5036_vm3, %v3313_v41, %v3317_v5  ;;  %v3825_v39 = vsel %vm5210_vm7, %v4788_v11, %v3824_v0 }
 0x1ed   : > { %v1667_v23 = vpop.f32.mrf.mxu3  ;;  %4690 = vmatmul.msk.bf16.gmra.mxu2 %vm668_vm4, %v4855_v40  ;;  %v2644_v45 = vpop.f32.mrf.mxu1  ;;  %v3327_v40 = vrot.slane %v3325_v6, 5 }
 0x1ee   : > { %v1701_v7 = vadd.f32 %v1667_v23, %v1414_v20  ;;  %v3323_v20 = vrot.slane %v3322_v53, 4  ;;  %v4929_v23 = vld [vmem:[%s5024_s26 + $0x88] sm:$0xf]  ;;  %v2723_v53 = vadd.f32 %v2644_v45, %v5502_v42  ;;  %v6090_v45 = vrot.slane %v3339_v43, 5 }
 0x1ef   : > { %v2492_v19 = vrot.slane %v4929_v23, 5 }
 0x1f0   : > { %v2929_v4 = vpop.f32.mrf.mxu2  ;;  %v6059_v16 = vadd.f32 %v2321_v10, %v1701_v7  ;;  %v4546_v10 = vld [vmem:[%s5024_s26 + $0x84] sm:$0xe]  ;;  %v3333_v7 = vshll.u32 %v4728_v55, 16  ;;  %v3328_v5 = vsel %vm5036_vm3, %v3323_v20, %v3327_v40  ;;  %v3332_v40 = vrot.slane %v3330_v35, 4 }
 0x1f1   : > { %v3009_v58 = vadd.f32 %v2929_v4, %v2722_v50  ;;  %v3493_v50 = vunpack.c.l.b16 %v3318_v62  ;;  %v4856_v4 = vld [vmem:[%s5024_s26 + $0x84] sm:$0xff]  ;;  %v4562_v9 = vrot.slane %v4546_v10, 9  ;;  %v2494_v41 = vrot.slane %v2492_v19, 4 }
 0x1f2   : > { %4755 = vmatmul.msk.bf16.gmra.mxu3 %vm668_vm4, %v3515_v28  ;;  %v3826_v28 = vrot.slane %v3824_v0, 4  ;;  %v3494_v20 = vunpack.c.l.b16 %v3328_v5  ;;  %v3335_v55 = vrot.slane %v3333_v7, 5  ;;  %v3891_v62 = vunpack.c.l.b16 %v3825_v39 }
 0x1f3   : > { %v2493_v23 = vsel %vm5210_vm7, %v4562_v9, %v2492_v19  ;;  %v6105_v19 = vld [vmem:[%s5024_s26 + $0xa0] sm:$0xf] }
 0x1f4   : > { %v3981_v46 = vpop.f32.mrf.mxu0  ;;  %v3828_v42 = vsel %vm5210_vm7, %v3826_v28, %v3827_v63  ;;  %v3516_v10 = vpack.c.b16 %v3494_v20, %v3493_v50  ;;  %v3336_v7 = vor.u32 %v3335_v55, %v3332_v40  ;;  %v3831_v40 = vrot.slane %v6063_v32, 5 }
 0x1f5   : > { %v3583_v27 = vpop.f32.mrf.mxu3  ;;  %v2647_v56 = vpop.f32.mrf.mxu1  ;;  %v3892_v35 = vunpack.c.l.b16 %v3828_v42  ;;  %v3363_v55 = vshll.u32 %v6105_v19, 16 }
 0x1f6   : > { %v3663_v38 = vadd.f32 %v3583_v27, %v3009_v58  ;;  %v6093_v27 = vld [vmem:[%s5024_s26 + $0x98] sm:$0x1]  ;;  %v3337_v9 = vrot.slane %v3336_v7, 4 }
 0x1f7   : > { %4804 = vmatmul.msk.bf16.gmra.mxu0 %vm668_vm4, %v3913_v24  ;;  %v4930_v24 = vld [vmem:[%s5024_s26 + $0x8c] sm:$0x1]  ;;  %v3349_v28 = vshll.u32 %v6093_v27, 16  ;;  %v3914_v50 = vpack.c.b16 %v3892_v35, %v3891_v62  ;;  %v3367_v62 = vshrl.u32 %v6105_v19, 16 }
 0x1f8   : > { %v4061_v52 = vadd.f32 %v3981_v46, %v3663_v38  ;;  %v2931_v6 = vpop.f32.mrf.mxu2  ;;  %4578 = vmatmul.msk.bf16.gmra.mxu1 %vm668_vm4, %v2575_v61  ;;  %v2495_v58 = vrot.slane %v4930_v24, 5  ;;  %v3345_v46 = vrot.slane %v3343_v12, 4  ;;  %v2724_v12 = vadd.f32 %v2647_v56, %v5515_v15 }
 0x1f9   : > { %v3010_v48 = vadd.f32 %v2931_v6, %v2723_v53  ;;  %v2554_v53 = vunpack.c.l.b16 %v2493_v23  ;;  %v3351_v24 = vrot.slane %v3349_v28, 5  ;;  %v3342_v32 = vsel %vm5036_vm3, %v3337_v9, %v6090_v45 }
 0x1fa   : > { %4094 = vst.msk [vmem:[%s6074_s13] sm:$0xff] %vm4093_vm8, %v4061_v52  ;;  %v2496_v38 = vsel %vm5210_vm7, %v2494_v41, %v2495_v58  ;;  %v3346_v5 = vor.u32 %v3345_v46, %v6090_v45  ;;  %v4773_v58 = vld [vmem:[%s5024_s26 + $0x90] sm:$0xe] }
 0x1fb   : > { %v2555_v6 = vunpack.c.l.b16 %v2496_v38  ;;  %v4789_v38 = vrot.slane %v4773_v58, 9  ;;  %v4733_v58 = vld [vmem:[%s5024_s26 + $0xa4] sm:$0x1] }
 0x1fc   : > { %v3983_v61 = vpop.f32.mrf.mxu0  ;;  %v3347_v41 = vrot.slane %v3346_v5, 4 }
 0x1fd   : > { %v3585_v0 = vpop.f32.mrf.mxu3  ;;  %4691 = vmatmul.msk.bf16.gmra.mxu2 %vm668_vm4, %v4856_v4  ;;  %v2649_v11 = vpop.f32.mrf.mxu1  ;;  %v4731_v4 = vld [vmem:[%s5024_s26 + $0x9c] sm:$0xf]  ;;  %v2576_v20 = vpack.c.b16 %v2555_v6, %v2554_v53  ;;  %v4857_v53 = vld [vmem:[%s5024_s26 + $0x90] sm:$0xff] }
 0x1fe   : > { %v3664_v63 = vadd.f32 %v3585_v0, %v3010_v48  ;;  %v3354_v48 = vshrl.u32 %v4731_v4, 16  ;;  %v3357_v15 = vshll.u32 %v4731_v4, 16  ;;  %v3352_v35 = vsel %vm5036_vm3, %v3347_v41, %v3351_v24 }
 0x1ff   : > { %v3495_v41 = vunpack.c.l.b16 %v3342_v32  ;;  %v3496_v24 = vunpack.c.l.b16 %v3352_v35  ;;  %v3838_v32 = vrot.slane %v6105_v19, 5  ;;  %v6147_v19 = vld [vmem:[%s5024_s26 + $0xac] sm:$0xf] }
 0x200   : > { %v4062_v43 = vadd.f32 %v3983_v61, %v3664_v63  ;;  %v2934_v52 = vpop.f32.mrf.mxu2  ;;  %v4931_v61 = vld [vmem:[%s5024_s26 + $0x94] sm:$0xf]  ;;  %v3834_v63 = vrot.slane %v6093_v27, 5  ;;  %v3356_v7 = vrot.slane %v3354_v48, 4  ;;  %v3359_v5 = vrot.slane %v3357_v15, 5 }
 0x201   : > { %v3011_v39 = vadd.f32 %v2934_v52, %v2724_v12  ;;  %v2499_v0 = vrot.slane %v4931_v61, 5  ;;  %v3833_v27 = vrot.slane %v3831_v40, 4  ;;  %v3365_v52 = vrot.slane %v3363_v55, 5 }
 0x202   : > { %4095 = vst.msk [vmem:[%s6074_s13 + $0x8] sm:$0xff] %vm4093_vm8, %v4062_v43  ;;  %4756 = vmatmul.msk.bf16.gmra.mxu3 %vm668_vm4, %v3516_v10  ;;  %v4547_v10 = vld [vmem:[%s5024_s26 + $0x90] sm:$0xe]  ;;  %v2725_v43 = vadd.f32 %v2649_v11, %v5528_v13  ;;  %v3360_v48 = vor.u32 %v3359_v5, %v3356_v7  ;;  %v3832_v13 = vsel %vm5210_vm7, %v4789_v38, %v3831_v40 }
 0x203   : > { %v4563_v6 = vrot.slane %v4547_v10, 9  ;;  %v2501_v4 = vrot.slane %v2499_v0, 4  ;;  %v3835_v11 = vsel %vm5210_vm7, %v3833_v27, %v3834_v63  ;;  %v3517_v10 = vpack.c.b16 %v3496_v24, %v3495_v41 }
 0x204   : > { %v3986_v56 = vpop.f32.mrf.mxu0  ;;  %v3893_v40 = vunpack.c.l.b16 %v3832_v13  ;;  %v3894_v38 = vunpack.c.l.b16 %v3835_v11  ;;  %v3361_v63 = vrot.slane %v3360_v48, 4 }
 0x205   : > { %v3588_v42 = vpop.f32.mrf.mxu3  ;;  %v2652_v46 = vpop.f32.mrf.mxu1  ;;  %v2500_v55 = vsel %vm5210_vm7, %v4563_v6, %v2499_v0  ;;  %v4734_v6 = vld [vmem:[%s5024_s26 + $0xa8] sm:$0xf] }
 0x206   : > { %v3665_v23 = vadd.f32 %v3588_v42, %v3011_v39  ;;  %v3369_v39 = vrot.slane %v3367_v62, 4  ;;  %v3373_v62 = vshll.u32 %v4733_v58, 16  ;;  %v2726_v7 = vadd.f32 %v2652_v46, %v5541_v57 }
 0x207   : > { %4805 = vmatmul.msk.bf16.gmra.mxu0 %vm668_vm4, %v3914_v50  ;;  %v4932_v50 = vld [vmem:[%s5024_s26 + $0x98] sm:$0x1]  ;;  %v2556_v0 = vunpack.c.l.b16 %v2500_v55  ;;  %v3366_v46 = vsel %vm5036_vm3, %v3361_v63, %v3365_v52  ;;  %v3378_v11 = vshrl.u32 %v4734_v6, 16  ;;  %v4548_v55 = vld [vmem:[%s5024_s26 + $0x9c] sm:$0xe] }
 0x208   : > { %v4063_v28 = vadd.f32 %v3986_v56, %v3665_v23  ;;  %v2936_v12 = vpop.f32.mrf.mxu2  ;;  %4579 = vmatmul.msk.bf16.gmra.mxu1 %vm668_vm4, %v2576_v20  ;;  %v2502_v45 = vrot.slane %v4932_v50, 5  ;;  %v3370_v61 = vor.u32 %v3369_v39, %v3365_v52  ;;  %v3375_v27 = vrot.slane %v3373_v62, 5 }
 0x209   : > { %v3012_v9 = vadd.f32 %v2936_v12, %v2725_v43  ;;  %v4774_v43 = vld [vmem:[%s5024_s26 + $0x9c] sm:$0xe]  ;;  %v3840_v39 = vrot.slane %v3838_v32, 4  ;;  %v3391_v62 = vshrl.u32 %v6147_v19, 16  ;;  %v3497_v52 = vunpack.c.l.b16 %v3366_v46 }
 0x20a   : > { %4096 = vst.msk [vmem:[%s6074_s13 + $0x10] sm:$0xff] %vm4093_vm8, %v4063_v28  ;;  %v2503_v42 = vsel %vm5210_vm7, %v2501_v4, %v2502_v45  ;;  %v3371_v12 = vrot.slane %v3370_v61, 4  ;;  %v3915_v4 = vpack.c.b16 %v3894_v38, %v3893_v40  ;;  %v4790_v50 = vrot.slane %v4774_v43, 9 }
 0x20b   : > { %v2557_v28 = vunpack.c.l.b16 %v2503_v42  ;;  %v3381_v42 = vshll.u32 %v4734_v6, 16  ;;  %v3387_v61 = vshll.u32 %v6147_v19, 16  ;;  %v3380_v43 = vrot.slane %v3378_v11, 4 }
 0x20c   : > { %v3988_v15 = vpop.f32.mrf.mxu0  ;;  %v3376_v48 = vsel %vm5036_vm3, %v3371_v12, %v3375_v27 }
 0x20d   : > { %v3590_v56 = vpop.f32.mrf.mxu3  ;;  %4692 = vmatmul.msk.bf16.gmra.mxu2 %vm668_vm4, %v4857_v53  ;;  %v2654_v20 = vpop.f32.mrf.mxu1  ;;  %v2577_v57 = vpack.c.b16 %v2557_v28, %v2556_v0  ;;  %v3498_v38 = vunpack.c.l.b16 %v3376_v48  ;;  %v4934_v0 = vld [vmem:[%s5024_s26 + $0xa4] sm:$0x1]  ;;  %v3383_v12 = vrot.slane %v3381_v42, 5  ;;  %v6168_v27 = vrot.slane %v3387_v61, 5 }
 0x20e   : > { %v3666_v23 = vadd.f32 %v3590_v56, %v3012_v9  ;;  %v3841_v9 = vrot.slane %v4733_v58, 5  ;;  %v3839_v58 = vsel %vm5210_vm7, %v4790_v50, %v3838_v32  ;;  %v2509_v28 = vrot.slane %v4934_v0, 5 }
 0x20f   : > { %v3895_v6 = vunpack.c.l.b16 %v3839_v58  ;;  %v3518_v50 = vpack.c.b16 %v3498_v38, %v3497_v52  ;;  %v6183_v52 = vld [vmem:[%s5024_s26 + $0xb8] sm:$0xf]  ;;  %v4775_v38 = vld [vmem:[%s5024_s26 + $0xa8] sm:$0xe]  ;;  %v3845_v0 = vrot.slane %v6147_v19, 5 }
 0x210   : > { %v4064_v35 = vadd.f32 %v3988_v15, %v3666_v23  ;;  %v2939_v5 = vpop.f32.mrf.mxu2  ;;  %v4933_v15 = vld [vmem:[%s5024_s26 + $0xa0] sm:$0xf]  ;;  %v3842_v63 = vsel %vm5210_vm7, %v3840_v39, %v3841_v9 }
 0x211   : > { %v3013_v53 = vadd.f32 %v2939_v5, %v2726_v7  ;;  %v2506_v13 = vrot.slane %v4933_v15, 5  ;;  %v4564_v7 = vrot.slane %v4548_v55, 9 }
 0x212   : > { %4097 = vst.msk [vmem:[%s6074_s13 + $0x18] sm:$0xff] %vm4093_vm8, %v4064_v35  ;;  %4757 = vmatmul.msk.bf16.gmra.mxu3 %vm668_vm4, %v3517_v10  ;;  %v2727_v10 = vadd.f32 %v2654_v20, %v5554_v54  ;;  %v4858_v35 = vld [vmem:[%s5024_s26 + $0x9c] sm:$0xff]  ;;  %v3393_v54 = vrot.slane %v3391_v62, 4  ;;  %v6171_v20 = vld [vmem:[%s5024_s26 + $0xb0] sm:$0x1] }
 0x213   : > { %v2508_v5 = vrot.slane %v2506_v13, 4  ;;  %v2507_v46 = vsel %vm5210_vm7, %v4564_v7, %v2506_v13  ;;  %v3397_v15 = vshll.u32 %v6171_v20, 16  ;;  %v4737_v62 = vld [vmem:[%s5024_s26 + $0xb4] sm:$0xf] }
 0x214   : > { %v3991_v45 = vpop.f32.mrf.mxu0  ;;  %v3394_v48 = vor.u32 %v3393_v54, %v6168_v27  ;;  %v2558_v42 = vunpack.c.l.b16 %v2507_v46 }
 0x215   : > { %v3593_v41 = vpop.f32.mrf.mxu3  ;;  %v2657_v24 = vpop.f32.mrf.mxu1  ;;  %v2510_v39 = vsel %vm5210_vm7, %v2508_v5, %v2509_v28 }
 0x216   : > { %v3667_v56 = vadd.f32 %v3593_v41, %v3013_v53  ;;  %v3384_v41 = vor.u32 %v3383_v12, %v3380_v43  ;;  %v2559_v61 = vunpack.c.l.b16 %v2510_v39 }
 0x217   : > { %4806 = vmatmul.msk.bf16.gmra.mxu0 %vm668_vm4, %v3915_v4 }
 0x218   : > { %v4065_v23 = vadd.f32 %v3991_v45, %v3667_v56  ;;  %v2941_v40 = vpop.f32.mrf.mxu2  ;;  %4580 = vmatmul.msk.bf16.gmra.mxu1 %vm668_vm4, %v2577_v57  ;;  %v3896_v45 = vunpack.c.l.b16 %v3842_v63  ;;  %v2728_v56 = vadd.f32 %v2657_v24, %v5567_v33  ;;  %v3402_v63 = vshrl.u32 %v4737_v62, 16 }
 0x219   : > { %v3014_v32 = vadd.f32 %v2941_v40, %v2727_v10  ;;  %v3395_v10 = vrot.slane %v3394_v48, 4  ;;  %v3399_v40 = vrot.slane %v3397_v15, 5  ;;  %v3405_v33 = vshll.u32 %v4737_v62, 16 }
 0x21a   : > { %4098 = vst.msk [vmem:[%s6074_s13 + $0x20] sm:$0xff] %vm4093_vm8, %v4065_v23  ;;  %v3916_v13 = vpack.c.b16 %v3896_v45, %v3895_v6  ;;  %v3385_v23 = vrot.slane %v3384_v41, 4  ;;  %v3411_v24 = vshll.u32 %v6183_v52, 16  ;;  %v2578_v5 = vpack.c.b16 %v2559_v61, %v2558_v42  ;;  %v4936_v61 = vld [vmem:[%s5024_s26 + $0xb0] sm:$0x1] }
 0x21b   : > { %v3400_v6 = vsel %vm5036_vm3, %v3395_v10, %v3399_v40  ;;  %v3404_v19 = vrot.slane %v3402_v63, 4  ;;  %v3407_v45 = vrot.slane %v3405_v33, 5  ;;  %v3848_v15 = vrot.slane %v6171_v20, 5 }
 0x21c   : > { %v3993_v53 = vpop.f32.mrf.mxu0  ;;  %v6200_v46 = vrot.slane %v3411_v24, 5  ;;  %v2516_v62 = vrot.slane %v4936_v61, 5  ;;  %v4937_v61 = vld [vmem:[%s5024_s26 + $0xb8] sm:$0xf] }
 0x21d   : > { %v3595_v4 = vpop.f32.mrf.mxu3  ;;  %4693 = vmatmul.msk.bf16.gmra.mxu2 %vm668_vm4, %v4858_v35  ;;  %v2659_v57 = vpop.f32.mrf.mxu1  ;;  %v3415_v35 = vshrl.u32 %v6183_v52, 16 }
 0x21e   : > { %v3668_v9 = vadd.f32 %v3595_v4, %v3014_v32  ;;  %v4935_v32 = vld [vmem:[%s5024_s26 + $0xac] sm:$0xf]  ;;  %v4791_v4 = vrot.slane %v4775_v38, 9  ;;  %v2729_v41 = vadd.f32 %v2659_v57, %v5580_v31  ;;  %v3408_v57 = vor.u32 %v3407_v45, %v3404_v19 }
 0x21f   : > { %v2513_v12 = vrot.slane %v4935_v32, 5  ;;  %v3417_v39 = vrot.slane %v3415_v35, 4 }
 0x220   : > { %v4066_v11 = vadd.f32 %v3993_v53, %v3668_v9  ;;  %v2944_v55 = vpop.f32.mrf.mxu2  ;;  %v3390_v53 = vsel %vm5036_vm3, %v3385_v23, %v6168_v27  ;;  %v3847_v27 = vrot.slane %v3845_v0, 4  ;;  %v3500_v23 = vunpack.c.l.b16 %v3400_v6 }
 0x221   : > { %v3015_v58 = vadd.f32 %v2944_v55, %v2728_v56  ;;  %v4859_v56 = vld [vmem:[%s5024_s26 + $0xa8] sm:$0xff]  ;;  %v2515_v42 = vrot.slane %v2513_v12, 4  ;;  %v3846_v31 = vsel %vm5210_vm7, %v4791_v4, %v3845_v0  ;;  %v3418_v10 = vor.u32 %v3417_v39, %v6200_v46  ;;  %v4740_v39 = vld [vmem:[%s5024_s26 + $0xc0] sm:$0xf] }
 0x222   : > { %4099 = vst.msk [vmem:[%s6074_s13 + $0x28] sm:$0xff] %vm4093_vm8, %v4066_v11  ;;  %4758 = vmatmul.msk.bf16.gmra.mxu3 %vm668_vm4, %v3518_v50  ;;  %v4549_v50 = vld [vmem:[%s5024_s26 + $0xa8] sm:$0xe]  ;;  %v6206_v11 = vld [vmem:[%s5024_s26 + $0xbc] sm:$0x1]  ;;  %v3849_v38 = vsel %vm5210_vm7, %v3847_v27, %v3848_v15  ;;  %v3897_v0 = vunpack.c.l.b16 %v3846_v31  ;;  %v3409_v32 = vrot.slane %v3408_v57, 4 }
 0x223   : > { %v4565_v55 = vrot.slane %v4549_v50, 9  ;;  %v3421_v20 = vshll.u32 %v6206_v11, 16  ;;  %v2517_v35 = vsel %vm5210_vm7, %v2515_v42, %v2516_v62  ;;  %v4776_v15 = vld [vmem:[%s5024_s26 + $0xb4] sm:$0xe]  ;;  %v2520_v62 = vrot.slane %v4937_v61, 5 }
 0x224   : > { %v3996_v7 = vpop.f32.mrf.mxu0  ;;  %v3429_v31 = vshll.u32 %v4740_v39, 16 }
 0x225   : > { %v3598_v28 = vpop.f32.mrf.mxu3  ;;  %v2662_v43 = vpop.f32.mrf.mxu1  ;;  %v2514_v24 = vsel %vm5210_vm7, %v4565_v55, %v2513_v12  ;;  %v2561_v12 = vunpack.c.l.b16 %v2517_v35  ;;  %v3855_v35 = vrot.slane %v6206_v11, 5 }
 0x226   : > { %v3669_v54 = vadd.f32 %v3598_v28, %v3015_v58  ;;  %v3499_v58 = vunpack.c.l.b16 %v3390_v53  ;;  %v3898_v28 = vunpack.c.l.b16 %v3849_v38  ;;  %v3423_v53 = vrot.slane %v3421_v20, 5 }
 0x227   : > { %4807 = vmatmul.msk.bf16.gmra.mxu0 %vm668_vm4, %v3916_v13  ;;  %v2730_v4 = vadd.f32 %v2662_v43, %v5593_v1  ;;  %v2560_v19 = vunpack.c.l.b16 %v2514_v24  ;;  %v3414_v1 = vsel %vm5036_vm3, %v3409_v32, %v6200_v46 }
 0x228   : > { %v4067_v9 = vadd.f32 %v3996_v7, %v3669_v54  ;;  %v2946_v48 = vpop.f32.mrf.mxu2  ;;  %4581 = vmatmul.msk.bf16.gmra.mxu1 %vm668_vm4, %v2578_v5  ;;  %v3519_v5 = vpack.c.b16 %v3500_v23, %v3499_v58  ;;  %v3419_v54 = vrot.slane %v3418_v10, 4  ;;  %v4550_v23 = vld [vmem:[%s5024_s26 + $0xb4] sm:$0xe]  ;;  %v3501_v10 = vunpack.c.l.b16 %v3414_v1 }
 0x229   : > { %v3016_v13 = vadd.f32 %v2946_v48, %v2729_v41  ;;  %v6229_v41 = vld [vmem:[%s5024_s26 + $0xc4] sm:$0xf]  ;;  %v2579_v27 = vpack.c.b16 %v2561_v12, %v2560_v19 }
 0x22a   : > { %4100 = vst.msk [vmem:[%s6074_s13 + $0x30] sm:$0xff] %vm4093_vm8, %v4067_v9  ;;  %v3917_v9 = vpack.c.b16 %v3898_v28, %v3897_v0  ;;  %v3424_v43 = vsel %vm5036_vm3, %v3419_v54, %v3423_v53  ;;  %v3435_v57 = vshll.u32 %v6229_v41, 16  ;;  %v3439_v46 = vshrl.u32 %v6229_v41, 16  ;;  %v4938_v28 = vld [vmem:[%s5024_s26 + $0xbc] sm:$0x1] }
 0x22b   : > { %v3502_v20 = vunpack.c.l.b16 %v3424_v43  ;;  %v2522_v0 = vrot.slane %v2520_v62, 4  ;;  %v2523_v32 = vrot.slane %v4938_v28, 5 }
 0x22c   : > { %v3998_v40 = vpop.f32.mrf.mxu0 }
 0x22d   : > { %v3600_v63 = vpop.f32.mrf.mxu3  ;;  %4694 = vmatmul.msk.bf16.gmra.mxu2 %vm668_vm4, %v4859_v56  ;;  %v2664_v33 = vpop.f32.mrf.mxu1  ;;  %v3852_v56 = vrot.slane %v6183_v52, 5  ;;  %v4792_v52 = vrot.slane %v4776_v15, 9 }
 0x22e   : > { %v3670_v7 = vadd.f32 %v3600_v63, %v3016_v13  ;;  %v3426_v13 = vshrl.u32 %v4740_v39, 16  ;;  %v2731_v38 = vadd.f32 %v2664_v33, %v5607_v25  ;;  %v3441_v25 = vrot.slane %v3439_v46, 4  ;;  %v6253_v33 = vld [vmem:[%s5024_s26 + $0xc8] sm:$0x1] }
 0x22f   : > { %v3854_v24 = vrot.slane %v3852_v56, 4  ;;  %v3853_v19 = vsel %vm5210_vm7, %v4792_v52, %v3852_v56  ;;  %v3445_v15 = vshll.u32 %v6253_v33, 16 }
 0x230   : > { %v4068_v6 = vadd.f32 %v3998_v40, %v3670_v7  ;;  %v2949_v50 = vpop.f32.mrf.mxu2  ;;  %v4860_v7 = vld [vmem:[%s5024_s26 + $0xb4] sm:$0xff]  ;;  %v3428_v54 = vrot.slane %v3426_v13, 4  ;;  %v3899_v56 = vunpack.c.l.b16 %v3853_v19  ;;  %v6401_v13 = vld [vmem:[#allocation2_spill] sm:$0xff] }
 0x231   : > { %v3017_v45 = vadd.f32 %v2949_v50, %v2730_v4  ;;  %v6250_v4 = vrot.slane %v3435_v57, 5  ;;  %v3856_v11 = vsel %vm5210_vm7, %v3854_v24, %v3855_v35  ;;  %v4743_v24 = vld [vmem:[%s5024_s26 + $0xcc] sm:$0xf]  ;;  %v6274_v35 = vld [vmem:[%s5024_s26 + $0xd0] sm:$0xf] }
 0x232   : > { %4101 = vst.msk [vmem:[%s6074_s13 + $0x38] sm:$0xff] %vm4093_vm8, %v4068_v6  ;;  %4759 = vmatmul.msk.bf16.gmra.mxu3 %vm668_vm4, %v3519_v5  ;;  %v4566_v5 = vrot.slane %v4550_v23, 9  ;;  %v3431_v6 = vrot.slane %v3429_v31, 5  ;;  %v3459_v19 = vshll.u32 %v6274_v35, 16 }
 0x233   : > { %v3442_v43 = vor.u32 %v3441_v25, %v6250_v4  ;;  %v4551_v25 = vld [vmem:[%s5024_s26 + $0xc0] sm:$0xe] }
 0x234   : > { %v4001_v48 = vpop.f32.mrf.mxu0  ;;  %v3432_v1 = vor.u32 %v3431_v6, %v3428_v54 }
 0x235   : > { %v3603_v55 = vpop.f32.mrf.mxu3  ;;  %v2667_v42 = vpop.f32.mrf.mxu1 }
 0x236   : > { %v3671_v58 = vadd.f32 %v3603_v55, %v3017_v45  ;;  %v3520_v45 = vpack.c.b16 %v3502_v20, %v3501_v10  ;;  %v3900_v55 = vunpack.c.l.b16 %v3856_v11  ;;  %v3433_v46 = vrot.slane %v3432_v1, 4 }
 0x237   : > { %4808 = vmatmul.msk.bf16.gmra.mxu0 %vm668_vm4, %v3917_v9  ;;  %v2521_v9 = vsel %vm5210_vm7, %v4566_v5, %v2520_v62  ;;  %v3443_v10 = vrot.slane %v3442_v43, 4  ;;  %v3447_v20 = vrot.slane %v3445_v15, 5  ;;  %v3463_v11 = vshrl.u32 %v6274_v35, 16  ;;  %v4940_v15 = vld [vmem:[%s5024_s26 + $0xc8] sm:$0x1] }
 0x238   : > { %v4069_v40 = vadd.f32 %v4001_v48, %v3671_v58  ;;  %v2951_v63 = vpop.f32.mrf.mxu2  ;;  %4582 = vmatmul.msk.bf16.gmra.mxu1 %vm668_vm4, %v2579_v27  ;;  %v2524_v48 = vsel %vm5210_vm7, %v2522_v0, %v2523_v32  ;;  %v2732_v58 = vadd.f32 %v2667_v42, %v6401_v13  ;;  %v2562_v31 = vunpack.c.l.b16 %v2521_v9  ;;  %v4939_v0 = vld [vmem:[%s5024_s26 + $0xc4] sm:$0xf] }
 0x239   : > { %v3018_v53 = vadd.f32 %v2951_v63, %v2731_v38  ;;  %v2563_v62 = vunpack.c.l.b16 %v2524_v48  ;;  %v3918_v52 = vpack.c.b16 %v3900_v55, %v3899_v56  ;;  %v3859_v42 = vrot.slane %v6229_v41, 5 }
 0x23a   : > { %4102 = vst.msk [vmem:[%s6074_s13 + $0x40] sm:$0xff] %vm4093_vm8, %v4069_v40  ;;  %v4777_v40 = vld [vmem:[%s5024_s26 + $0xc0] sm:$0xe]  ;;  %v2527_v28 = vrot.slane %v4939_v0, 5  ;;  %v3438_v54 = vsel %vm5036_vm3, %v3433_v46, %v6250_v4  ;;  %v3450_v41 = vshrl.u32 %v4743_v24, 16  ;;  %v3862_v48 = vrot.slane %v6253_v33, 5 }
 0x23b   : > { %v2580_v63 = vpack.c.b16 %v2563_v62, %v2562_v31  ;;  %v4793_v6 = vrot.slane %v4777_v40, 9  ;;  %v3861_v4 = vrot.slane %v3859_v42, 4  ;;  %v4567_v1 = vrot.slane %v4551_v25, 9 }
 0x23c   : > { %v4003_v50 = vpop.f32.mrf.mxu0  ;;  %v2529_v43 = vrot.slane %v2527_v28, 4  ;;  %v2530_v56 = vrot.slane %v4940_v15, 5  ;;  %v3465_v31 = vrot.slane %v3463_v11, 4 }
 0x23d   : > { %v3605_v12 = vpop.f32.mrf.mxu3  ;;  %4695 = vmatmul.msk.bf16.gmra.mxu2 %vm668_vm4, %v4860_v7  ;;  %v2669_v39 = vpop.f32.mrf.mxu1  ;;  %v3863_v33 = vsel %vm5210_vm7, %v3861_v4, %v3862_v48  ;;  %v3866_v4 = vrot.slane %v6274_v35, 5 }
 0x23e   : > { %v3672_v27 = vadd.f32 %v3605_v12, %v3018_v53  ;;  %v3448_v53 = vsel %vm5036_vm3, %v3443_v10, %v3447_v20  ;;  %v2528_v20 = vsel %vm5210_vm7, %v4567_v1, %v2527_v28 }
 0x23f   : > { %v3504_v13 = vunpack.c.l.b16 %v3448_v53 }
 0x240   : > { %v4070_v61 = vadd.f32 %v4003_v50, %v3672_v27  ;;  %v2954_v23 = vpop.f32.mrf.mxu2  ;;  %v3453_v50 = vshll.u32 %v4743_v24, 16  ;;  %v4861_v27 = vld [vmem:[%s5024_s26 + $0xc0] sm:$0xff] }
 0x241   : > { %v3019_v57 = vadd.f32 %v2954_v23, %v2732_v58  ;;  %v3461_v23 = vrot.slane %v3459_v19, 5 }
 0x242   : > { %4103 = vst.msk [vmem:[%s6074_s13 + $0x48] sm:$0xff] %vm4093_vm8, %v4070_v61  ;;  %4760 = vmatmul.msk.bf16.gmra.mxu3 %vm668_vm4, %v3520_v45  ;;  %v2733_v45 = vadd.f32 %v2669_v39, %v5654_v47  ;;  %v3503_v61 = vunpack.c.l.b16 %v3438_v54  ;;  %v3860_v47 = vsel %vm5210_vm7, %v4793_v6, %v3859_v42  ;;  %v3452_v39 = vrot.slane %v3450_v41, 4 }
 0x243   : > { %v3455_v58 = vrot.slane %v3453_v50, 5  ;;  %v3902_v42 = vunpack.c.l.b16 %v3863_v33  ;;  %v2564_v6 = vunpack.c.l.b16 %v2528_v20 }
 0x244   : > { %v4006_v38 = vpop.f32.mrf.mxu0 }
 0x245   : > { %v3608_v7 = vpop.f32.mrf.mxu3  ;;  %v2672_v5 = vpop.f32.mrf.mxu1  ;;  %v3456_v24 = vor.u32 %v3455_v58, %v3452_v39 }
 0x246   : > { %v3673_v32 = vadd.f32 %v3608_v7, %v3019_v57  ;;  %v4745_v57 = vld [vmem:[%s5024_s26 + $0xd4] sm:$0x1]  ;;  %v3466_v7 = vor.u32 %v3465_v31, %v3461_v23  ;;  %v2734_v54 = vadd.f32 %v2672_v5, %v5665_v51 }
 0x247   : > { %4809 = vmatmul.msk.bf16.gmra.mxu0 %vm668_vm4, %v3918_v52  ;;  %v2531_v52 = vsel %vm5210_vm7, %v2529_v43, %v2530_v56  ;;  %v3469_v0 = vshll.u32 %v4745_v57, 16  ;;  %v3457_v50 = vrot.slane %v3456_v24, 4  ;;  %v6402_v56 = vld [vmem:[#allocation3_spill] sm:$0xff]  ;;  %v3869_v35 = vrot.slane %v4745_v57, 5 }
 0x248   : > { %v4071_v12 = vadd.f32 %v4006_v38, %v3673_v32  ;;  %v2956_v9 = vpop.f32.mrf.mxu2  ;;  %4583 = vmatmul.msk.bf16.gmra.mxu1 %vm668_vm4, %v2580_v63  ;;  %v3521_v38 = vpack.c.b16 %v3504_v13, %v3503_v61  ;;  %v3901_v63 = vunpack.c.l.b16 %v3860_v47  ;;  %v2565_v25 = vunpack.c.l.b16 %v2531_v52  ;;  %v4862_v47 = vld [vmem:[%s5024_s26 + $0xcc] sm:$0xff] }
 0x249   : > { %v3020_v55 = vadd.f32 %v2956_v9, %v2733_v45  ;;  %v3467_v19 = vrot.slane %v3466_v7, 4  ;;  %v3471_v11 = vrot.slane %v3469_v0, 5  ;;  %v4778_v9 = vld [vmem:[%s5024_s26 + $0xcc] sm:$0xe]  ;;  %v3868_v13 = vrot.slane %v3866_v4, 4 }
 0x24a   : > { %4104 = vst.msk [vmem:[%s6074_s13 + $0x50] sm:$0xff] %vm4093_vm8, %v4071_v12  ;;  %v3919_v41 = vpack.c.b16 %v3902_v42, %v3901_v63  ;;  %v2581_v45 = vpack.c.b16 %v2565_v25, %v2564_v6  ;;  %v4794_v43 = vrot.slane %v4778_v9, 9 }
 0x24b   : > { %v3472_v1 = vsel %vm5036_vm3, %v3467_v19, %v3471_v11 }
 0x24c   : > { %v4008_v62 = vpop.f32.mrf.mxu0  ;;  %v3506_v31 = vunpack.c.l.b16 %v3472_v1  ;;  %v3867_v36 = vsel %vm5210_vm7, %v4794_v43, %v3866_v4 }
 0x24d   : > { %v3610_v46 = vpop.f32.mrf.mxu3  ;;  %4696 = vmatmul.msk.bf16.gmra.mxu2 %vm668_vm4, %v4861_v27  ;;  %v2674_v10 = vpop.f32.mrf.mxu1  ;;  %v3462_v27 = vsel %vm5036_vm3, %v3457_v50, %v3461_v23  ;;  %v3903_v20 = vunpack.c.l.b16 %v3867_v36 }
 0x24e   : > { %v3674_v40 = vadd.f32 %v3610_v46, %v3020_v55  ;;  %v2735_v55 = vadd.f32 %v2674_v10, %v6402_v56  ;;  %v3505_v58 = vunpack.c.l.b16 %v3462_v27 }
 0x250   : > { %v4072_v32 = vadd.f32 %v4008_v62, %v3674_v40  ;;  %v2959_v53 = vpop.f32.mrf.mxu2  ;;  %v3870_v62 = vsel %vm5210_vm7, %v3868_v13, %v3869_v35  ;;  %v3522_v57 = vpack.c.b16 %v3506_v31, %v3505_v58 }
 0x251   : > { %v3021_v28 = vadd.f32 %v2959_v53, %v2734_v54  ;;  %v3904_v52 = vunpack.c.l.b16 %v3870_v62 }
 0x252   : > { %4105 = vst.msk [vmem:[%s6074_s13 + $0x58] sm:$0xff] %vm4093_vm8, %v4072_v32  ;;  %4761 = vmatmul.msk.bf16.gmra.mxu3 %vm668_vm4, %v3521_v38 }
 0x253   : > { %v3920_v18 = vpack.c.b16 %v3904_v52, %v3903_v20 }
 0x254   : > { %v4011_v12 = vpop.f32.mrf.mxu0 }
 0x255   : > { %v3613_v51 = vpop.f32.mrf.mxu3  ;;  %v2677_v5 = vpop.f32.mrf.mxu1 }
 0x256   : > { %v3675_v48 = vadd.f32 %v3613_v51, %v3021_v28  ;;  %v2736_v38 = vadd.f32 %v2677_v5, %v5701_v29 }
 0x257   : > { %4810 = vmatmul.msk.bf16.gmra.mxu0 %vm668_vm4, %v3919_v41 }
 0x258   : > { %v4073_v15 = vadd.f32 %v4011_v12, %v3675_v48  ;;  %v2961_v61 = vpop.f32.mrf.mxu2  ;;  %4584 = vmatmul.msk.bf16.gmra.mxu1 %vm668_vm4, %v2581_v45 }
 0x259   : > { %v3022_v39 = vadd.f32 %v2961_v61, %v2735_v55 }
 0x25a   : > { %4106 = vst.msk [vmem:[%s6074_s13 + $0x60] sm:$0xff] %vm4093_vm8, %v4073_v15 }
 0x25c   : > { %v4013_v23 = vpop.f32.mrf.mxu0 }
 0x25d   : > { %v3615_v33 = vpop.f32.mrf.mxu3  ;;  %4697 = vmatmul.msk.bf16.gmra.mxu2 %vm668_vm4, %v4862_v47  ;;  %v2679_v46 = vpop.f32.mrf.mxu1 }
 0x25e   : > { %v3676_v10 = vadd.f32 %v3615_v33, %v3022_v39  ;;  %v2737_v53 = vadd.f32 %v2679_v46, %v5725_v37 }
 0x260   : > { %v4074_v40 = vadd.f32 %v4013_v23, %v3676_v10  ;;  %v2964_v63 = vpop.f32.mrf.mxu2 }
 0x261   : > { %v3023_v42 = vadd.f32 %v2964_v63, %v2736_v38 }
 0x262   : > { %4107 = vst.msk [vmem:[%s6074_s13 + $0x68] sm:$0xff] %vm4093_vm8, %v4074_v40  ;;  %4762 = vmatmul.msk.bf16.gmra.mxu3 %vm668_vm4, %v3522_v57 }
 0x264   : > { %v4016_v24 = vpop.f32.mrf.mxu0 }
 0x265   : > { %v3618_v7 = vpop.f32.mrf.mxu3  ;;  %v2682_v0 = vpop.f32.mrf.mxu1 }
 0x266   : > { %v3677_v32 = vadd.f32 %v3618_v7, %v3023_v42  ;;  %v2738_v11 = vadd.f32 %v2682_v0, %v5744_v34 }
 0x267   : > { %4811 = vmatmul.msk.bf16.gmra.mxu0 %vm668_vm4, %v3920_v18 }
 0x268   : > { %v4075_v54 = vadd.f32 %v4016_v24, %v3677_v32  ;;  %v2966_v6 = vpop.f32.mrf.mxu2 }
 0x269   : > { %v3024_v29 = vadd.f32 %v2966_v6, %v2737_v53 }
 0x26a   : > { %4108 = vst.msk [vmem:[%s6074_s13 + $0x70] sm:$0xff] %vm4093_vm8, %v4075_v54 }
 0x26c   : > { %v4018_v25 = vpop.f32.mrf.mxu0 }
 0x26d   : > { %v3620_v28 = vpop.f32.mrf.mxu3  ;;  %v2684_v41 = vpop.f32.mrf.mxu1 }
 0x26e   : > { %v3678_v50 = vadd.f32 %v3620_v28, %v3024_v29  ;;  %v2739_v48 = vadd.f32 %v2684_v41, %v5768_v3 }
 0x270   : > { %v4076_v19 = vadd.f32 %v4018_v25, %v3678_v50  ;;  %v2969_v12 = vpop.f32.mrf.mxu2 }
 0x271   : > { %v3025_v45 = vadd.f32 %v2969_v12, %v2738_v11 }
 0x272   : > { %4109 = vst.msk [vmem:[%s6074_s13 + $0x78] sm:$0xff] %vm4093_vm8, %v4076_v19 }
 0x274   : > { %v4021_v9 = vpop.f32.mrf.mxu0 }
 0x275   : > { %v3623_v4 = vpop.f32.mrf.mxu3  ;;  %v2687_v37 = vpop.f32.mrf.mxu1 }
 0x276   : > { %v3679_v51 = vadd.f32 %v3623_v4, %v3025_v45  ;;  %v2740_v61 = vadd.f32 %v2687_v37, %v5787_v2 }
 0x278   : > { %v4077_v5 = vadd.f32 %v4021_v9, %v3679_v51  ;;  %v2971_v27 = vpop.f32.mrf.mxu2 }
 0x279   : > { %v3026_v1 = vadd.f32 %v2971_v27, %v2739_v48 }
 0x27a   : > { %4110 = vst.msk [vmem:[%s6074_s13 + $0x80] sm:$0xff] %vm4093_vm8, %v4077_v5 }
 0x27c   : > { %v4023_v43 = vpop.f32.mrf.mxu0 }
 0x27d   : > { %v3625_v15 = vpop.f32.mrf.mxu3  ;;  %v2689_v34 = vpop.f32.mrf.mxu1 }
 0x27e   : > { %v3680_v56 = vadd.f32 %v3625_v15, %v3026_v1  ;;  %v2741_v23 = vadd.f32 %v2689_v34, %v5811_v26 }
 0x280   : > { %v4078_v55 = vadd.f32 %v4023_v43, %v3680_v56  ;;  %v2974_v13 = vpop.f32.mrf.mxu2 }
 0x281   : > { %v3027_v35 = vadd.f32 %v2974_v13, %v2740_v61 }
 0x282   : > { %4111 = vst.msk [vmem:[%s6074_s13 + $0x88] sm:$0xff] %vm4093_vm8, %v4078_v55  ;;  %v6403_v55 = vld [vmem:[#allocation4_spill] sm:$0xff] }
 0x284   : > { %v4026_v47 = vpop.f32.mrf.mxu0 }
 0x285   : > { %v3628_v39 = vpop.f32.mrf.mxu3  ;;  %v2692_v3 = vpop.f32.mrf.mxu1 }
 0x286   : > { %v3681_v58 = vadd.f32 %v3628_v39, %v3027_v35  ;;  %v2742_v20 = vadd.f32 %v2692_v3, %v5830_v60 }
 0x288   : > { %v4079_v31 = vadd.f32 %v4026_v47, %v3681_v58  ;;  %v2976_v36 = vpop.f32.mrf.mxu2 }
 0x289   : > { %v3028_v62 = vadd.f32 %v2976_v36, %v2741_v23 }
 0x28a   : > { %4112 = vst.msk [vmem:[%s6074_s13 + $0x90] sm:$0xff] %vm4093_vm8, %v4079_v31 }
 0x28c   : > { %v4028_v33 = vpop.f32.mrf.mxu0 }
 0x28d   : > { %v3630_v46 = vpop.f32.mrf.mxu3  ;;  %v2694_v2 = vpop.f32.mrf.mxu1 }
 0x28e   : > { %v3682_v10 = vadd.f32 %v3630_v46, %v3028_v62  ;;  %v2743_v24 = vadd.f32 %v2694_v2, %v5854_v14 }
 0x290   : > { %v4080_v57 = vadd.f32 %v4028_v33, %v3682_v10  ;;  %v2979_v52 = vpop.f32.mrf.mxu2 }
 0x291   : > { %v3029_v40 = vadd.f32 %v2979_v52, %v2742_v20 }
 0x292   : > { %4113 = vst.msk [vmem:[%s6074_s13 + $0x98] sm:$0xff] %vm4093_vm8, %v4080_v57 }
 0x294   : > { %v4031_v38 = vpop.f32.mrf.mxu0 }
 0x295   : > { %v3633_v63 = vpop.f32.mrf.mxu3  ;;  %v2697_v26 = vpop.f32.mrf.mxu1 }
 0x296   : > { %v3683_v42 = vadd.f32 %v3633_v63, %v3029_v40  ;;  %v2744_v29 = vadd.f32 %v2697_v26, %v5873_v21 }
 0x298   : > { %v4081_v18 = vadd.f32 %v4031_v38, %v3683_v42  ;;  %v2981_v7 = vpop.f32.mrf.mxu2 }
 0x299   : > { %v3030_v0 = vadd.f32 %v2981_v7, %v2743_v24 }
 0x29a   : > { %4114 = vst.msk [vmem:[%s6074_s13 + $0xa0] sm:$0xff] %vm4093_vm8, %v4081_v18 }
 0x29c   : > { %v4033_v32 = vpop.f32.mrf.mxu0 }
 0x29d   : > { %v3635_v54 = vpop.f32.mrf.mxu3  ;;  %v2699_v60 = vpop.f32.mrf.mxu1 }
 0x29e   : > { %v3684_v53 = vadd.f32 %v3635_v54, %v3030_v0  ;;  %v2745_v12 = vadd.f32 %v2699_v60, %v5897_v49 }
 0x2a0   : > { %v4082_v6 = vadd.f32 %v4033_v32, %v3684_v53  ;;  %v2984_v25 = vpop.f32.mrf.mxu2 }
 0x2a1   : > { %v3031_v28 = vadd.f32 %v2984_v25, %v2744_v29 }
 0x2a2   : > { %4115 = vst.msk [vmem:[%s6074_s13 + $0xa8] sm:$0xff] %vm4093_vm8, %v4082_v6 }
 0x2a4   : > { %v4036_v41 = vpop.f32.mrf.mxu0 }
 0x2a5   : > { %v3638_v50 = vpop.f32.mrf.mxu3  ;;  %v2702_v14 = vpop.f32.mrf.mxu1 }
 0x2a6   : > { %v3685_v19 = vadd.f32 %v3638_v50, %v3031_v28  ;;  %v2746_v48 = vadd.f32 %v2702_v14, %v5916_v17 }
 0x2a8   : > { %v4083_v11 = vadd.f32 %v4036_v41, %v3685_v19  ;;  %v2986_v45 = vpop.f32.mrf.mxu2 }
 0x2a9   : > { %v3032_v9 = vadd.f32 %v2986_v45, %v2745_v12 }
 0x2aa   : > { %4116 = vst.msk [vmem:[%s6074_s13 + $0xb0] sm:$0xff] %vm4093_vm8, %v4083_v11 }
 0x2ac   : > { %v4038_v4 = vpop.f32.mrf.mxu0 }
 0x2ad   : > { %v3640_v37 = vpop.f32.mrf.mxu3  ;;  %v2704_v21 = vpop.f32.mrf.mxu1 }
 0x2ae   : > { %v3686_v51 = vadd.f32 %v3640_v37, %v3032_v9  ;;  %v2747_v61 = vadd.f32 %v2704_v21, %v6403_v55 }
 0x2b0   : > { %v4084_v5 = vadd.f32 %v4038_v4, %v3686_v51  ;;  %v2989_v27 = vpop.f32.mrf.mxu2 }
 0x2b1   : > { %v3033_v1 = vadd.f32 %v2989_v27, %v2746_v48 }
 0x2b2   : > { %4117 = vst.msk [vmem:[%s6074_s13 + $0xb8] sm:$0xff] %vm4093_vm8, %v4084_v5 }
 0x2b4   : > { %v4041_v43 = vpop.f32.mrf.mxu0 }
 0x2b5   : > { %v3643_v15 = vpop.f32.mrf.mxu3  ;;  %v2707_v49 = vpop.f32.mrf.mxu1 }
 0x2b6   : > { %v3687_v34 = vadd.f32 %v3643_v15, %v3033_v1  ;;  %v2748_v31 = vadd.f32 %v2707_v49, %v5957_v44 }
 0x2b8   : > { %v4085_v56 = vadd.f32 %v4041_v43, %v3687_v34  ;;  %v2991_v13 = vpop.f32.mrf.mxu2 }
 0x2b9   : > { %v3034_v35 = vadd.f32 %v2991_v13, %v2747_v61 }
 0x2ba   : > { %4118 = vst.msk [vmem:[%s6074_s13 + $0xc0] sm:$0xff] %vm4093_vm8, %v4085_v56 }
 0x2bc   : > { %v4043_v47 = vpop.f32.mrf.mxu0 }
 0x2bd   : > { %v3645_v39 = vpop.f32.mrf.mxu3  ;;  %v2709_v17 = vpop.f32.mrf.mxu1 }
 0x2be   : > { %v3688_v3 = vadd.f32 %v3645_v39, %v3034_v35  ;;  %v2749_v57 = vadd.f32 %v2709_v17, %v5978_v8 }
 0x2c0   : > { %v4086_v58 = vadd.f32 %v4043_v47, %v3688_v3  ;;  %v2994_v23 = vpop.f32.mrf.mxu2 }
 0x2c1   : > { %v3035_v36 = vadd.f32 %v2994_v23, %v2748_v31 }
 0x2c2   : > { %4119 = vst.msk [vmem:[%s6074_s13 + $0xc8] sm:$0xff] %vm4093_vm8, %v4086_v58 }
 0x2c4   : > { %v4046_v62 = vpop.f32.mrf.mxu0 }
 0x2c5   : > { %v3648_v33 = vpop.f32.mrf.mxu3  ;;  %v2712_v2 = vpop.f32.mrf.mxu1 }
 0x2c6   : > { %v3689_v46 = vadd.f32 %v3648_v33, %v3035_v36  ;;  %v2750_v26 = vadd.f32 %v2712_v2, %v5996_v30 }
 0x2c8   : > { %v4087_v10 = vadd.f32 %v4046_v62, %v3689_v46  ;;  %v2996_v20 = vpop.f32.mrf.mxu2 }
 0x2c9   : > { %v3036_v52 = vadd.f32 %v2996_v20, %v2749_v57 }
 0x2ca   : > { %4120 = vst.msk [vmem:[%s6074_s13 + $0xd0] sm:$0xff] %vm4093_vm8, %v4087_v10 }
 0x2cc   : > { %v4048_v40 = vpop.f32.mrf.mxu0 }
 0x2cd   : > { %v3650_v38 = vpop.f32.mrf.mxu3  ;;  %v2714_v18 = vpop.f32.mrf.mxu1 }
 0x2ce   : > { %v3690_v44 = vadd.f32 %v3650_v38, %v3036_v52  ;;  %v2751_v54 = vadd.f32 %v2714_v18, %v6019_v59 }
 0x2d0   : > { %v4088_v63 = vadd.f32 %v4048_v40, %v3690_v44  ;;  %v2999_v42 = vpop.f32.mrf.mxu2 }
 0x2d1   : > { %v3037_v24 = vadd.f32 %v2999_v42, %v2750_v26 }
 0x2d2   : > { %4121 = vst.msk [vmem:[%s6074_s13 + $0xd8] sm:$0xff] %vm4093_vm8, %v4088_v63 }
 0x2d4   : > { %v4051_v7 = vpop.f32.mrf.mxu0 }
 0x2d5   : > { %v3653_v0 = vpop.f32.mrf.mxu3  ;;  %v2717_v6 = vpop.f32.mrf.mxu1 }
 0x2d6   : > { %v3691_v8 = vadd.f32 %v3653_v0, %v3037_v24  ;;  %v2752_v41 = vadd.f32 %v2717_v6, %v6039_v22 }
 0x2d8   : > { %v4089_v32 = vadd.f32 %v4051_v7, %v3691_v8  ;;  %v3001_v60 = vpop.f32.mrf.mxu2 }
 0x2d9   : > { %v3038_v53 = vadd.f32 %v3001_v60, %v2751_v54 }
 0x2da   : > { %4122 = vst.msk [vmem:[%s6074_s13 + $0xe0] sm:$0xff] %vm4093_vm8, %v4089_v32 }
 0x2dc   : > { %v4053_v29 = vpop.f32.mrf.mxu0 }
 0x2dd   : > { %v3655_v30 = vpop.f32.mrf.mxu3  ;;  %v2719_v19 = vpop.f32.mrf.mxu1 }
 0x2de   : > { %v3692_v25 = vadd.f32 %v3655_v30, %v3038_v53  ;;  %v2753_v9 = vadd.f32 %v2719_v19, %v6059_v16 }
 0x2e0   : > { %v4090_v28 = vadd.f32 %v4053_v29, %v3692_v25  ;;  %v3004_v50 = vpop.f32.mrf.mxu2 }
 0x2e1   : > { %v3039_v14 = vadd.f32 %v3004_v50, %v2752_v41 }
 0x2e2   : > { %4123 = vst.msk [vmem:[%s6074_s13 + $0xe8] sm:$0xff] %vm4093_vm8, %v4090_v28 }
 0x2e4   : > { %v4056_v11 = vpop.f32.mrf.mxu0 }
 0x2e5   : > { %v3658_v59 = vpop.f32.mrf.mxu3 }
 0x2e6   : > { %v3693_v12 = vadd.f32 %v3658_v59, %v3039_v14 }
 0x2e8   : > { %v4091_v45 = vadd.f32 %v4056_v11, %v3693_v12  ;;  %v3006_v4 = vpop.f32.mrf.mxu2 }
 0x2e9   : > { %v3040_v37 = vadd.f32 %v3006_v4, %v2753_v9 }
 0x2ea   : > { %4124 = vst.msk [vmem:[%s6074_s13 + $0xf0] sm:$0xff] %vm4093_vm8, %v4091_v45 }
 0x2ec   : > { %v4058_v5 = vpop.f32.mrf.mxu0 }
 0x2ed   : > { %v3660_v21 = vpop.f32.mrf.mxu3 }
 0x2ee   : > { %v3694_v51 = vadd.f32 %v3660_v21, %v3040_v37 }
 0x2f0   : > { %v4092_v22 = vadd.f32 %v4058_v5, %v3694_v51 }
 0x2f2   : > { %4125 = vst.msk [vmem:[%s6074_s13 + $0xf8] sm:$0xff] %vm4093_vm8, %v4092_v22 }
 0x2f3 PF: > { %s12_s11 = sadd.s32 1, %s4963_s11   ;;  %s6404_s9 = smov %s4959_s10 }
 0x2f4   : > { %p9_p5 = scmp.ge.s32.totalorder %s12_s11, 4   ;;  %s6405_s10 = smov %s6407_s12 }
 0x2f6   :  { %11 = sbr.rel (!%p9_p5) target bundleno = 2 (0x2), region = 71 }

</bundles_post_ra>
